<compile_context>
chip_gen: v7x
topology: tpu7x:2x2x1
jax: 0.10.0
libtpu: 0.0.40
codegen_flags: <defaults>
</compile_context>

<pallas_src>
import functools

import jax
import jax.numpy as jnp
from jax.experimental import pallas as pl
from jax.experimental.pallas import tpu as pltpu


def _round_up(x, m):
    return ((x + m - 1) // m) * m


def _pad2d(a, rows, cols):
    pr, pc = rows - a.shape[0], cols - a.shape[1]
    if pr == 0 and pc == 0:
        return a
    return jnp.pad(a, ((0, pr), (0, pc)))


# --------------------------- support pass: S = X @ W ------------------------
def _support_kernel(x_ref, w_ref, s_ref):
    # x_ref: (TM, F_p) bf16, w_ref: (F_p, H_p) bf16 -> s_ref: (TM, H_p) bf16
    s_ref[...] = jnp.dot(
        x_ref[...], w_ref[...], preferred_element_type=jnp.float32
    ).astype(s_ref.dtype)


def _support(x_bf16, w_bf16, tile_m):
    n, f = x_bf16.shape
    h = w_bf16.shape[1]
    return pl.pallas_call(
        _support_kernel,
        out_shape=jax.ShapeDtypeStruct((n, h), jnp.bfloat16),
        grid_spec=pltpu.PrefetchScalarGridSpec(
            num_scalar_prefetch=0,
            grid=(n // tile_m,),
            in_specs=[
                pl.BlockSpec((tile_m, f), lambda i: (i, 0)),  # X row tile
                pl.BlockSpec((f, h), lambda i: (0, 0)),       # W resident
            ],
            out_specs=pl.BlockSpec((tile_m, h), lambda i: (i, 0)),
        ),
        compiler_params=pltpu.CompilerParams(
            dimension_semantics=("parallel",),
            vmem_limit_bytes=64 * 1024 * 1024,
        ),
    )(x_bf16, w_bf16)


# ------------------- aggregate pass 1: leaky_relu(adj @ S + b) ---------------
def _agg1_kernel(adj_ref, s_ref, b_ref, emb_ref):
    h = jnp.dot(
        adj_ref[...], s_ref[...], preferred_element_type=jnp.float32
    ) + b_ref[...]
    emb_ref[...] = jnp.where(h >= 0, h, 0.01 * h).astype(emb_ref.dtype)


# --------------- aggregate pass 2: softmax(adj @ S + b, axis=1) --------------
def _agg2_kernel(adj_ref, s_ref, b_ref, prob_ref, *, nclass):
    logits = jnp.dot(
        adj_ref[...], s_ref[...], preferred_element_type=jnp.float32
    ) + b_ref[...]
    # mask padded class lanes so they don't contribute to the softmax
    lane = jax.lax.broadcasted_iota(jnp.int32, logits.shape, 1)
    logits = jnp.where(lane < nclass, logits, -jnp.inf)
    m = jnp.max(logits, axis=1, keepdims=True)
    e = jnp.exp(logits - m)
    denom = jnp.sum(e, axis=1, keepdims=True)
    prob_ref[...] = (e * pl.reciprocal(denom, approx=True)).astype(prob_ref.dtype)


def _aggregate(adj_bf16, support_bf16, bias_f32, kernel, tile_m):
    n = adj_bf16.shape[0]
    h = support_bf16.shape[1]
    return pl.pallas_call(
        kernel,
        out_shape=jax.ShapeDtypeStruct((n, h), jnp.float32),
        grid_spec=pltpu.PrefetchScalarGridSpec(
            num_scalar_prefetch=0,
            grid=(n // tile_m,),
            in_specs=[
                pl.BlockSpec((tile_m, n), lambda i: (i, 0)),  # adj row tile
                pl.BlockSpec((n, h), lambda i: (0, 0)),       # support resident
                pl.BlockSpec((1, h), lambda i: (0, 0)),       # bias resident
            ],
            out_specs=pl.BlockSpec((tile_m, h), lambda i: (i, 0)),
        ),
        compiler_params=pltpu.CompilerParams(
            dimension_semantics=("parallel",),
            vmem_limit_bytes=64 * 1024 * 1024,
        ),
    )(adj_bf16, support_bf16, bias_f32)


@functools.partial(jax.jit, static_argnames=("tile_m",))
def gcn1_forward(x, adj, w1, b1, w2, b2, *, tile_m=256):
    n, nfeat = x.shape
    nhid = w1.shape[1]
    nclass = w2.shape[1]

    # Lane-dense padding: feature/hidden/class dims -> multiples of 128,
    # node count -> multiple of the row tile (tile is itself a multiple of 8).
    tile_m = min(tile_m, _round_up(n, 8))
    n_p = _round_up(n, tile_m)
    f_p = _round_up(nfeat, 128)
    h_p = _round_up(nhid, 128)
    c_p = _round_up(nclass, 128)

    # MXU operands in bf16 (f32 accumulation); biases stay f32.
    x_p = _pad2d(x, n_p, f_p).astype(jnp.bfloat16)
    adj_p = _pad2d(adj, n_p, n_p).astype(jnp.bfloat16)
    w1_p = _pad2d(w1, f_p, h_p).astype(jnp.bfloat16)
    w2_p = _pad2d(w2, h_p, c_p).astype(jnp.bfloat16)
    b1_p = _pad2d(b1.reshape(1, -1), 1, h_p).astype(jnp.float32)
    b2_p = _pad2d(b2.reshape(1, -1), 1, c_p).astype(jnp.float32)

    # layer 1: support once, then row-tiled aggregation + leaky_relu
    s1 = _support(x_p, w1_p, tile_m)                               # [n_p, h_p] bf16
    emb_p = _aggregate(adj_p, s1, b1_p, _agg1_kernel, tile_m)      # [n_p, h_p] f32

    # layer 2: support once on the embedding, then aggregation + softmax
    s2 = _support(emb_p.astype(jnp.bfloat16), w2_p, tile_m)        # [n_p, c_p] bf16
    agg2 = functools.partial(_agg2_kernel, nclass=nclass)
    probs_p = _aggregate(adj_p, s2, b2_p, agg2, tile_m)            # [n_p, c_p] f32

    return probs_p[:n, :nclass], emb_p[:n, :nhid]


def _reference(x, adj, w1, b1, w2, b2):
    """Pure-JAX reference mirroring the kernel's bf16/f32 precision choices."""
    xb, adjb = x.astype(jnp.bfloat16), adj.astype(jnp.bfloat16)
    w1b, w2b = w1.astype(jnp.bfloat16), w2.astype(jnp.bfloat16)
    s1 = jnp.dot(xb, w1b, preferred_element_type=jnp.float32).astype(jnp.bfloat16)
    h1 = jnp.dot(adjb, s1, preferred_element_type=jnp.float32) + b1
    y = jnp.where(h1 >= 0, h1, 0.01 * h1)
    s2 = jnp.dot(
        y.astype(jnp.bfloat16), w2b, preferred_element_type=jnp.float32
    ).astype(jnp.bfloat16)
    logits = jnp.dot(adjb, s2, preferred_element_type=jnp.float32) + b2
    return jax.nn.softmax(logits, axis=1), y


if __name__ == "__main__":
    # Small (but tiling-exercising) shapes consistent with the module:
    # N nodes, nfeat input features, nhid hidden, nclass classes.
    N, NFEAT, NHID, NCLASS = 512, 64, 64, 8

    key = jax.random.PRNGKey(0)
    kx, kadj, kw1, kb1, kw2, kb2 = jax.random.split(key, 6)

    x = jax.random.normal(kx, (N, NFEAT), dtype=jnp.float32)

    # symmetric, row-normalized adjacency (with self loops), as a GCN would use
    a = jax.random.uniform(kadj, (N, N), dtype=jnp.float32)
    a = (a + a.T) * 0.5 + jnp.eye(N, dtype=jnp.float32)
    adj = a / jnp.sum(a, axis=1, keepdims=True)

    # pygcn-style init: uniform(-stdv, stdv), stdv = 1/sqrt(fan_out)
    stdv1 = 1.0 / jnp.sqrt(jnp.float32(NHID))
    stdv2 = 1.0 / jnp.sqrt(jnp.float32(NCLASS))
    w1 = jax.random.uniform(kw1, (NFEAT, NHID), jnp.float32, -stdv1, stdv1)
    b1 = jax.random.uniform(kb1, (1, NHID), jnp.float32, -stdv1, stdv1)
    w2 = jax.random.uniform(kw2, (NHID, NCLASS), jnp.float32, -stdv2, stdv2)
    b2 = jax.random.uniform(kb2, (1, NCLASS), jnp.float32, -stdv2, stdv2)

    probs, emb = jax.block_until_ready(
        gcn1_forward(x, adj, w1, b1, w2, b2, tile_m=256)
    )

    probs_ref, emb_ref = _reference(x, adj, w1, b1, w2, b2)

    assert probs.shape == (N, NCLASS) and emb.shape == (N, NHID)
    assert jnp.allclose(emb, emb_ref, atol=2e-3, rtol=2e-3)
    assert jnp.allclose(probs, probs_ref, atol=2e-3, rtol=2e-3)
    assert jnp.allclose(jnp.sum(probs, axis=1), 1.0, atol=2e-3)

    print("KERNEL_OK")
</pallas_src>

<mosaic_0001>
module attributes {stable_mosaic.version = 11 : i64} {
  func.func @_support_kernel(%arg0: i32, %arg1: memref<256x128xbf16, #tpu.memory_space<vmem>>, %arg2: memref<128x128xbf16, #tpu.memory_space<vmem>>, %arg3: memref<256x128xbf16, #tpu.memory_space<vmem>>) attributes {dimension_semantics = [#tpu.dimension_semantics<parallel>], iteration_bounds = array<i64: 2>, scalar_prefetch = 0 : i64, scratch_operands = 0 : i64, tpu.core_type = #tpu.core_type<tc>, window_params = [{transform_indices = @transform_0, window_bounds = array<i64: 256, 128>}, {pipeline_mode = #tpu.pipeline_mode<synchronous>, transform_indices = @transform_1, window_bounds = array<i64: 128, 128>}, {transform_indices = @transform_2, window_bounds = array<i64: 256, 128>}]} {
    %c0 = arith.constant 0 : index
    %c0_0 = arith.constant 0 : index
    %0 = vector.load %arg1[%c0, %c0_0] : memref<256x128xbf16, #tpu.memory_space<vmem>>, vector<256x128xbf16>
    %c0_1 = arith.constant 0 : index
    %c0_2 = arith.constant 0 : index
    %1 = vector.load %arg2[%c0_1, %c0_2] : memref<128x128xbf16, #tpu.memory_space<vmem>>, vector<128x128xbf16>
    %cst = arith.constant dense<0.000000e+00> : vector<256x128xf32>
    %2 = tpu.matmul %0, %1, %cst {dimension_numbers = #tpu.dot_dimension_numbers<[1], [0], [0], [1], [0, 0, 1, 1], [], []>} : vector<256x128xbf16>, vector<128x128xbf16>, vector<256x128xf32> -> vector<256x128xf32>
    %3 = arith.truncf %2 : vector<256x128xf32> to vector<256x128xbf16>
    %c0_3 = arith.constant 0 : index
    %c0_4 = arith.constant 0 : index
    %4 = vector.load %arg3[%c0_3, %c0_4] : memref<256x128xbf16, #tpu.memory_space<vmem>>, vector<256x128xbf16>
    tpu.vector_store %arg3[%c0_3, %c0_4], %3 {strides = array<i32>} : memref<256x128xbf16, #tpu.memory_space<vmem>>, vector<256x128xbf16>,
    return
  }
  func.func @transform_0(%arg0: i32) -> (i32, i32) {
    %c0_i32 = arith.constant 0 : i32
    %c0_i32_0 = arith.constant 0 : i32
    return %arg0, %c0_i32 : i32, i32
  }
  func.func @transform_1(%arg0: i32) -> (i32, i32) {
    %c0_i32 = arith.constant 0 : i32
    %c0_i32_0 = arith.constant 0 : i32
    %c0_i32_1 = arith.constant 0 : i32
    return %c0_i32, %c0_i32_0 : i32, i32
  }
  func.func @transform_2(%arg0: i32) -> (i32, i32) {
    %c0_i32 = arith.constant 0 : i32
    %c0_i32_0 = arith.constant 0 : i32
    return %arg0, %c0_i32 : i32, i32
  }
}

module attributes {stable_mosaic.version = 11 : i64} {
  func.func @_agg1_kernel(%arg0: i32, %arg1: memref<256x512xbf16, #tpu.memory_space<vmem>>, %arg2: memref<512x128xbf16, #tpu.memory_space<vmem>>, %arg3: memref<1x128xf32, #tpu.memory_space<vmem>>, %arg4: memref<256x128xf32, #tpu.memory_space<vmem>>) attributes {dimension_semantics = [#tpu.dimension_semantics<parallel>], iteration_bounds = array<i64: 2>, scalar_prefetch = 0 : i64, scratch_operands = 0 : i64, tpu.core_type = #tpu.core_type<tc>, window_params = [{transform_indices = @transform_0, window_bounds = array<i64: 256, 512>}, {pipeline_mode = #tpu.pipeline_mode<synchronous>, transform_indices = @transform_1, window_bounds = array<i64: 512, 128>}, {pipeline_mode = #tpu.pipeline_mode<synchronous>, transform_indices = @transform_2, window_bounds = array<i64: 1, 128>}, {transform_indices = @transform_3, window_bounds = array<i64: 256, 128>}]} {
    %c0 = arith.constant 0 : index
    %c0_0 = arith.constant 0 : index
    %0 = vector.load %arg1[%c0, %c0_0] : memref<256x512xbf16, #tpu.memory_space<vmem>>, vector<256x512xbf16>
    %c0_1 = arith.constant 0 : index
    %c0_2 = arith.constant 0 : index
    %1 = vector.load %arg2[%c0_1, %c0_2] : memref<512x128xbf16, #tpu.memory_space<vmem>>, vector<512x128xbf16>
    %cst = arith.constant dense<0.000000e+00> : vector<256x128xf32>
    %2 = tpu.matmul %0, %1, %cst {dimension_numbers = #tpu.dot_dimension_numbers<[1], [0], [0], [1], [0, 0, 1, 1], [], []>} : vector<256x512xbf16>, vector<512x128xbf16>, vector<256x128xf32> -> vector<256x128xf32>
    %c0_3 = arith.constant 0 : index
    %c0_4 = arith.constant 0 : index
    %3 = vector.load %arg3[%c0_3, %c0_4] : memref<1x128xf32, #tpu.memory_space<vmem>>, vector<1x128xf32>
    %4 = vector.broadcast %3 : vector<1x128xf32> to vector<256x128xf32>
    %5 = arith.addf %2, %4 : vector<256x128xf32>
    %cst_5 = arith.constant 0.000000e+00 : f32
    %6 = vector.broadcast %cst_5 : f32 to vector<256x128xf32>
    %7 = arith.cmpf oge, %5, %6 : vector<256x128xf32>
    %cst_6 = arith.constant 0.00999999977 : f32
    %8 = vector.broadcast %cst_6 : f32 to vector<256x128xf32>
    %9 = arith.mulf %8, %5 : vector<256x128xf32>
    %10 = arith.select %7, %5, %9 : vector<256x128xi1>, vector<256x128xf32>
    %c0_7 = arith.constant 0 : index
    %c0_8 = arith.constant 0 : index
    %11 = vector.load %arg4[%c0_7, %c0_8] : memref<256x128xf32, #tpu.memory_space<vmem>>, vector<256x128xf32>
    tpu.vector_store %arg4[%c0_7, %c0_8], %10 {strides = array<i32>} : memref<256x128xf32, #tpu.memory_space<vmem>>, vector<256x128xf32>,
    return
  }
  func.func @transform_0(%arg0: i32) -> (i32, i32) {
    %c0_i32 = arith.constant 0 : i32
    %c0_i32_0 = arith.constant 0 : i32
    return %arg0, %c0_i32 : i32, i32
  }
  func.func @transform_1(%arg0: i32) -> (i32, i32) {
    %c0_i32 = arith.constant 0 : i32
    %c0_i32_0 = arith.constant 0 : i32
    %c0_i32_1 = arith.constant 0 : i32
    return %c0_i32, %c0_i32_0 : i32, i32
  }
  func.func @transform_2(%arg0: i32) -> (i32, i32) {
    %c0_i32 = arith.constant 0 : i32
    %c0_i32_0 = arith.constant 0 : i32
    %c0_i32_1 = arith.constant 0 : i32
    return %c0_i32, %c0_i32_0 : i32, i32
  }
  func.func @transform_3(%arg0: i32) -> (i32, i32) {
    %c0_i32 = arith.constant 0 : i32
    %c0_i32_0 = arith.constant 0 : i32
    return %arg0, %c0_i32 : i32, i32
  }
}

module attributes {stable_mosaic.version = 11 : i64} {
  func.func @_agg2_kernel(%arg0: i32, %arg1: memref<256x512xbf16, #tpu.memory_space<vmem>>, %arg2: memref<512x128xbf16, #tpu.memory_space<vmem>>, %arg3: memref<1x128xf32, #tpu.memory_space<vmem>>, %arg4: memref<256x128xf32, #tpu.memory_space<vmem>>) attributes {dimension_semantics = [#tpu.dimension_semantics<parallel>], iteration_bounds = array<i64: 2>, scalar_prefetch = 0 : i64, scratch_operands = 0 : i64, tpu.core_type = #tpu.core_type<tc>, window_params = [{transform_indices = @transform_0, window_bounds = array<i64: 256, 512>}, {pipeline_mode = #tpu.pipeline_mode<synchronous>, transform_indices = @transform_1, window_bounds = array<i64: 512, 128>}, {pipeline_mode = #tpu.pipeline_mode<synchronous>, transform_indices = @transform_2, window_bounds = array<i64: 1, 128>}, {transform_indices = @transform_3, window_bounds = array<i64: 256, 128>}]} {
    %c0 = arith.constant 0 : index
    %c0_0 = arith.constant 0 : index
    %0 = vector.load %arg1[%c0, %c0_0] : memref<256x512xbf16, #tpu.memory_space<vmem>>, vector<256x512xbf16>
    %c0_1 = arith.constant 0 : index
    %c0_2 = arith.constant 0 : index
    %1 = vector.load %arg2[%c0_1, %c0_2] : memref<512x128xbf16, #tpu.memory_space<vmem>>, vector<512x128xbf16>
    %cst = arith.constant dense<0.000000e+00> : vector<256x128xf32>
    %2 = tpu.matmul %0, %1, %cst {dimension_numbers = #tpu.dot_dimension_numbers<[1], [0], [0], [1], [0, 0, 1, 1], [], []>} : vector<256x512xbf16>, vector<512x128xbf16>, vector<256x128xf32> -> vector<256x128xf32>
    %c0_3 = arith.constant 0 : index
    %c0_4 = arith.constant 0 : index
    %3 = vector.load %arg3[%c0_3, %c0_4] : memref<1x128xf32, #tpu.memory_space<vmem>>, vector<1x128xf32>
    %4 = vector.broadcast %3 : vector<1x128xf32> to vector<256x128xf32>
    %5 = arith.addf %2, %4 : vector<256x128xf32>
    %6 = tpu.iota {dimensions = array<i32: 1>} : vector<256x128xi32>
    %c8_i32 = arith.constant 8 : i32
    %7 = vector.broadcast %c8_i32 : i32 to vector<256x128xi32>
    %8 = arith.cmpi slt, %6, %7 : vector<256x128xi32>
    %cst_5 = arith.constant 0xFF800000 : f32
    %9 = vector.broadcast %cst_5 : f32 to vector<256x128xf32>
    %10 = arith.select %8, %5, %9 : vector<256x128xi1>, vector<256x128xf32>
    %cst_6 = arith.constant dense<0xFF800000> : vector<256xf32>
    %11 = vector.multi_reduction <maximumf>, %10, %cst_6 [1] : vector<256x128xf32> to vector<256xf32>
    %12 = vector.shape_cast %11 : vector<256xf32> to vector<256x1xf32>
    %13 = vector.broadcast %12 : vector<256x1xf32> to vector<256x128xf32>
    %14 = arith.subf %10, %13 : vector<256x128xf32>
    %15 = math.exp %14 : vector<256x128xf32>
    %cst_7 = arith.constant dense<0.000000e+00> : vector<256xf32>
    %16 = vector.multi_reduction <add>, %15, %cst_7 [1] : vector<256x128xf32> to vector<256xf32>
    %17 = vector.shape_cast %16 : vector<256xf32> to vector<256x1xf32>
    %18 = tpu.reciprocal %17 {approx = true} : vector<256x1xf32> -> vector<256x1xf32>
    %19 = vector.broadcast %18 : vector<256x1xf32> to vector<256x128xf32>
    %20 = arith.mulf %15, %19 : vector<256x128xf32>
    %c0_8 = arith.constant 0 : index
    %c0_9 = arith.constant 0 : index
    %21 = vector.load %arg4[%c0_8, %c0_9] : memref<256x128xf32, #tpu.memory_space<vmem>>, vector<256x128xf32>
    tpu.vector_store %arg4[%c0_8, %c0_9], %20 {strides = array<i32>} : memref<256x128xf32, #tpu.memory_space<vmem>>, vector<256x128xf32>,
    return
  }
  func.func @transform_0(%arg0: i32) -> (i32, i32) {
    %c0_i32 = arith.constant 0 : i32
    %c0_i32_0 = arith.constant 0 : i32
    return %arg0, %c0_i32 : i32, i32
  }
  func.func @transform_1(%arg0: i32) -> (i32, i32) {
    %c0_i32 = arith.constant 0 : i32
    %c0_i32_0 = arith.constant 0 : i32
    %c0_i32_1 = arith.constant 0 : i32
    return %c0_i32, %c0_i32_0 : i32, i32
  }
  func.func @transform_2(%arg0: i32) -> (i32, i32) {
    %c0_i32 = arith.constant 0 : i32
    %c0_i32_0 = arith.constant 0 : i32
    %c0_i32_1 = arith.constant 0 : i32
    return %c0_i32, %c0_i32_0 : i32, i32
  }
  func.func @transform_3(%arg0: i32) -> (i32, i32) {
    %c0_i32 = arith.constant 0 : i32
    %c0_i32_0 = arith.constant 0 : i32
    return %arg0, %c0_i32 : i32, i32
  }
}

</mosaic_0001>

<bundles_post_ra>
// kernel: gcn1_forward.4
= control target key start
LH: loop header
LB: loop body
LE: loop exit
PB: predicated region body
PF: predicated region fallthrough
CT: control target
= control target key end

     0   :  { %7 = vsyncpa [#allocation3], 0  ;;  %s1564_s0 = inlined_call_operand.hbm [shape: bf16[512,128], index: 0, kind: input, shape index: {}]   ;;  %s1565_s1 = inlined_call_operand.hbm [shape: bf16[128,128], index: 1, kind: input, shape index: {}]   ;;  %s1566_s2 = inlined_call_operand.hbm [shape: bf16[512,128], index: 2, kind: output, shape index: {}]  }
   0x1   :  { %9 = vsyncpa [#allocation3 + $0x1], 0 }
   0x2   :  { %10 = vsyncpa [#allocation6], 0 }
   0x3   :  { %11 = vsyncpa [#allocation4], 0 }
   0x4   :  { %13 = vsyncpa [#allocation4 + $0x1], 0  ;;  %s1316_s9 = smov 0   ;;  %s1318_s10 = smov 0  }
   0x5   :  { %s1320_s11 = smov 0   ;;  %s1322_s12 = smov 0  }
   0x6 LB: > { %s1337_s13 = sadd.s32 4294967295, %s1292_s12   ;;  %s790_s14 = sadd.s32 4294967294, %s1292_s12   ;;  %s1292_s12 = sphi %s1322_s12, %s1586_s12   ;;  %s1288_s11 = sphi %s1320_s11, %s1585_s11   ;;  %s1284_s10 = sphi %s1318_s10, %s1584_s10   ;;  %s1280_s9 = sphi %s1316_s9, %s1583_s9  }
   0x7   : > { %p39_p0 = scmp.ne.s32.totalorder %s1284_s10, %s1280_s9  ;;  %p1567_p1 = scmp.eq.s32.totalorder %s1337_s13, 0 }
   0x8   : > { %p90_p3 = scmp.eq.s32.totalorder %s790_s14, 1  ;;  %p791_p5 = scmp.ge.s32.totalorder %s1292_s12, 1 }
   0x9   : > { %p1346_p4 = por %p1567_p1, %p39_p0  ;;  %p97_p7 = scmp.lt.s32.totalorder %s1292_s12, 3 }
   0xa   : > { %p1351_p6 = por %p90_p3, %p39_p0  ;;  %s1294_s18 = smov [#allocation5]  }
   0xb   : > { %s1570_s15 = scalar_select %p1346_p4, 1, 0 }
   0xc   : > { %s1571_s16 = scalar_select %p1351_p6, 1, 0 }
   0xd   : > { %p1356_p8 = pnand %p791_p5, %p97_p7  ;;  %s109_s19 = sshll.u32 %s1294_s18, 4  ;;  %s1360_s19 = int_to_ptr.vmem [resolvable:$true] %s109_s19 }
   0xe   : > { %s1372_s21 = sadd.s32 1, %s1292_s12   ;;  %s26_s22 = sadd.s32 1, %s1288_s11 }
   0xf   : > { %s1572_s17 = scalar_select %p1356_p8, 1, 0 }
  0x10   : > { %p1087_p9 = pneg %p1356_p8  ;;  %s23_s23 = ssub.s32 %s1292_s12, %s1372_s21 }
  0x11   : > { %s1164_s26 = scalar_lea.hbm %s1565_s1, 1024 }
  0x12   : > { %p1367_p11 = pnand %p1087_p9, %p1567_p1  ;;  %p1165_p12 = scmp.ne.s32.totalorder %s1565_s1, %s1164_s26 }
  0x13   : > { %p1171_p5 = scmp.lt.u32.totalorder %s1164_s26, %s1565_s1 }
  0x14   : > { %p1166_p13 = pneg %p1367_p11 }
  0x16   : > { %p1167_p0 = pnand %p1166_p13, %p1165_p12 }
  0x18   : > { %p1168_p3 = pneg %p1167_p0 }
  0x1a   : > { %p1173_p7 = pnand %p1171_p5, %p1168_p3 }
  0x1c   : > { %1176 = shalt.err (!%p1173_p7)
}
  0x1d   : > { %s1177_s3 = scalar_lea.vmem %s1360_s19, 1024  ;;  %p1185_p2 = scmp.lt.s32.totalorder %s1360_s19, %s1360_s19 }
  0x1e   : > { %p1178_p9 = scmp.ne.s32.totalorder %s1360_s19, %s1177_s3  ;;  %p1186_p6 = scmp.lt.s32.totalorder %s1177_s3, %s1177_s3 }
  0x20   : > { %p1180_p10 = pnand %p1178_p9, %p1166_p13  ;;  %p1187_p4 = por %p1186_p6, %p1185_p2 }
  0x22   : > { %p1181_p1 = pneg %p1180_p10 }
  0x24   : > { %p1188_p8 = pnand %p1187_p4, %p1181_p1 }
  0x26   : > { %1191 = shalt.err (!%p1188_p8)
}
  0x27   : > { %s1295_s4 = smov 64   ;;  %s1296_s5 = smov 4  }
  0x28   : > { %1090 = dma.hbm_to_vmem [thread:$0]  (!%p1367_p11), %s1565_s1, 1024, %s1360_s19, [#allocation6], %s1295_s4, %s1295_s4, %s1296_s5  }
  0x29   : > { %p24_p1 = scmp.eq.s32.totalorder %s23_s23, 0  ;;  %p33_p2 = scmp.ne.s32.totalorder %s1288_s11, %s1284_s10 }
  0x2a   : > { %p34_p4 = scmp.eq.s32.totalorder %s1292_s12, 0  ;;  %p1100_p6 = scmp.lt.s32.totalorder %s1292_s12, 2 }
  0x2b   : > { %s1406_s8 = scalar_select %p24_p1, %s1288_s11, %s26_s22  }
  0x2c   : > { %p35_p8 = por %p34_p4, %p33_p2  ;;  %p1574_p10 = scmp.eq.s32.totalorder %s1337_s13, 1 }
  0x2d   : > { %s123_s18 = sand.u32 1, %s1288_s11   ;;  %s862_s20 = sshll.u32 %s1292_s12, 11 }
  0x2e   : > { %p1410_p12 = por %p1574_p10, %p33_p2  ;;  %s794_s24 = sshll.u32 %s123_s18, 7 }
  0x2f   : > { %s1419_s27 = scalar_lea.hbm %s1564_s0, %s862_s20  ;;  %s127_s19 = scalar_lea.vmem [#allocation2], %s794_s24 }
  0x30   : > { %s134_s22 = sshll.u32 %s127_s19, 4  ;;  %p1421_p11 = pnand %p1100_p6, %p35_p8  ;;  %s1425_s22 = int_to_ptr.vmem [resolvable:$true] %s134_s22 }
  0x31   : > { %s1427_s28 = scalar_lea.sflag [#allocation3], %s123_s18  ;;  %s1192_s29 = scalar_lea.hbm %s1419_s27, 2048 }
  0x32   : > { %p1193_p13 = scmp.ne.s32.totalorder %s1419_s27, %s1192_s29  ;;  %p1194_p0 = pneg %p1421_p11 }
  0x33   : > { %s1197_s6 = scalar_lea.hbm %s1564_s0, 4096  ;;  %p1198_p7 = scmp.lt.u32.totalorder %s1419_s27, %s1564_s0 }
  0x34   : > { %p1195_p3 = pnand %p1194_p0, %p1193_p13  ;;  %p1199_p9 = scmp.lt.u32.totalorder %s1197_s6, %s1192_s29 }
  0x35   : > { %p1201_p2 = scmp.lt.u32.totalorder %s1192_s29, %s1419_s27 }
  0x36   : > { %p1196_p5 = pneg %p1195_p3  ;;  %p1200_p1 = por %p1199_p9, %p1198_p7 }
  0x38   : > { %p1202_p4 = por %p1201_p2, %p1200_p1 }
  0x3a   : > { %p1203_p6 = pnand %p1202_p4, %p1196_p5 }
  0x3c   : > { %1206 = shalt.err (!%p1203_p6)
}
  0x3d   : > { %s1207_s18 = scalar_lea.vmem %s1425_s22, 2048  ;;  %s1297_s24 = smov [#allocation2]  }
  0x3e   : > { %p1208_p8 = scmp.ne.s32.totalorder %s1425_s22, %s1207_s18  ;;  %s1212_s25 = sshll.u32 %s1297_s24, 4  ;;  %s1213_s25 = int_to_ptr.vmem [resolvable:$false] %s1212_s25 }
  0x3f   : > { %s1214_s26 = scalar_lea.vmem %s1213_s25, 4096  ;;  %p1215_p3 = scmp.lt.s32.totalorder %s1425_s22, %s1213_s25 }
  0x40   : > { %p1210_p10 = pnand %p1208_p8, %p1194_p0  ;;  %p1216_p7 = scmp.lt.s32.totalorder %s1214_s26, %s1207_s18 }
  0x42   : > { %p1211_p13 = pneg %p1210_p10  ;;  %p1217_p9 = por %p1216_p7, %p1215_p3 }
  0x44   : > { %p1218_p1 = pnand %p1217_p9, %p1211_p13 }
  0x46   : > { %1221 = shalt.err (!%p1218_p1)
}
  0x47   : > { %1094 = dma.hbm_to_vmem [thread:$0]  (!%p1421_p11), %s1419_s27, 2048, %s1425_s22, %s1427_s28, %s1295_s4, %s1295_s4, %s1296_s5  }
  0x48   : > { %p1577_p0 = scmp.ne.s32.totalorder %s1572_s17, 0 }
  0x49   : > { %s1461_s19 = sand.u32 (!%p1577_p0), 1, %s1284_s10   ;;  %p1578_p5 = scmp.ne.s32.totalorder (!%p1577_p0), %s1570_s15, 0 }
  0x4a   : > { %146 = sbr.rel (%p1577_p0) target bundleno = 374 (0x176), region = 28  ;;  %s798_s29 = sshll.u32 (!%p1577_p0), %s1461_s19, 7 }
  0x4b   : > { %s149_s30 = scalar_lea.sflag (!%p1577_p0), [#allocation3], %s1461_s19  ;;  %s1467_s23 = scalar_lea.vmem (!%p1577_p0), [#allocation2], %s798_s29 }
  0x51   : > { %1267 = dma.done.wait (%p1578_p5), %s149_s30, 2048  }
  0x52   : > { %1269 = vsyncadd (%p1578_p5), %s149_s30, 4294965248  ;;  %p1579_p11 = scmp.eq.s32.totalorder %s1337_s13, 0 }
  0x54   : > { %1271 = dma.done.wait (%p1579_p11), [#allocation6], 1024   ;;  %p1580_p2 = pmov %p1579_p11 }
  0x55   : > { %v1140_v0 = vld [vmem:[#allocation5] sm:$0xff]   ;;  %v1141_v1 = vld [vmem:[#allocation5 + $0x8] sm:$0xff]   ;;  %v1142_v2 = vld [vmem:[#allocation5 + $0x10] sm:$0xff]   ;;  %s1495_s15 = scalar_lea.vmem [#allocation7], %s798_s29  ;;  %s895_s17 = sshll.u32 %s1337_s13, 11 }
  0x56   : > { %1273 = vsyncadd (%p1580_p2), [#allocation6], 4294966272  ;;  %1015 = vmatprep.subr.bf16.mxu0 %v1140_v0  ;;  %1063 = vmatprep.subr.bf16.mxu1 %v1140_v0  ;;  %v1143_v3 = vld [vmem:[#allocation5 + $0x18] sm:$0xff]   ;;  %v1148_v4 = vld [vmem:[%s1467_s23] sm:$0xff]   ;;  %s707_s4 = sshll.u32 %s1495_s15, 4  ;;  %s1514_s22 = scalar_lea.hbm %s1566_s2, %s895_s17  ;;  %s1516_s4 = int_to_ptr.vmem [resolvable:$true] %s707_s4 }
  0x57   : > { %1016 = vmatpush3.bf16.msra.mxu0 %v1140_v0  ;;  %1071 = vmatpush3.bf16.msra.mxu1 %v1140_v0  ;;  %v1149_v5 = vld [vmem:[%s1467_s23 + $0x40] sm:$0xff]   ;;  %v1145_v7 = vld [vmem:[#allocation5 + $0x28] sm:$0xff]   ;;  %v1146_v8 = vld [vmem:[#allocation5 + $0x30] sm:$0xff]   ;;  %s694_s13 = scalar_lea.sflag [#allocation4], %s1461_s19  ;;  %s1222_s28 = scalar_lea.vmem %s1516_s4, 2048 }
  0x58   : > { %1017 = vmatprep.subr.bf16.mxu0 %v1141_v1  ;;  %1064 = vmatprep.subr.bf16.mxu1 %v1141_v1  ;;  %v1144_v6 = vld [vmem:[#allocation5 + $0x20] sm:$0xff]   ;;  %v1147_v9 = vld [vmem:[#allocation5 + $0x38] sm:$0xff]   ;;  %v1150_v10 = vld [vmem:[%s1467_s23 + $0x8] sm:$0xff]   ;;  %p1223_p4 = scmp.ne.s32.totalorder %s1516_s4, %s1222_s28  ;;  %s1298_s3 = smov [#allocation7]  }
  0x59   : > { %1031 = vmatprep.mubr.bf16.mxu0 %v1148_v4  ;;  %1047 = vmatprep.mubr.bf16.mxu1 %v1149_v5  ;;  %v1151_v11 = vld [vmem:[%s1467_s23 + $0x48] sm:$0xff]   ;;  %v1152_v12 = vld [vmem:[%s1467_s23 + $0x10] sm:$0xff]   ;;  %v1154_v14 = vld [vmem:[%s1467_s23 + $0x18] sm:$0xff]   ;;  %s1226_s6 = sshll.u32 %s1298_s3, 4  ;;  %s1227_s6 = int_to_ptr.vmem [resolvable:$false] %s1226_s6 }
  0x5a   : > { %v1153_v13 = vld [vmem:[%s1467_s23 + $0x50] sm:$0xff]   ;;  %v1155_v15 = vld [vmem:[%s1467_s23 + $0x58] sm:$0xff]   ;;  %v1156_v16 = vld [vmem:[%s1467_s23 + $0x20] sm:$0xff]   ;;  %p1224_p6 = pnand %p1223_p4, %p1410_p12  ;;  %s1228_s7 = scalar_lea.vmem %s1227_s6, 4096 }
  0x5b   : > { %1018 = vmatpush3.bf16.msra.mxu0 %v1141_v1  ;;  %1072 = vmatpush3.bf16.msra.mxu1 %v1141_v1  ;;  %v1157_v17 = vld [vmem:[%s1467_s23 + $0x60] sm:$0xff]   ;;  %v1158_v18 = vld [vmem:[%s1467_s23 + $0x28] sm:$0xff]   ;;  %v1160_v20 = vld [vmem:[%s1467_s23 + $0x30] sm:$0xff]   ;;  %p1229_p10 = scmp.lt.s32.totalorder %s1516_s4, %s1227_s6  ;;  %p1230_p13 = scmp.lt.s32.totalorder %s1228_s7, %s1222_s28 }
  0x5c   : > { %1019 = vmatprep.subr.bf16.mxu0 %v1142_v2  ;;  %1065 = vmatprep.subr.bf16.mxu1 %v1142_v2  ;;  %v1159_v19 = vld [vmem:[%s1467_s23 + $0x68] sm:$0xff]   ;;  %v1161_v21 = vld [vmem:[%s1467_s23 + $0x70] sm:$0xff]   ;;  %v1162_v22 = vld [vmem:[%s1467_s23 + $0x38] sm:$0xff]   ;;  %p1225_p8 = pneg %p1224_p6 }
  0x5d   : > { %v1163_v23 = vld [vmem:[%s1467_s23 + $0x78] sm:$0xff]   ;;  %p1231_p3 = por %p1230_p13, %p1229_p10 }
  0x5f   : > { %1020 = vmatpush3.bf16.msra.mxu0 %v1142_v2  ;;  %1073 = vmatpush3.bf16.msra.mxu1 %v1142_v2  ;;  %p1232_p7 = pnand %p1231_p3, %p1225_p8 }
  0x60   : > { %1021 = vmatprep.subr.bf16.mxu0 %v1143_v3  ;;  %1066 = vmatprep.subr.bf16.mxu1 %v1143_v3 }
  0x63   : > { %1022 = vmatpush3.bf16.msra.mxu0 %v1143_v3  ;;  %1074 = vmatpush3.bf16.msra.mxu1 %v1143_v3 }
  0x64   : > { %1023 = vmatprep.subr.bf16.mxu0 %v1144_v6  ;;  %1067 = vmatprep.subr.bf16.mxu1 %v1144_v6 }
  0x67   : > { %1024 = vmatpush3.bf16.msra.mxu0 %v1144_v6  ;;  %1075 = vmatpush3.bf16.msra.mxu1 %v1144_v6 }
  0x68   : > { %1025 = vmatprep.subr.bf16.mxu0 %v1145_v7  ;;  %1068 = vmatprep.subr.bf16.mxu1 %v1145_v7 }
  0x6b   : > { %1026 = vmatpush3.bf16.msra.mxu0 %v1145_v7  ;;  %1076 = vmatpush3.bf16.msra.mxu1 %v1145_v7 }
  0x6c   : > { %1027 = vmatprep.subr.bf16.mxu0 %v1146_v8  ;;  %1069 = vmatprep.subr.bf16.mxu1 %v1146_v8 }
  0x6f   : > { %1028 = vmatpush3.bf16.msra.mxu0 %v1146_v8  ;;  %1077 = vmatpush3.bf16.msra.mxu1 %v1146_v8 }
  0x70   : > { %1029 = vmatprep.subr.bf16.mxu0 %v1147_v9  ;;  %1070 = vmatprep.subr.bf16.mxu1 %v1147_v9 }
  0x73   : > { %1030 = vmatpush3.bf16.msra.mxu0 %v1147_v9  ;;  %1078 = vmatpush3.bf16.msra.mxu1 %v1147_v9 }
  0x76   : > { %1032 = vmatmul.mubr.bf16.vlgmr.msra.gmra.mrb[0].mxu0 %v1150_v10  ;;  %1048 = vmatmul.mubr.bf16.vlgmr.msra.gmra.mrb[0].mxu1 %v1151_v11 }
  0x77   : > { %1035 = vmatprep.mubr.bf16.mxu0 %v1152_v12  ;;  %1051 = vmatprep.mubr.bf16.mxu1 %v1153_v13 }
  0x7e   : > { %1036 = vmatmul.mubr.bf16.gmra.mrb[4].mxu0 %v1154_v14  ;;  %1052 = vmatmul.mubr.bf16.gmra.mrb[4].mxu1 %v1155_v15 }
  0x7f   : > { %1039 = vmatprep.mubr.bf16.mxu0 %v1156_v16  ;;  %1055 = vmatprep.mubr.bf16.mxu1 %v1157_v17 }
  0x86   : > { %1040 = vmatmul.mubr.bf16.gmra.mrb[8].mxu0 %v1158_v18  ;;  %1056 = vmatmul.mubr.bf16.gmra.mrb[8].mxu1 %v1159_v19 }
  0x87   : > { %1043 = vmatprep.mubr.bf16.mxu0 %v1160_v20  ;;  %1059 = vmatprep.mubr.bf16.mxu1 %v1161_v21 }
  0x8e   : > { %1044 = vmatmul.mubr.bf16.gmra.mrb[12].mxu0 %v1162_v22  ;;  %1060 = vmatmul.mubr.bf16.gmra.mrb[12].mxu1 %v1163_v23 }
 0x149   : > { %v1033_v24 = vpop.f32.mrb[0].mxu0  ;;  %v1049_v25 = vpop.f32.mrb[0].mxu1 }
 0x14a   : > { %v406_v26 = vpop.f32.mrb[1].mxu0  ;;  %v470_v27 = vpop.f32.mrb[1].mxu1 }
 0x14b   : > { %v1034_v28 = vpop.f32.mrb[2].mxu0  ;;  %v1050_v29 = vpop.f32.mrb[2].mxu1 }
 0x14c   : > { %v904_v30 = vpack.c.bf16 %v1034_v28, %v1033_v24  ;;  %v944_v31 = vpack.c.bf16 %v1050_v29, %v1049_v25  ;;  %v409_v32 = vpop.f32.mrb[3].mxu0  ;;  %v473_v33 = vpop.f32.mrb[3].mxu1 }
 0x14d   : > { %v899_v34 = vpack.c.bf16 %v409_v32, %v406_v26  ;;  %v939_v35 = vpack.c.bf16 %v473_v33, %v470_v27 }
 0x14e   : > { %976 = vst [vmem:[%s1495_s15 + $0x8] sm:$0xff] %v904_v30   ;;  %984 = vst [vmem:[%s1495_s15 + $0x48] sm:$0xff] %v944_v31  }
 0x14f   : > { %900 = vst [vmem:[%s1495_s15] sm:$0xff] %v899_v34   ;;  %983 = vst [vmem:[%s1495_s15 + $0x40] sm:$0xff] %v939_v35  }
 0x151   : > { %v1037_v36 = vpop.f32.mrb[4].mxu0  ;;  %v1053_v37 = vpop.f32.mrb[4].mxu1 }
 0x152   : > { %v422_v38 = vpop.f32.mrb[5].mxu0  ;;  %v486_v39 = vpop.f32.mrb[5].mxu1 }
 0x153   : > { %v1038_v40 = vpop.f32.mrb[6].mxu0  ;;  %v1054_v41 = vpop.f32.mrb[6].mxu1 }
 0x154   : > { %v914_v42 = vpack.c.bf16 %v1038_v40, %v1037_v36  ;;  %v954_v43 = vpack.c.bf16 %v1054_v41, %v1053_v37  ;;  %v425_v44 = vpop.f32.mrb[7].mxu0  ;;  %v489_v45 = vpop.f32.mrb[7].mxu1 }
 0x155   : > { %v909_v46 = vpack.c.bf16 %v425_v44, %v422_v38  ;;  %v949_v47 = vpack.c.bf16 %v489_v45, %v486_v39 }
 0x156   : > { %978 = vst [vmem:[%s1495_s15 + $0x18] sm:$0xff] %v914_v42   ;;  %986 = vst [vmem:[%s1495_s15 + $0x58] sm:$0xff] %v954_v43  }
 0x157   : > { %977 = vst [vmem:[%s1495_s15 + $0x10] sm:$0xff] %v909_v46   ;;  %985 = vst [vmem:[%s1495_s15 + $0x50] sm:$0xff] %v949_v47  }
 0x159   : > { %v1041_v48 = vpop.f32.mrb[8].mxu0  ;;  %v1057_v49 = vpop.f32.mrb[8].mxu1 }
 0x15a   : > { %v438_v50 = vpop.f32.mrb[9].mxu0  ;;  %v502_v51 = vpop.f32.mrb[9].mxu1 }
 0x15b   : > { %v1042_v52 = vpop.f32.mrb[10].mxu0  ;;  %v1058_v53 = vpop.f32.mrb[10].mxu1 }
 0x15c   : > { %v924_v54 = vpack.c.bf16 %v1042_v52, %v1041_v48  ;;  %v964_v55 = vpack.c.bf16 %v1058_v53, %v1057_v49  ;;  %v441_v56 = vpop.f32.mrb[11].mxu0  ;;  %v505_v57 = vpop.f32.mrb[11].mxu1 }
 0x15d   : > { %v919_v58 = vpack.c.bf16 %v441_v56, %v438_v50  ;;  %v959_v59 = vpack.c.bf16 %v505_v57, %v502_v51 }
 0x15e   : > { %980 = vst [vmem:[%s1495_s15 + $0x28] sm:$0xff] %v924_v54   ;;  %988 = vst [vmem:[%s1495_s15 + $0x68] sm:$0xff] %v964_v55  }
 0x15f   : > { %979 = vst [vmem:[%s1495_s15 + $0x20] sm:$0xff] %v919_v58   ;;  %987 = vst [vmem:[%s1495_s15 + $0x60] sm:$0xff] %v959_v59  }
 0x161   : > { %v1045_v60 = vpop.f32.mrb[12].mxu0  ;;  %v1061_v61 = vpop.f32.mrb[12].mxu1 }
 0x162   : > { %v454_v62 = vpop.f32.mrb[13].mxu0  ;;  %v518_v63 = vpop.f32.mrb[13].mxu1 }
 0x163   : > { %v1046_v0 = vpop.f32.mrb[14].mxu0  ;;  %v1062_v1 = vpop.f32.mrb[14].mxu1 }
 0x164   : > { %v934_v2 = vpack.c.bf16 %v1046_v0, %v1045_v60  ;;  %v974_v3 = vpack.c.bf16 %v1062_v1, %v1061_v61  ;;  %v457_v4 = vpop.f32.mrb[15].mxu0  ;;  %v521_v5 = vpop.f32.mrb[15].mxu1 }
 0x165   : > { %v929_v6 = vpack.c.bf16 %v457_v4, %v454_v62  ;;  %v969_v7 = vpack.c.bf16 %v521_v5, %v518_v63 }
 0x166   : > { %982 = vst [vmem:[%s1495_s15 + $0x38] sm:$0xff] %v934_v2   ;;  %990 = vst [vmem:[%s1495_s15 + $0x78] sm:$0xff] %v974_v3  }
 0x167   : > { %981 = vst [vmem:[%s1495_s15 + $0x30] sm:$0xff] %v929_v6   ;;  %989 = vst [vmem:[%s1495_s15 + $0x70] sm:$0xff] %v969_v7  }
 0x168   : > { %1235 = shalt.err (!%p1232_p7)
}
 0x169   : > { %s1236_s20 = scalar_lea.hbm %s1514_s22, 2048  ;;  %s1240_s25 = scalar_lea.hbm %s1566_s2, 4096 }
 0x16a   : > { %p1237_p9 = scmp.ne.s32.totalorder %s1514_s22, %s1236_s20  ;;  %p1241_p5 = scmp.lt.u32.totalorder %s1514_s22, %s1566_s2 }
 0x16b   : > { %p1242_p11 = scmp.lt.u32.totalorder %s1240_s25, %s1236_s20  ;;  %p1244_p4 = scmp.lt.u32.totalorder %s1236_s20, %s1514_s22 }
 0x16c   : > { %p1238_p1 = pnand %p1237_p9, %p1410_p12 }
 0x16d   : > { %p1243_p2 = por %p1242_p11, %p1241_p5 }
 0x16e   : > { %p1239_p0 = pneg %p1238_p1 }
 0x16f   : > { %p1245_p6 = por %p1244_p4, %p1243_p2 }
 0x171   : > { %p1246_p8 = pnand %p1245_p6, %p1239_p0 }
 0x173   : > { %1249 = shalt.err (!%p1246_p8)
}
 0x174   : > { %s1299_s30 = smov 64   ;;  %s1300_s23 = smov 4  }
 0x175   : > { %1085 = dma.vmem_to_hbm [thread:$0]  (%p1410_p12), %s1516_s4, 2048, %s1514_s22, %s694_s13, %s1299_s30, %s1299_s30, %s1300_s23  }
 0x176 PF: > { %s722_s15 = sand.u32 1, %s1280_s9   ;;  %p1581_p10 = scmp.ne.s32.totalorder %s1571_s16, 0 }
 0x177   : > { %p1582_p13 = scmp.ge.s32.totalorder %s1292_s12, 2  ;;  %s723_s17 = scalar_lea.sflag [#allocation4], %s722_s15 }
 0x179   : > { %p1096_p3 = pnand %p1582_p13, %p1581_p10 }
 0x17b   : > { %1275 = dma.done.wait (!%p1096_p3), %s723_s17, 2048  }
 0x17c   : > { %1277 = vsyncadd (!%p1096_p3), %s723_s17, 4294965248  ;;  %p16_p7 = scmp.ge.s32.totalorder %s1372_s21, 4   ;;  %s1583_s9 = smov %s1284_s10 }
 0x17d   : > { %s1584_s10 = smov %s1288_s11  ;;  %s1585_s11 = smov %s1406_s8 }
 0x17e   : > { %s1586_s12 = smov %s1372_s21  ;;  %18 = sbr.rel (!%p16_p7) target bundleno = 6 (0x6), region = 77 }
 0x185   :  { %728 = vsyncpa [#allocation3], 1 }
 0x186   :  { %730 = vsyncpa [#allocation3 + $0x1], 1 }
 0x187   :  { %731 = vsyncpa [#allocation6], 1 }
 0x188   :  { %732 = vsyncpa [#allocation4], 1 }
 0x189   :  { %734 = vsyncpa [#allocation4 + $0x1], 1 }

// kernel: gcn1_forward.5
= control target key start
LH: loop header
LB: loop body
LE: loop exit
PB: predicated region body
PF: predicated region fallthrough
CT: control target
= control target key end

     0   :  { %8 = vsyncpa [#allocation3], 0  ;;  %s2526_s0 = inlined_call_operand.hbm [shape: bf16[512,512], index: 0, kind: input, shape index: {}]   ;;  %s2527_s1 = inlined_call_operand.hbm [shape: bf16[512,128], index: 1, kind: input, shape index: {}]   ;;  %s2528_s2 = inlined_call_operand.hbm [shape: f32[1,128], index: 2, kind: input, shape index: {}]   ;;  %s2529_s3 = inlined_call_operand.hbm [shape: f32[512,128], index: 3, kind: output, shape index: {}]  }
   0x1   :  { %10 = vsyncpa [#allocation3 + $0x1], 0 }
   0x2   :  { %11 = vsyncpa [#allocation6], 0 }
   0x3   :  { %12 = vsyncpa [#allocation4], 0 }
   0x4   :  { %14 = vsyncpa [#allocation4 + $0x1], 0  ;;  %s2155_s12 = smov 0   ;;  %s2157_s13 = smov 0  }
   0x5   :  { %s2159_s14 = smov 0   ;;  %s2161_s15 = smov 0  }
   0x6 LB: > { %s2176_s16 = sadd.s32 4294967295, %s2123_s15   ;;  %s1423_s17 = sadd.s32 4294967294, %s2123_s15   ;;  %s2123_s15 = sphi %s2161_s15, %s2549_s15   ;;  %s2119_s14 = sphi %s2159_s14, %s2548_s14   ;;  %s2115_s13 = sphi %s2157_s13, %s2547_s13   ;;  %s2111_s12 = sphi %s2155_s12, %s2546_s12  }
   0x7   : > { %p40_p0 = scmp.ne.s32.totalorder %s2115_s13, %s2111_s12  ;;  %p2530_p1 = scmp.eq.s32.totalorder %s2176_s16, 0 }
   0x8   : > { %p112_p3 = scmp.eq.s32.totalorder %s1423_s17, 1  ;;  %p1424_p5 = scmp.ge.s32.totalorder %s2123_s15, 1 }
   0x9   : > { %p2185_p4 = por %p2530_p1, %p40_p0  ;;  %p119_p7 = scmp.lt.s32.totalorder %s2123_s15, 3 }
   0xa   : > { %p2190_p6 = por %p112_p3, %p40_p0  ;;  %s2125_s21 = smov [#allocation5]  }
   0xb   : > { %s2533_s18 = scalar_select %p2185_p4, 1, 0 }
   0xc   : > { %s2534_s19 = scalar_select %p2190_p6, 1, 0 }
   0xd   : > { %p2195_p8 = pnand %p1424_p5, %p119_p7  ;;  %s131_s22 = sshll.u32 %s2125_s21, 4  ;;  %s2199_s22 = int_to_ptr.vmem [resolvable:$true] %s131_s22 }
   0xe   : > { %s2126_s24 = smov [#allocation7]   ;;  %s1967_s28 = scalar_lea.hbm %s2527_s1, 4096 }
   0xf   : > { %p1778_p9 = pneg %p2195_p8  ;;  %s145_s25 = sshll.u32 %s2126_s24, 4  ;;  %s2210_s25 = int_to_ptr.vmem [resolvable:$true] %s145_s25 }
  0x10   : > { %p1968_p12 = scmp.ne.s32.totalorder %s2527_s1, %s1967_s28  ;;  %p1974_p5 = scmp.lt.u32.totalorder %s1967_s28, %s2527_s1 }
  0x11   : > { %p2206_p11 = pnand %p1778_p9, %p2530_p1 }
  0x13   : > { %p1969_p13 = pneg %p2206_p11 }
  0x15   : > { %p1970_p0 = pnand %p1969_p13, %p1968_p12 }
  0x17   : > { %p1971_p3 = pneg %p1970_p0 }
  0x19   : > { %p1976_p7 = pnand %p1974_p5, %p1971_p3 }
  0x1b   : > { %1979 = shalt.err (!%p1976_p7)
}
  0x1c   : > { %s1980_s6 = scalar_lea.vmem %s2199_s22, 4096  ;;  %p1988_p2 = scmp.lt.s32.totalorder %s2199_s22, %s2199_s22 }
  0x1d   : > { %p1981_p9 = scmp.ne.s32.totalorder %s2199_s22, %s1980_s6  ;;  %p1989_p12 = scmp.lt.s32.totalorder %s1980_s6, %s1980_s6 }
  0x1f   : > { %p1983_p10 = pnand %p1981_p9, %p1969_p13  ;;  %p1990_p0 = por %p1989_p12, %p1988_p2 }
  0x21   : > { %p1984_p1 = pneg %p1983_p10 }
  0x23   : > { %p1991_p6 = pnand %p1990_p0, %p1984_p1 }
  0x25   : > { %1994 = shalt.err (!%p1991_p6)
}
  0x26   : > { %s2127_s7 = smov 64   ;;  %s2128_s8 = smov 4  }
  0x27   : > { %1781 = dma.hbm_to_vmem [thread:$0]  (!%p2206_p11), %s2527_s1, 4096, %s2199_s22, [#allocation6], %s2127_s7, %s2127_s7, %s2128_s8  }
  0x28   : > { %s1995_s21 = scalar_lea.hbm %s2528_s2, 16 }
  0x29   : > { %p1996_p2 = scmp.ne.s32.totalorder %s2528_s2, %s1995_s21  ;;  %p2002_p10 = scmp.lt.u32.totalorder %s1995_s21, %s2528_s2 }
  0x2b   : > { %p1998_p1 = pnand %p1996_p2, %p1969_p13 }
  0x2d   : > { %p1999_p6 = pneg %p1998_p1 }
  0x2f   : > { %p2004_p3 = pnand %p2002_p10, %p1999_p6 }
  0x31   : > { %2007 = shalt.err (!%p2004_p3)
}
  0x32   : > { %s2008_s22 = scalar_lea.vmem %s2210_s25, 16  ;;  %s2015_s29 = scalar_lea.vmem %s2210_s25, 32 }
  0x33   : > { %p2009_p5 = scmp.ne.s32.totalorder %s2210_s25, %s2008_s22  ;;  %p2016_p12 = scmp.lt.s32.totalorder %s2210_s25, %s2210_s25 }
  0x34   : > { %p2017_p0 = scmp.lt.s32.totalorder %s2015_s29, %s2008_s22 }
  0x35   : > { %p2011_p7 = pnand %p2009_p5, %p1969_p13 }
  0x36   : > { %p2018_p2 = por %p2017_p0, %p2016_p12 }
  0x37   : > { %p2012_p9 = pneg %p2011_p7 }
  0x39   : > { %p2019_p1 = pnand %p2018_p2, %p2012_p9 }
  0x3b   : > { %2022 = shalt.err (!%p2019_p1)
}
  0x3c   : > { %1784 = dma.hbm_to_vmem [thread:$0]  (!%p2206_p11), %s2528_s2, 16, %s2210_s25, [#allocation6]  }
  0x3d   : > { %s2266_s5 = sadd.s32 1, %s2123_s15   ;;  %s27_s23 = sadd.s32 1, %s2119_s14 }
  0x3e   : > { %s24_s6 = ssub.s32 %s2123_s15, %s2266_s5  ;;  %p34_p13 = scmp.ne.s32.totalorder %s2119_s14, %s2115_s13 }
  0x3f   : > { %p25_p6 = scmp.eq.s32.totalorder %s24_s6, 0  ;;  %p35_p10 = scmp.eq.s32.totalorder %s2123_s15, 0 }
  0x40   : > { %p2537_p3 = scmp.eq.s32.totalorder %s2176_s16, 1  ;;  %p1795_p7 = scmp.lt.s32.totalorder %s2123_s15, 2 }
  0x41   : > { %s2282_s8 = scalar_select %p25_p6, %s2119_s14, %s27_s23  }
  0x42   : > { %p2276_p5 = por %p2537_p3, %p34_p13  ;;  %p36_p9 = por %p35_p10, %p34_p13 }
  0x43   : > { %s156_s9 = sand.u32 1, %s2119_s14   ;;  %s1540_s25 = sshll.u32 %s2123_s15, 13 }
  0x44   : > { %s2538_s7 = scalar_select %p2276_p5, 1, 0 }
  0x45   : > { %s1428_s10 = sshll.u32 %s156_s9, 9  ;;  %s2289_s21 = scalar_lea.hbm %s2526_s0, %s1540_s25 }
  0x46   : > { %s160_s24 = scalar_lea.vmem [#allocation2], %s1428_s10  ;;  %p2293_p11 = pnand %p1795_p7, %p36_p9 }
  0x47   : > { %s168_s26 = sshll.u32 %s160_s24, 4  ;;  %s2297_s28 = scalar_lea.sflag [#allocation3], %s156_s9  ;;  %s2291_s26 = int_to_ptr.vmem [resolvable:$true] %s168_s26 }
  0x48   : > { %s2023_s22 = scalar_lea.hbm %s2289_s21, 8192  ;;  %p2025_p0 = pneg %p2293_p11 }
  0x49   : > { %p2024_p12 = scmp.ne.s32.totalorder %s2289_s21, %s2023_s22  ;;  %s2028_s4 = scalar_lea.hbm %s2526_s0, 16384 }
  0x4a   : > { %p2029_p13 = scmp.lt.u32.totalorder %s2289_s21, %s2526_s0  ;;  %p2030_p6 = scmp.lt.u32.totalorder %s2028_s4, %s2023_s22 }
  0x4b   : > { %p2026_p2 = pnand %p2025_p0, %p2024_p12  ;;  %p2032_p3 = scmp.lt.u32.totalorder %s2023_s22, %s2289_s21 }
  0x4c   : > { %p2031_p10 = por %p2030_p6, %p2029_p13 }
  0x4d   : > { %p2027_p1 = pneg %p2026_p2 }
  0x4e   : > { %p2033_p7 = por %p2032_p3, %p2031_p10 }
  0x50   : > { %p2034_p9 = pnand %p2033_p7, %p2027_p1 }
  0x52   : > { %2037 = shalt.err (!%p2034_p9)
}
  0x53   : > { %s2038_s9 = scalar_lea.vmem %s2291_s26, 8192  ;;  %s2129_s10 = smov [#allocation2]  }
  0x54   : > { %p2039_p12 = scmp.ne.s32.totalorder %s2291_s26, %s2038_s9  ;;  %s2043_s25 = sshll.u32 %s2129_s10, 4  ;;  %s2044_s25 = int_to_ptr.vmem [resolvable:$false] %s2043_s25 }
  0x55   : > { %s2045_s11 = scalar_lea.vmem %s2044_s25, 16384  ;;  %p2046_p4 = scmp.lt.s32.totalorder %s2291_s26, %s2044_s25 }
  0x56   : > { %p2041_p2 = pnand %p2039_p12, %p2025_p0  ;;  %p2047_p13 = scmp.lt.s32.totalorder %s2045_s11, %s2038_s9 }
  0x58   : > { %p2042_p5 = pneg %p2041_p2  ;;  %p2048_p6 = por %p2047_p13, %p2046_p4 }
  0x5a   : > { %p2049_p10 = pnand %p2048_p6, %p2042_p5 }
  0x5c   : > { %2052 = shalt.err (!%p2049_p10)
}
  0x5d   : > { %s2130_s17 = smov 256   ;;  %s2131_s24 = smov 16  }
  0x5e   : > { %1788 = dma.hbm_to_vmem [thread:$0]  (!%p2293_p11), %s2289_s21, 8192, %s2291_s26, %s2297_s28, %s2130_s17, %s2130_s17, %s2131_s24  }
  0x5f   : > { %180 = sbr.rel (%p2195_p8) target bundleno = 499 (0x1f3), region = 32  ;;  %s2328_s22 = sand.u32 (!%p2195_p8), 1, %s2115_s13  }
  0x60   : > { %s1433_s29 = sshll.u32 (!%p2195_p8), %s2328_s22, 9  ;;  %s183_s30 = scalar_lea.sflag (!%p2195_p8), [#allocation3], %s2328_s22 }
  0x61   : > { %s2332_s4 = scalar_lea.vmem (!%p2195_p8), [#allocation2], %s1433_s29  ;;  %p2540_p4 = scmp.ne.s32.totalorder (!%p2195_p8), %s2533_s18, 0 }
  0x66   : > { %2098 = dma.done.wait (%p2540_p4), %s183_s30, 8192  }
  0x67   : > { %2100 = vsyncadd (%p2540_p4), %s183_s30, 4294959104  ;;  %p2541_p5 = scmp.eq.s32.totalorder %s2176_s16, 0 }
  0x69   : > { %2102 = dma.done.wait (%p2541_p5), [#allocation6], 4112   ;;  %p2542_p8 = pmov %p2541_p5 }
  0x6a   : > { %v1839_v0 = vld [vmem:[#allocation5 + $0x40] sm:$0xff]   ;;  %v1843_v4 = vld [vmem:[#allocation5 + $0x48] sm:$0xff]   ;;  %v1847_v8 = vld [vmem:[#allocation5 + $0x50] sm:$0xff]   ;;  %s1436_s18 = sshll.u32 %s2328_s22, 8  ;;  %s1541_s21 = sshll.u32 %s2176_s16, 12 }
  0x6b   : > { %2104 = vsyncadd (%p2542_p8), [#allocation6], 4294963184  ;;  %v1840_v1 = vld [vmem:[#allocation5 + $0xc0] sm:$0xff]   ;;  %1542 = vmatprep.subr.bf16.mxu0 %v1839_v0  ;;  %v1844_v5 = vld [vmem:[#allocation5 + $0xc8] sm:$0xff]   ;;  %s2411_s20 = scalar_lea.vmem [#allocation8], %s1436_s18  ;;  %s2478_s23 = scalar_lea.hbm %s2529_s3, %s1541_s21 }
  0x6c   : > { %v1841_v2 = vld [vmem:[#allocation5] sm:$0xff]   ;;  %1654 = vmatprep.subr.bf16.mxu1 %v1840_v1  ;;  %v1845_v6 = vld [vmem:[#allocation5 + $0x8] sm:$0xff]   ;;  %v1848_v9 = vld [vmem:[#allocation5 + $0xd0] sm:$0xff]   ;;  %s1331_s26 = sshll.u32 %s2411_s20, 4  ;;  %s1318_s16 = scalar_lea.sflag [#allocation4], %s2328_s22  ;;  %s2480_s26 = int_to_ptr.vmem [resolvable:$true] %s1331_s26 }
  0x6d   : > { %v1842_v3 = vld [vmem:[#allocation5 + $0x80] sm:$0xff]   ;;  %1543 = vmatpush3.bf16.msra.mxu0 %v1841_v2  ;;  %v1846_v7 = vld [vmem:[#allocation5 + $0x88] sm:$0xff]   ;;  %v1849_v10 = vld [vmem:[#allocation5 + $0x10] sm:$0xff]   ;;  %s2053_s6 = scalar_lea.vmem %s2480_s26, 4096  ;;  %p2543_p0 = scmp.ne.s32.totalorder %s2538_s7, 0 }
  0x6e   : > { %1655 = vmatpush3.bf16.msra.mxu1 %v1842_v3  ;;  %1544 = vmatprep.subr.bf16.mxu0 %v1843_v4  ;;  %v1850_v11 = vld [vmem:[#allocation5 + $0x90] sm:$0xff]   ;;  %v1851_v12 = vld [vmem:[#allocation5 + $0x58] sm:$0xff]   ;;  %v1855_v16 = vld [vmem:[#allocation5 + $0x60] sm:$0xff]   ;;  %p2054_p11 = scmp.ne.s32.totalorder %s2480_s26, %s2053_s6  ;;  %s2132_s9 = smov [#allocation8]  }
  0x6f   : > { %1656 = vmatprep.subr.bf16.mxu1 %v1844_v5  ;;  %v1852_v13 = vld [vmem:[#allocation5 + $0xd8] sm:$0xff]   ;;  %v1856_v17 = vld [vmem:[#allocation5 + $0xe0] sm:$0xff]   ;;  %v1859_v20 = vld [vmem:[#allocation5 + $0x68] sm:$0xff]   ;;  %s2057_s10 = sshll.u32 %s2132_s9, 4  ;;  %s2058_s10 = int_to_ptr.vmem [resolvable:$false] %s2057_s10 }
  0x70   : > { %v1853_v14 = vld [vmem:[#allocation5 + $0x18] sm:$0xff]   ;;  %v1857_v18 = vld [vmem:[#allocation5 + $0x20] sm:$0xff]   ;;  %v1860_v21 = vld [vmem:[#allocation5 + $0xe8] sm:$0xff]   ;;  %p2055_p1 = pnand %p2054_p11, %p2543_p0  ;;  %s2059_s25 = scalar_lea.vmem %s2058_s10, 8192 }
  0x71   : > { %1545 = vmatpush3.bf16.msra.mxu0 %v1845_v6  ;;  %v1854_v15 = vld [vmem:[#allocation5 + $0x98] sm:$0xff]   ;;  %v1858_v19 = vld [vmem:[#allocation5 + $0xa0] sm:$0xff]   ;;  %v1861_v22 = vld [vmem:[#allocation5 + $0x28] sm:$0xff]   ;;  %p2060_p7 = scmp.lt.s32.totalorder %s2480_s26, %s2058_s10  ;;  %p2061_p9 = scmp.lt.s32.totalorder %s2059_s25, %s2053_s6 }
  0x72   : > { %1657 = vmatpush3.bf16.msra.mxu1 %v1846_v7  ;;  %1546 = vmatprep.subr.bf16.mxu0 %v1847_v8  ;;  %v1862_v23 = vld [vmem:[#allocation5 + $0xa8] sm:$0xff]   ;;  %v1863_v24 = vld [vmem:[#allocation5 + $0x70] sm:$0xff]   ;;  %v1867_v28 = vld [vmem:[#allocation5 + $0x78] sm:$0xff]   ;;  %p2056_p3 = pneg %p2055_p1 }
  0x73   : > { %1658 = vmatprep.subr.bf16.mxu1 %v1848_v9  ;;  %v1864_v25 = vld [vmem:[#allocation5 + $0xf0] sm:$0xff]   ;;  %v1868_v29 = vld [vmem:[#allocation5 + $0xf8] sm:$0xff]   ;;  %p2062_p12 = por %p2061_p9, %p2060_p7 }
  0x74   : > { %v1865_v26 = vld [vmem:[#allocation5 + $0x30] sm:$0xff]   ;;  %v1869_v30 = vld [vmem:[#allocation5 + $0x38] sm:$0xff]  }
  0x75   : > { %1547 = vmatpush3.bf16.msra.mxu0 %v1849_v10  ;;  %v1866_v27 = vld [vmem:[#allocation5 + $0xb0] sm:$0xff]   ;;  %v1870_v31 = vld [vmem:[#allocation5 + $0xb8] sm:$0xff]   ;;  %p2063_p2 = pnand %p2062_p12, %p2056_p3 }
  0x76   : > { %1659 = vmatpush3.bf16.msra.mxu1 %v1850_v11  ;;  %1548 = vmatprep.subr.bf16.mxu0 %v1851_v12  ;;  %v1871_v32 = vld [vmem:[%s2332_s4] ss:$16 sps:$4 sm:$0xff]   ;;  %v1873_v33 = vld [vmem:[%s2332_s4 + $0x4] ss:$16 sps:$4 sm:$0xff]   ;;  %v1874_v34 = vld [vmem:[%s2332_s4 + $0x8] ss:$16 sps:$4 sm:$0xff]  }
  0x77   : > { %1660 = vmatprep.subr.bf16.mxu1 %v1852_v13  ;;  %v1876_v35 = vld [vmem:[%s2332_s4 + $0xc] ss:$16 sps:$4 sm:$0xff]   ;;  %899 = vmatprep.mubr.bf16.mxu0 %v1873_v33  ;;  %v1877_v36 = vld [vmem:[%s2332_s4 + $0x24] ss:$16 sps:$4 sm:$0xff]   ;;  %v1881_v38 = vld [vmem:[%s2332_s4 + $0x20] ss:$16 sps:$4 sm:$0xff]  }
  0x78   : > { %1060 = vmatprep.mubr.bf16.mxu1 %v1876_v35  ;;  %v1879_v37 = vld [vmem:[%s2332_s4 + $0x2c] ss:$16 sps:$4 sm:$0xff]   ;;  %v1882_v39 = vld [vmem:[%s2332_s4 + $0x28] ss:$16 sps:$4 sm:$0xff]   ;;  %v1883_v40 = vld [vmem:[%s2332_s4 + $0x44] ss:$16 sps:$4 sm:$0xff]  }
  0x79   : > { %1549 = vmatpush3.bf16.msra.mxu0 %v1853_v14  ;;  %v1885_v41 = vld [vmem:[%s2332_s4 + $0x4c] ss:$16 sps:$4 sm:$0xff]   ;;  %v1887_v42 = vld [vmem:[%s2332_s4 + $0x40] ss:$16 sps:$4 sm:$0xff]   ;;  %v1888_v43 = vld [vmem:[%s2332_s4 + $0x48] ss:$16 sps:$4 sm:$0xff]  }
  0x7a   : > { %1661 = vmatpush3.bf16.msra.mxu1 %v1854_v15  ;;  %1550 = vmatprep.subr.bf16.mxu0 %v1855_v16  ;;  %v1889_v44 = vld [vmem:[%s2332_s4 + $0x64] ss:$16 sps:$4 sm:$0xff]   ;;  %v1891_v45 = vld [vmem:[%s2332_s4 + $0x6c] ss:$16 sps:$4 sm:$0xff]   ;;  %v1893_v46 = vld [vmem:[%s2332_s4 + $0x60] ss:$16 sps:$4 sm:$0xff]  }
  0x7b   : > { %1662 = vmatprep.subr.bf16.mxu1 %v1856_v17  ;;  %v1894_v47 = vld [vmem:[%s2332_s4 + $0x68] ss:$16 sps:$4 sm:$0xff]   ;;  %v1895_v48 = vld [vmem:[%s2332_s4 + $0x84] ss:$16 sps:$4 sm:$0xff]   ;;  %v1897_v49 = vld [vmem:[%s2332_s4 + $0x8c] ss:$16 sps:$4 sm:$0xff]  }
  0x7c   : > { %v1899_v50 = vld [vmem:[%s2332_s4 + $0x80] ss:$16 sps:$4 sm:$0xff]   ;;  %v1900_v51 = vld [vmem:[%s2332_s4 + $0x88] ss:$16 sps:$4 sm:$0xff]   ;;  %v1901_v52 = vld [vmem:[%s2332_s4 + $0xa4] ss:$16 sps:$4 sm:$0xff]  }
  0x7d   : > { %1551 = vmatpush3.bf16.msra.mxu0 %v1857_v18  ;;  %v1903_v53 = vld [vmem:[%s2332_s4 + $0xac] ss:$16 sps:$4 sm:$0xff]   ;;  %v1905_v54 = vld [vmem:[%s2332_s4 + $0xa0] ss:$16 sps:$4 sm:$0xff]   ;;  %v1906_v55 = vld [vmem:[%s2332_s4 + $0xa8] ss:$16 sps:$4 sm:$0xff]  }
  0x7e   : > { %1663 = vmatpush3.bf16.msra.mxu1 %v1858_v19  ;;  %1552 = vmatprep.subr.bf16.mxu0 %v1859_v20  ;;  %v1907_v56 = vld [vmem:[%s2332_s4 + $0xc4] ss:$16 sps:$4 sm:$0xff]   ;;  %v1909_v57 = vld [vmem:[%s2332_s4 + $0xcc] ss:$16 sps:$4 sm:$0xff]   ;;  %v1911_v58 = vld [vmem:[%s2332_s4 + $0xc0] ss:$16 sps:$4 sm:$0xff]  }
  0x7f   : > { %1664 = vmatprep.subr.bf16.mxu1 %v1860_v21  ;;  %v1912_v59 = vld [vmem:[%s2332_s4 + $0xc8] ss:$16 sps:$4 sm:$0xff]   ;;  %v1913_v60 = vld [vmem:[%s2332_s4 + $0xe4] ss:$16 sps:$4 sm:$0xff]   ;;  %v1915_v61 = vld [vmem:[%s2332_s4 + $0xec] ss:$16 sps:$4 sm:$0xff]  }
  0x80   : > { %v1917_v62 = vld [vmem:[%s2332_s4 + $0xe0] ss:$16 sps:$4 sm:$0xff]   ;;  %v1918_v63 = vld [vmem:[%s2332_s4 + $0xe8] ss:$16 sps:$4 sm:$0xff]   ;;  %v1919_v0 = vld [vmem:[%s2332_s4 + $0x104] ss:$16 sps:$4 sm:$0xff]  }
  0x81   : > { %1553 = vmatpush3.bf16.msra.mxu0 %v1861_v22  ;;  %v1921_v1 = vld [vmem:[%s2332_s4 + $0x10c] ss:$16 sps:$4 sm:$0xff]   ;;  %v1923_v2 = vld [vmem:[%s2332_s4 + $0x100] ss:$16 sps:$4 sm:$0xff]   ;;  %v1924_v3 = vld [vmem:[%s2332_s4 + $0x108] ss:$16 sps:$4 sm:$0xff]  }
  0x82   : > { %1665 = vmatpush3.bf16.msra.mxu1 %v1862_v23  ;;  %1554 = vmatprep.subr.bf16.mxu0 %v1863_v24  ;;  %v1925_v4 = vld [vmem:[%s2332_s4 + $0x124] ss:$16 sps:$4 sm:$0xff]   ;;  %v1927_v5 = vld [vmem:[%s2332_s4 + $0x12c] ss:$16 sps:$4 sm:$0xff]   ;;  %v1929_v6 = vld [vmem:[%s2332_s4 + $0x120] ss:$16 sps:$4 sm:$0xff]  }
  0x83   : > { %1666 = vmatprep.subr.bf16.mxu1 %v1864_v25  ;;  %v1930_v7 = vld [vmem:[%s2332_s4 + $0x128] ss:$16 sps:$4 sm:$0xff]   ;;  %v1931_v8 = vld [vmem:[%s2332_s4 + $0x144] ss:$16 sps:$4 sm:$0xff]   ;;  %v1933_v9 = vld [vmem:[%s2332_s4 + $0x14c] ss:$16 sps:$4 sm:$0xff]  }
  0x84   : > { %v1935_v10 = vld [vmem:[%s2332_s4 + $0x140] ss:$16 sps:$4 sm:$0xff]   ;;  %v1936_v11 = vld [vmem:[%s2332_s4 + $0x148] ss:$16 sps:$4 sm:$0xff]   ;;  %v1937_v12 = vld [vmem:[%s2332_s4 + $0x164] ss:$16 sps:$4 sm:$0xff]  }
  0x85   : > { %1555 = vmatpush3.bf16.msra.mxu0 %v1865_v26  ;;  %v1939_v13 = vld [vmem:[%s2332_s4 + $0x16c] ss:$16 sps:$4 sm:$0xff]   ;;  %v1941_v14 = vld [vmem:[%s2332_s4 + $0x160] ss:$16 sps:$4 sm:$0xff]   ;;  %v1942_v15 = vld [vmem:[%s2332_s4 + $0x168] ss:$16 sps:$4 sm:$0xff]  }
  0x86   : > { %1667 = vmatpush3.bf16.msra.mxu1 %v1866_v27  ;;  %1556 = vmatprep.subr.bf16.mxu0 %v1867_v28  ;;  %v1943_v16 = vld [vmem:[%s2332_s4 + $0x184] ss:$16 sps:$4 sm:$0xff]   ;;  %v1945_v17 = vld [vmem:[%s2332_s4 + $0x18c] ss:$16 sps:$4 sm:$0xff]   ;;  %v1947_v18 = vld [vmem:[%s2332_s4 + $0x180] ss:$16 sps:$4 sm:$0xff]  }
  0x87   : > { %1668 = vmatprep.subr.bf16.mxu1 %v1868_v29  ;;  %v1948_v19 = vld [vmem:[%s2332_s4 + $0x188] ss:$16 sps:$4 sm:$0xff]   ;;  %v1949_v20 = vld [vmem:[%s2332_s4 + $0x1a4] ss:$16 sps:$4 sm:$0xff]   ;;  %v1951_v21 = vld [vmem:[%s2332_s4 + $0x1ac] ss:$16 sps:$4 sm:$0xff]  }
  0x88   : > { %v1953_v22 = vld [vmem:[%s2332_s4 + $0x1a0] ss:$16 sps:$4 sm:$0xff]   ;;  %v1954_v23 = vld [vmem:[%s2332_s4 + $0x1a8] ss:$16 sps:$4 sm:$0xff]   ;;  %v1955_v24 = vld [vmem:[%s2332_s4 + $0x1c4] ss:$16 sps:$4 sm:$0xff]  }
  0x89   : > { %1557 = vmatpush3.bf16.msra.mxu0 %v1869_v30  ;;  %v1957_v25 = vld [vmem:[%s2332_s4 + $0x1cc] ss:$16 sps:$4 sm:$0xff]   ;;  %v1959_v26 = vld [vmem:[%s2332_s4 + $0x1c0] ss:$16 sps:$4 sm:$0xff]   ;;  %v1960_v27 = vld [vmem:[%s2332_s4 + $0x1c8] ss:$16 sps:$4 sm:$0xff]  }
  0x8a   : > { %1669 = vmatpush3.bf16.msra.mxu1 %v1870_v31  ;;  %v1961_v28 = vld [vmem:[%s2332_s4 + $0x1e4] ss:$16 sps:$4 sm:$0xff]   ;;  %v1963_v29 = vld [vmem:[%s2332_s4 + $0x1ec] ss:$16 sps:$4 sm:$0xff]   ;;  %v1965_v30 = vld [vmem:[%s2332_s4 + $0x1e0] ss:$16 sps:$4 sm:$0xff]  }
  0x8b   : > { %v1966_v31 = vld [vmem:[%s2332_s4 + $0x1e8] ss:$16 sps:$4 sm:$0xff]  }
  0x8c   : > { %900 = vmatmul.mubr.bf16.vlgmr.msra.gmra.mrb[0].mxu0 %v1871_v32 }
  0x8d   : > { %1061 = vmatmul.mubr.bf16.vlgmr.msra.gmra.mrb[0].mxu1 %v1874_v34  ;;  %907 = vmatprep.mubr.bf16.mxu0 %v1877_v36  ;;  %v2406_v34 = vld [vmem:[#allocation7] ss:$0 sm:$0xff] }
  0x8e   : > { %1068 = vmatprep.mubr.bf16.mxu1 %v1879_v37 }
  0x94   : > { %908 = vmatmul.mubr.bf16.gmra.mrb[4].mxu0 %v1881_v38 }
  0x95   : > { %1069 = vmatmul.mubr.bf16.gmra.mrb[4].mxu1 %v1882_v39  ;;  %915 = vmatprep.mubr.bf16.mxu0 %v1883_v40 }
  0x96   : > { %1076 = vmatprep.mubr.bf16.mxu1 %v1885_v41 }
  0x9c   : > { %916 = vmatmul.mubr.bf16.gmra.mrb[8].mxu0 %v1887_v42 }
  0x9d   : > { %1077 = vmatmul.mubr.bf16.gmra.mrb[8].mxu1 %v1888_v43  ;;  %923 = vmatprep.mubr.bf16.mxu0 %v1889_v44 }
  0x9e   : > { %1084 = vmatprep.mubr.bf16.mxu1 %v1891_v45 }
  0xa4   : > { %924 = vmatmul.mubr.bf16.gmra.mrb[12].mxu0 %v1893_v46 }
  0xa5   : > { %1085 = vmatmul.mubr.bf16.gmra.mrb[12].mxu1 %v1894_v47  ;;  %931 = vmatprep.mubr.bf16.mxu0 %v1895_v48 }
  0xa6   : > { %1092 = vmatprep.mubr.bf16.mxu1 %v1897_v49 }
  0xac   : > { %932 = vmatmul.mubr.bf16.gmra.mrb[16].mxu0 %v1899_v50 }
  0xad   : > { %1093 = vmatmul.mubr.bf16.gmra.mrb[16].mxu1 %v1900_v51  ;;  %939 = vmatprep.mubr.bf16.mxu0 %v1901_v52 }
  0xae   : > { %1100 = vmatprep.mubr.bf16.mxu1 %v1903_v53 }
  0xb4   : > { %940 = vmatmul.mubr.bf16.gmra.mrb[20].mxu0 %v1905_v54 }
  0xb5   : > { %1101 = vmatmul.mubr.bf16.gmra.mrb[20].mxu1 %v1906_v55  ;;  %947 = vmatprep.mubr.bf16.mxu0 %v1907_v56 }
  0xb6   : > { %1108 = vmatprep.mubr.bf16.mxu1 %v1909_v57 }
  0xbc   : > { %948 = vmatmul.mubr.bf16.gmra.mrb[24].mxu0 %v1911_v58 }
  0xbd   : > { %1109 = vmatmul.mubr.bf16.gmra.mrb[24].mxu1 %v1912_v59  ;;  %955 = vmatprep.mubr.bf16.mxu0 %v1913_v60 }
  0xbe   : > { %1116 = vmatprep.mubr.bf16.mxu1 %v1915_v61 }
  0xc4   : > { %956 = vmatmul.mubr.bf16.gmra.mrb[28].mxu0 %v1917_v62 }
  0xc5   : > { %1117 = vmatmul.mubr.bf16.gmra.mrb[28].mxu1 %v1918_v63  ;;  %963 = vmatprep.mubr.bf16.mxu0 %v1919_v0 }
  0xc6   : > { %1124 = vmatprep.mubr.bf16.mxu1 %v1921_v1 }
  0xcc   : > { %964 = vmatmul.mubr.bf16.gmra.mrb[32].mxu0 %v1923_v2 }
  0xcd   : > { %1125 = vmatmul.mubr.bf16.gmra.mrb[32].mxu1 %v1924_v3  ;;  %971 = vmatprep.mubr.bf16.mxu0 %v1925_v4 }
  0xce   : > { %1132 = vmatprep.mubr.bf16.mxu1 %v1927_v5 }
  0xd4   : > { %972 = vmatmul.mubr.bf16.gmra.mrb[36].mxu0 %v1929_v6 }
  0xd5   : > { %1133 = vmatmul.mubr.bf16.gmra.mrb[36].mxu1 %v1930_v7  ;;  %979 = vmatprep.mubr.bf16.mxu0 %v1931_v8 }
  0xd6   : > { %1140 = vmatprep.mubr.bf16.mxu1 %v1933_v9 }
  0xdc   : > { %980 = vmatmul.mubr.bf16.gmra.mrb[40].mxu0 %v1935_v10 }
  0xdd   : > { %1141 = vmatmul.mubr.bf16.gmra.mrb[40].mxu1 %v1936_v11  ;;  %987 = vmatprep.mubr.bf16.mxu0 %v1937_v12 }
  0xde   : > { %1148 = vmatprep.mubr.bf16.mxu1 %v1939_v13 }
  0xe4   : > { %988 = vmatmul.mubr.bf16.gmra.mrb[44].mxu0 %v1941_v14 }
  0xe5   : > { %1149 = vmatmul.mubr.bf16.gmra.mrb[44].mxu1 %v1942_v15  ;;  %995 = vmatprep.mubr.bf16.mxu0 %v1943_v16 }
  0xe6   : > { %1156 = vmatprep.mubr.bf16.mxu1 %v1945_v17 }
  0xec   : > { %996 = vmatmul.mubr.bf16.gmra.mrb[48].mxu0 %v1947_v18 }
  0xed   : > { %1157 = vmatmul.mubr.bf16.gmra.mrb[48].mxu1 %v1948_v19  ;;  %1003 = vmatprep.mubr.bf16.mxu0 %v1949_v20 }
  0xee   : > { %1164 = vmatprep.mubr.bf16.mxu1 %v1951_v21 }
  0xf4   : > { %1004 = vmatmul.mubr.bf16.gmra.mrb[52].mxu0 %v1953_v22 }
  0xf5   : > { %1165 = vmatmul.mubr.bf16.gmra.mrb[52].mxu1 %v1954_v23  ;;  %1011 = vmatprep.mubr.bf16.mxu0 %v1955_v24 }
  0xf6   : > { %1172 = vmatprep.mubr.bf16.mxu1 %v1957_v25 }
  0xfc   : > { %1012 = vmatmul.mubr.bf16.gmra.mrb[56].mxu0 %v1959_v26 }
  0xfd   : > { %1173 = vmatmul.mubr.bf16.gmra.mrb[56].mxu1 %v1960_v27  ;;  %1019 = vmatprep.mubr.bf16.mxu0 %v1961_v28 }
  0xfe   : > { %1180 = vmatprep.mubr.bf16.mxu1 %v1963_v29 }
 0x104   : > { %1020 = vmatmul.mubr.bf16.gmra.mrb[60].mxu0 %v1965_v30 }
 0x105   : > { %1181 = vmatmul.mubr.bf16.gmra.mrb[60].mxu1 %v1966_v31 }
 0x15f   : > { %v1558_v32 = vpop.f32.mrb[0].mxu0 }
 0x160   : > { %v1670_v33 = vpop.f32.mrb[0].mxu1  ;;  %v1559_v35 = vpop.f32.mrb[1].mxu0 }
 0x161   : > { %v1560_v36 = vadd.f32 %v1559_v35, %v1558_v32  ;;  %v1671_v37 = vpop.f32.mrb[1].mxu1  ;;  %v1561_v38 = vpop.f32.mrb[2].mxu0 }
 0x162   : > { %v1672_v39 = vadd.f32 %v1671_v37, %v1670_v33  ;;  %v1673_v40 = vpop.f32.mrb[2].mxu1  ;;  %v1562_v41 = vpop.f32.mrb[3].mxu0 }
 0x163   : > { %v902_v42 = vadd.f32 %v1560_v36, %v2406_v34  ;;  %v1563_v43 = vadd.f32 %v1562_v41, %v1561_v38  ;;  %v1674_v44 = vpop.f32.mrb[3].mxu1 }
 0x164   : > { %v1675_v45 = vadd.f32 %v1674_v44, %v1673_v40 }
 0x165   : > { %v1063_v46 = vadd.f32 %v1672_v39, %v902_v42  ;;  %v905_v47 = vadd.f32 %v1563_v43, %v2406_v34 }
 0x167   : > { %vm1189_vm0 = vcmp.ge.f32.partialorder %v1063_v46, 0.0  ;;  %v1221_v48 = vmul.f32 0.01, %v1063_v46  ;;  %v1066_v49 = vadd.f32 %v1675_v45, %v905_v47  ;;  %v1564_v50 = vpop.f32.mrb[4].mxu0 }
 0x168   : > { %v1676_v51 = vpop.f32.mrb[4].mxu1  ;;  %v1565_v52 = vpop.f32.mrb[5].mxu0 }
 0x169   : > { %v1253_v53 = vsel %vm1189_vm0, %v1063_v46, %v1221_v48  ;;  %vm1190_vm1 = vcmp.ge.f32.partialorder %v1066_v49, 0.0  ;;  %v1222_v54 = vmul.f32 0.01, %v1066_v49  ;;  %v1566_v55 = vadd.f32 %v1565_v52, %v1564_v50  ;;  %v1677_v56 = vpop.f32.mrb[5].mxu1  ;;  %v1567_v57 = vpop.f32.mrb[6].mxu0 }
 0x16a   : > { %1285 = vst [vmem:[%s2411_s20] sm:$0xff] %v1253_v53  ;;  %v1678_v58 = vadd.f32 %v1677_v56, %v1676_v51  ;;  %v1679_v59 = vpop.f32.mrb[6].mxu1  ;;  %v1568_v60 = vpop.f32.mrb[7].mxu0 }
 0x16b   : > { %v1254_v61 = vsel %vm1190_vm1, %v1066_v49, %v1222_v54  ;;  %v910_v62 = vadd.f32 %v1566_v55, %v2406_v34  ;;  %v1569_v63 = vadd.f32 %v1568_v60, %v1567_v57  ;;  %v1680_v0 = vpop.f32.mrb[7].mxu1 }
 0x16c   : > { %1286 = vst [vmem:[%s2411_s20 + $0x8] sm:$0xff] %v1254_v61  ;;  %v1681_v1 = vadd.f32 %v1680_v0, %v1679_v59 }
 0x16d   : > { %v1071_v2 = vadd.f32 %v1678_v58, %v910_v62  ;;  %v913_v3 = vadd.f32 %v1569_v63, %v2406_v34 }
 0x16f   : > { %vm1191_vm2 = vcmp.ge.f32.partialorder %v1071_v2, 0.0  ;;  %v1223_v4 = vmul.f32 0.01, %v1071_v2  ;;  %v1074_v5 = vadd.f32 %v1681_v1, %v913_v3  ;;  %v1570_v6 = vpop.f32.mrb[8].mxu0 }
 0x170   : > { %v1682_v7 = vpop.f32.mrb[8].mxu1  ;;  %v1571_v8 = vpop.f32.mrb[9].mxu0 }
 0x171   : > { %v1255_v9 = vsel %vm1191_vm2, %v1071_v2, %v1223_v4  ;;  %vm1192_vm3 = vcmp.ge.f32.partialorder %v1074_v5, 0.0  ;;  %v1224_v10 = vmul.f32 0.01, %v1074_v5  ;;  %v1572_v11 = vadd.f32 %v1571_v8, %v1570_v6  ;;  %v1683_v12 = vpop.f32.mrb[9].mxu1  ;;  %v1573_v13 = vpop.f32.mrb[10].mxu0 }
 0x172   : > { %1287 = vst [vmem:[%s2411_s20 + $0x10] sm:$0xff] %v1255_v9  ;;  %v1684_v14 = vadd.f32 %v1683_v12, %v1682_v7  ;;  %v1685_v15 = vpop.f32.mrb[10].mxu1  ;;  %v1574_v16 = vpop.f32.mrb[11].mxu0 }
 0x173   : > { %v1256_v17 = vsel %vm1192_vm3, %v1074_v5, %v1224_v10  ;;  %v918_v18 = vadd.f32 %v1572_v11, %v2406_v34  ;;  %v1575_v19 = vadd.f32 %v1574_v16, %v1573_v13  ;;  %v1686_v20 = vpop.f32.mrb[11].mxu1 }
 0x174   : > { %1288 = vst [vmem:[%s2411_s20 + $0x18] sm:$0xff] %v1256_v17  ;;  %v1687_v21 = vadd.f32 %v1686_v20, %v1685_v15 }
 0x175   : > { %v1079_v22 = vadd.f32 %v1684_v14, %v918_v18  ;;  %v921_v23 = vadd.f32 %v1575_v19, %v2406_v34 }
 0x177   : > { %vm1193_vm4 = vcmp.ge.f32.partialorder %v1079_v22, 0.0  ;;  %v1225_v24 = vmul.f32 0.01, %v1079_v22  ;;  %v1082_v25 = vadd.f32 %v1687_v21, %v921_v23  ;;  %v1576_v26 = vpop.f32.mrb[12].mxu0 }
 0x178   : > { %v1688_v27 = vpop.f32.mrb[12].mxu1  ;;  %v1577_v28 = vpop.f32.mrb[13].mxu0 }
 0x179   : > { %v1257_v29 = vsel %vm1193_vm4, %v1079_v22, %v1225_v24  ;;  %vm1194_vm5 = vcmp.ge.f32.partialorder %v1082_v25, 0.0  ;;  %v1226_v30 = vmul.f32 0.01, %v1082_v25  ;;  %v1578_v31 = vadd.f32 %v1577_v28, %v1576_v26  ;;  %v1689_v32 = vpop.f32.mrb[13].mxu1  ;;  %v1579_v33 = vpop.f32.mrb[14].mxu0 }
 0x17a   : > { %1289 = vst [vmem:[%s2411_s20 + $0x20] sm:$0xff] %v1257_v29  ;;  %v1690_v35 = vadd.f32 %v1689_v32, %v1688_v27  ;;  %v1691_v36 = vpop.f32.mrb[14].mxu1  ;;  %v1580_v37 = vpop.f32.mrb[15].mxu0 }
 0x17b   : > { %v1258_v38 = vsel %vm1194_vm5, %v1082_v25, %v1226_v30  ;;  %v926_v39 = vadd.f32 %v1578_v31, %v2406_v34  ;;  %v1581_v40 = vadd.f32 %v1580_v37, %v1579_v33  ;;  %v1692_v41 = vpop.f32.mrb[15].mxu1 }
 0x17c   : > { %1290 = vst [vmem:[%s2411_s20 + $0x28] sm:$0xff] %v1258_v38  ;;  %v1693_v42 = vadd.f32 %v1692_v41, %v1691_v36 }
 0x17d   : > { %v1087_v43 = vadd.f32 %v1690_v35, %v926_v39  ;;  %v929_v44 = vadd.f32 %v1581_v40, %v2406_v34 }
 0x17f   : > { %vm1195_vm6 = vcmp.ge.f32.partialorder %v1087_v43, 0.0  ;;  %v1227_v45 = vmul.f32 0.01, %v1087_v43  ;;  %v1090_v46 = vadd.f32 %v1693_v42, %v929_v44  ;;  %v1582_v47 = vpop.f32.mrb[16].mxu0 }
 0x180   : > { %v1694_v48 = vpop.f32.mrb[16].mxu1  ;;  %v1583_v49 = vpop.f32.mrb[17].mxu0 }
 0x181   : > { %v1259_v50 = vsel %vm1195_vm6, %v1087_v43, %v1227_v45  ;;  %vm1196_vm7 = vcmp.ge.f32.partialorder %v1090_v46, 0.0  ;;  %v1228_v51 = vmul.f32 0.01, %v1090_v46  ;;  %v1584_v52 = vadd.f32 %v1583_v49, %v1582_v47  ;;  %v1695_v53 = vpop.f32.mrb[17].mxu1  ;;  %v1585_v54 = vpop.f32.mrb[18].mxu0 }
 0x182   : > { %1291 = vst [vmem:[%s2411_s20 + $0x30] sm:$0xff] %v1259_v50  ;;  %v1696_v55 = vadd.f32 %v1695_v53, %v1694_v48  ;;  %v1697_v56 = vpop.f32.mrb[18].mxu1  ;;  %v1586_v57 = vpop.f32.mrb[19].mxu0 }
 0x183   : > { %v1260_v58 = vsel %vm1196_vm7, %v1090_v46, %v1228_v51  ;;  %v934_v59 = vadd.f32 %v1584_v52, %v2406_v34  ;;  %v1587_v60 = vadd.f32 %v1586_v57, %v1585_v54  ;;  %v1698_v61 = vpop.f32.mrb[19].mxu1 }
 0x184   : > { %1292 = vst [vmem:[%s2411_s20 + $0x38] sm:$0xff] %v1260_v58  ;;  %v1699_v62 = vadd.f32 %v1698_v61, %v1697_v56 }
 0x185   : > { %v1095_v63 = vadd.f32 %v1696_v55, %v934_v59  ;;  %v937_v0 = vadd.f32 %v1587_v60, %v2406_v34 }
 0x187   : > { %vm1197_vm8 = vcmp.ge.f32.partialorder %v1095_v63, 0.0  ;;  %v1229_v1 = vmul.f32 0.01, %v1095_v63  ;;  %v1098_v2 = vadd.f32 %v1699_v62, %v937_v0  ;;  %v1588_v3 = vpop.f32.mrb[20].mxu0 }
 0x188   : > { %v1700_v4 = vpop.f32.mrb[20].mxu1  ;;  %v1589_v5 = vpop.f32.mrb[21].mxu0 }
 0x189   : > { %v1261_v6 = vsel %vm1197_vm8, %v1095_v63, %v1229_v1  ;;  %vm1198_vm9 = vcmp.ge.f32.partialorder %v1098_v2, 0.0  ;;  %v1230_v7 = vmul.f32 0.01, %v1098_v2  ;;  %v1590_v8 = vadd.f32 %v1589_v5, %v1588_v3  ;;  %v1701_v9 = vpop.f32.mrb[21].mxu1  ;;  %v1591_v10 = vpop.f32.mrb[22].mxu0 }
 0x18a   : > { %1293 = vst [vmem:[%s2411_s20 + $0x40] sm:$0xff] %v1261_v6  ;;  %v1702_v11 = vadd.f32 %v1701_v9, %v1700_v4  ;;  %v1703_v12 = vpop.f32.mrb[22].mxu1  ;;  %v1592_v13 = vpop.f32.mrb[23].mxu0 }
 0x18b   : > { %v1262_v14 = vsel %vm1198_vm9, %v1098_v2, %v1230_v7  ;;  %v942_v15 = vadd.f32 %v1590_v8, %v2406_v34  ;;  %v1593_v16 = vadd.f32 %v1592_v13, %v1591_v10  ;;  %v1704_v17 = vpop.f32.mrb[23].mxu1 }
 0x18c   : > { %1294 = vst [vmem:[%s2411_s20 + $0x48] sm:$0xff] %v1262_v14  ;;  %v1705_v18 = vadd.f32 %v1704_v17, %v1703_v12 }
 0x18d   : > { %v1103_v19 = vadd.f32 %v1702_v11, %v942_v15  ;;  %v945_v20 = vadd.f32 %v1593_v16, %v2406_v34 }
 0x18f   : > { %vm1199_vm10 = vcmp.ge.f32.partialorder %v1103_v19, 0.0  ;;  %v1231_v21 = vmul.f32 0.01, %v1103_v19  ;;  %v1106_v22 = vadd.f32 %v1705_v18, %v945_v20  ;;  %v1594_v23 = vpop.f32.mrb[24].mxu0 }
 0x190   : > { %v1706_v24 = vpop.f32.mrb[24].mxu1  ;;  %v1595_v25 = vpop.f32.mrb[25].mxu0 }
 0x191   : > { %v1263_v26 = vsel %vm1199_vm10, %v1103_v19, %v1231_v21  ;;  %vm1200_vm11 = vcmp.ge.f32.partialorder %v1106_v22, 0.0  ;;  %v1232_v27 = vmul.f32 0.01, %v1106_v22  ;;  %v1596_v28 = vadd.f32 %v1595_v25, %v1594_v23  ;;  %v1707_v29 = vpop.f32.mrb[25].mxu1  ;;  %v1597_v30 = vpop.f32.mrb[26].mxu0 }
 0x192   : > { %1295 = vst [vmem:[%s2411_s20 + $0x50] sm:$0xff] %v1263_v26  ;;  %v1708_v31 = vadd.f32 %v1707_v29, %v1706_v24  ;;  %v1709_v32 = vpop.f32.mrb[26].mxu1  ;;  %v1598_v33 = vpop.f32.mrb[27].mxu0 }
 0x193   : > { %v1264_v35 = vsel %vm1200_vm11, %v1106_v22, %v1232_v27  ;;  %v950_v36 = vadd.f32 %v1596_v28, %v2406_v34  ;;  %v1599_v37 = vadd.f32 %v1598_v33, %v1597_v30  ;;  %v1710_v38 = vpop.f32.mrb[27].mxu1 }
 0x194   : > { %1296 = vst [vmem:[%s2411_s20 + $0x58] sm:$0xff] %v1264_v35  ;;  %v1711_v39 = vadd.f32 %v1710_v38, %v1709_v32 }
 0x195   : > { %v1111_v40 = vadd.f32 %v1708_v31, %v950_v36  ;;  %v953_v41 = vadd.f32 %v1599_v37, %v2406_v34 }
 0x197   : > { %vm1201_vm12 = vcmp.ge.f32.partialorder %v1111_v40, 0.0  ;;  %v1233_v42 = vmul.f32 0.01, %v1111_v40  ;;  %v1114_v43 = vadd.f32 %v1711_v39, %v953_v41  ;;  %v1600_v44 = vpop.f32.mrb[28].mxu0 }
 0x198   : > { %v1712_v45 = vpop.f32.mrb[28].mxu1  ;;  %v1601_v46 = vpop.f32.mrb[29].mxu0 }
 0x199   : > { %v1265_v47 = vsel %vm1201_vm12, %v1111_v40, %v1233_v42  ;;  %vm1202_vm13 = vcmp.ge.f32.partialorder %v1114_v43, 0.0  ;;  %v1234_v48 = vmul.f32 0.01, %v1114_v43  ;;  %v1602_v49 = vadd.f32 %v1601_v46, %v1600_v44  ;;  %v1713_v50 = vpop.f32.mrb[29].mxu1  ;;  %v1603_v51 = vpop.f32.mrb[30].mxu0 }
 0x19a   : > { %1297 = vst [vmem:[%s2411_s20 + $0x60] sm:$0xff] %v1265_v47  ;;  %v1714_v52 = vadd.f32 %v1713_v50, %v1712_v45  ;;  %v1715_v53 = vpop.f32.mrb[30].mxu1  ;;  %v1604_v54 = vpop.f32.mrb[31].mxu0 }
 0x19b   : > { %v1266_v55 = vsel %vm1202_vm13, %v1114_v43, %v1234_v48  ;;  %v958_v56 = vadd.f32 %v1602_v49, %v2406_v34  ;;  %v1605_v57 = vadd.f32 %v1604_v54, %v1603_v51  ;;  %v1716_v58 = vpop.f32.mrb[31].mxu1 }
 0x19c   : > { %1298 = vst [vmem:[%s2411_s20 + $0x68] sm:$0xff] %v1266_v55  ;;  %v1717_v59 = vadd.f32 %v1716_v58, %v1715_v53 }
 0x19d   : > { %v1119_v60 = vadd.f32 %v1714_v52, %v958_v56  ;;  %v961_v61 = vadd.f32 %v1605_v57, %v2406_v34 }
 0x19f   : > { %vm1203_vm14 = vcmp.ge.f32.partialorder %v1119_v60, 0.0  ;;  %v1235_v62 = vmul.f32 0.01, %v1119_v60  ;;  %v1122_v63 = vadd.f32 %v1717_v59, %v961_v61  ;;  %v1606_v0 = vpop.f32.mrb[32].mxu0 }
 0x1a0   : > { %v1718_v1 = vpop.f32.mrb[32].mxu1  ;;  %v1607_v2 = vpop.f32.mrb[33].mxu0 }
 0x1a1   : > { %v1267_v3 = vsel %vm1203_vm14, %v1119_v60, %v1235_v62  ;;  %vm1204_vm15 = vcmp.ge.f32.partialorder %v1122_v63, 0.0  ;;  %v1236_v4 = vmul.f32 0.01, %v1122_v63  ;;  %v1608_v5 = vadd.f32 %v1607_v2, %v1606_v0  ;;  %v1719_v6 = vpop.f32.mrb[33].mxu1  ;;  %v1609_v7 = vpop.f32.mrb[34].mxu0 }
 0x1a2   : > { %1299 = vst [vmem:[%s2411_s20 + $0x70] sm:$0xff] %v1267_v3  ;;  %v1720_v8 = vadd.f32 %v1719_v6, %v1718_v1  ;;  %v1721_v9 = vpop.f32.mrb[34].mxu1  ;;  %v1610_v10 = vpop.f32.mrb[35].mxu0 }
 0x1a3   : > { %v1268_v11 = vsel %vm1204_vm15, %v1122_v63, %v1236_v4  ;;  %v966_v12 = vadd.f32 %v1608_v5, %v2406_v34  ;;  %v1611_v13 = vadd.f32 %v1610_v10, %v1609_v7  ;;  %v1722_v14 = vpop.f32.mrb[35].mxu1 }
 0x1a4   : > { %1300 = vst [vmem:[%s2411_s20 + $0x78] sm:$0xff] %v1268_v11  ;;  %v1723_v15 = vadd.f32 %v1722_v14, %v1721_v9 }
 0x1a5   : > { %v1127_v16 = vadd.f32 %v1720_v8, %v966_v12  ;;  %v969_v17 = vadd.f32 %v1611_v13, %v2406_v34 }
 0x1a7   : > { %vm1205_vm0 = vcmp.ge.f32.partialorder %v1127_v16, 0.0  ;;  %v1237_v18 = vmul.f32 0.01, %v1127_v16  ;;  %v1130_v19 = vadd.f32 %v1723_v15, %v969_v17  ;;  %v1612_v20 = vpop.f32.mrb[36].mxu0 }
 0x1a8   : > { %v1724_v21 = vpop.f32.mrb[36].mxu1  ;;  %v1613_v22 = vpop.f32.mrb[37].mxu0 }
 0x1a9   : > { %v1269_v23 = vsel %vm1205_vm0, %v1127_v16, %v1237_v18  ;;  %vm1206_vm1 = vcmp.ge.f32.partialorder %v1130_v19, 0.0  ;;  %v1238_v24 = vmul.f32 0.01, %v1130_v19  ;;  %v1614_v25 = vadd.f32 %v1613_v22, %v1612_v20  ;;  %v1725_v26 = vpop.f32.mrb[37].mxu1  ;;  %v1615_v27 = vpop.f32.mrb[38].mxu0 }
 0x1aa   : > { %1301 = vst [vmem:[%s2411_s20 + $0x80] sm:$0xff] %v1269_v23  ;;  %v1726_v28 = vadd.f32 %v1725_v26, %v1724_v21  ;;  %v1727_v29 = vpop.f32.mrb[38].mxu1  ;;  %v1616_v30 = vpop.f32.mrb[39].mxu0 }
 0x1ab   : > { %v1270_v31 = vsel %vm1206_vm1, %v1130_v19, %v1238_v24  ;;  %v974_v32 = vadd.f32 %v1614_v25, %v2406_v34  ;;  %v1617_v33 = vadd.f32 %v1616_v30, %v1615_v27  ;;  %v1728_v35 = vpop.f32.mrb[39].mxu1 }
 0x1ac   : > { %1302 = vst [vmem:[%s2411_s20 + $0x88] sm:$0xff] %v1270_v31  ;;  %v1729_v36 = vadd.f32 %v1728_v35, %v1727_v29 }
 0x1ad   : > { %v1135_v37 = vadd.f32 %v1726_v28, %v974_v32  ;;  %v977_v38 = vadd.f32 %v1617_v33, %v2406_v34 }
 0x1af   : > { %vm1207_vm2 = vcmp.ge.f32.partialorder %v1135_v37, 0.0  ;;  %v1239_v39 = vmul.f32 0.01, %v1135_v37  ;;  %v1138_v40 = vadd.f32 %v1729_v36, %v977_v38  ;;  %v1618_v41 = vpop.f32.mrb[40].mxu0 }
 0x1b0   : > { %v1730_v42 = vpop.f32.mrb[40].mxu1  ;;  %v1619_v43 = vpop.f32.mrb[41].mxu0 }
 0x1b1   : > { %v1271_v44 = vsel %vm1207_vm2, %v1135_v37, %v1239_v39  ;;  %vm1208_vm3 = vcmp.ge.f32.partialorder %v1138_v40, 0.0  ;;  %v1240_v45 = vmul.f32 0.01, %v1138_v40  ;;  %v1620_v46 = vadd.f32 %v1619_v43, %v1618_v41  ;;  %v1731_v47 = vpop.f32.mrb[41].mxu1  ;;  %v1621_v48 = vpop.f32.mrb[42].mxu0 }
 0x1b2   : > { %1303 = vst [vmem:[%s2411_s20 + $0x90] sm:$0xff] %v1271_v44  ;;  %v1732_v49 = vadd.f32 %v1731_v47, %v1730_v42  ;;  %v1733_v50 = vpop.f32.mrb[42].mxu1  ;;  %v1622_v51 = vpop.f32.mrb[43].mxu0 }
 0x1b3   : > { %v1272_v52 = vsel %vm1208_vm3, %v1138_v40, %v1240_v45  ;;  %v982_v53 = vadd.f32 %v1620_v46, %v2406_v34  ;;  %v1623_v54 = vadd.f32 %v1622_v51, %v1621_v48  ;;  %v1734_v55 = vpop.f32.mrb[43].mxu1 }
 0x1b4   : > { %1304 = vst [vmem:[%s2411_s20 + $0x98] sm:$0xff] %v1272_v52  ;;  %v1735_v56 = vadd.f32 %v1734_v55, %v1733_v50 }
 0x1b5   : > { %v1143_v57 = vadd.f32 %v1732_v49, %v982_v53  ;;  %v985_v58 = vadd.f32 %v1623_v54, %v2406_v34 }
 0x1b7   : > { %vm1209_vm4 = vcmp.ge.f32.partialorder %v1143_v57, 0.0  ;;  %v1241_v59 = vmul.f32 0.01, %v1143_v57  ;;  %v1146_v60 = vadd.f32 %v1735_v56, %v985_v58  ;;  %v1624_v61 = vpop.f32.mrb[44].mxu0 }
 0x1b8   : > { %v1736_v62 = vpop.f32.mrb[44].mxu1  ;;  %v1625_v63 = vpop.f32.mrb[45].mxu0 }
 0x1b9   : > { %v1273_v0 = vsel %vm1209_vm4, %v1143_v57, %v1241_v59  ;;  %vm1210_vm5 = vcmp.ge.f32.partialorder %v1146_v60, 0.0  ;;  %v1242_v1 = vmul.f32 0.01, %v1146_v60  ;;  %v1626_v2 = vadd.f32 %v1625_v63, %v1624_v61  ;;  %v1737_v3 = vpop.f32.mrb[45].mxu1  ;;  %v1627_v4 = vpop.f32.mrb[46].mxu0 }
 0x1ba   : > { %1305 = vst [vmem:[%s2411_s20 + $0xa0] sm:$0xff] %v1273_v0  ;;  %v1738_v5 = vadd.f32 %v1737_v3, %v1736_v62  ;;  %v1739_v6 = vpop.f32.mrb[46].mxu1  ;;  %v1628_v7 = vpop.f32.mrb[47].mxu0 }
 0x1bb   : > { %v1274_v8 = vsel %vm1210_vm5, %v1146_v60, %v1242_v1  ;;  %v990_v9 = vadd.f32 %v1626_v2, %v2406_v34  ;;  %v1629_v10 = vadd.f32 %v1628_v7, %v1627_v4  ;;  %v1740_v11 = vpop.f32.mrb[47].mxu1 }
 0x1bc   : > { %1306 = vst [vmem:[%s2411_s20 + $0xa8] sm:$0xff] %v1274_v8  ;;  %v1741_v12 = vadd.f32 %v1740_v11, %v1739_v6 }
 0x1bd   : > { %v1151_v13 = vadd.f32 %v1738_v5, %v990_v9  ;;  %v993_v14 = vadd.f32 %v1629_v10, %v2406_v34 }
 0x1bf   : > { %vm1211_vm6 = vcmp.ge.f32.partialorder %v1151_v13, 0.0  ;;  %v1243_v15 = vmul.f32 0.01, %v1151_v13  ;;  %v1154_v16 = vadd.f32 %v1741_v12, %v993_v14  ;;  %v1630_v17 = vpop.f32.mrb[48].mxu0 }
 0x1c0   : > { %v1742_v18 = vpop.f32.mrb[48].mxu1  ;;  %v1631_v19 = vpop.f32.mrb[49].mxu0 }
 0x1c1   : > { %v1275_v20 = vsel %vm1211_vm6, %v1151_v13, %v1243_v15  ;;  %vm1212_vm7 = vcmp.ge.f32.partialorder %v1154_v16, 0.0  ;;  %v1244_v21 = vmul.f32 0.01, %v1154_v16  ;;  %v1632_v22 = vadd.f32 %v1631_v19, %v1630_v17  ;;  %v1743_v23 = vpop.f32.mrb[49].mxu1  ;;  %v1633_v24 = vpop.f32.mrb[50].mxu0 }
 0x1c2   : > { %1307 = vst [vmem:[%s2411_s20 + $0xb0] sm:$0xff] %v1275_v20  ;;  %v1744_v25 = vadd.f32 %v1743_v23, %v1742_v18  ;;  %v1745_v26 = vpop.f32.mrb[50].mxu1  ;;  %v1634_v27 = vpop.f32.mrb[51].mxu0 }
 0x1c3   : > { %v1276_v28 = vsel %vm1212_vm7, %v1154_v16, %v1244_v21  ;;  %v998_v29 = vadd.f32 %v1632_v22, %v2406_v34  ;;  %v1635_v30 = vadd.f32 %v1634_v27, %v1633_v24  ;;  %v1746_v31 = vpop.f32.mrb[51].mxu1 }
 0x1c4   : > { %1308 = vst [vmem:[%s2411_s20 + $0xb8] sm:$0xff] %v1276_v28  ;;  %v1747_v32 = vadd.f32 %v1746_v31, %v1745_v26 }
 0x1c5   : > { %v1159_v33 = vadd.f32 %v1744_v25, %v998_v29  ;;  %v1001_v35 = vadd.f32 %v1635_v30, %v2406_v34 }
 0x1c7   : > { %vm1213_vm8 = vcmp.ge.f32.partialorder %v1159_v33, 0.0  ;;  %v1245_v36 = vmul.f32 0.01, %v1159_v33  ;;  %v1162_v37 = vadd.f32 %v1747_v32, %v1001_v35  ;;  %v1636_v38 = vpop.f32.mrb[52].mxu0 }
 0x1c8   : > { %v1748_v39 = vpop.f32.mrb[52].mxu1  ;;  %v1637_v40 = vpop.f32.mrb[53].mxu0 }
 0x1c9   : > { %v1277_v41 = vsel %vm1213_vm8, %v1159_v33, %v1245_v36  ;;  %vm1214_vm9 = vcmp.ge.f32.partialorder %v1162_v37, 0.0  ;;  %v1246_v42 = vmul.f32 0.01, %v1162_v37  ;;  %v1638_v43 = vadd.f32 %v1637_v40, %v1636_v38  ;;  %v1749_v44 = vpop.f32.mrb[53].mxu1  ;;  %v1639_v45 = vpop.f32.mrb[54].mxu0 }
 0x1ca   : > { %1309 = vst [vmem:[%s2411_s20 + $0xc0] sm:$0xff] %v1277_v41  ;;  %v1750_v46 = vadd.f32 %v1749_v44, %v1748_v39  ;;  %v1751_v47 = vpop.f32.mrb[54].mxu1  ;;  %v1640_v48 = vpop.f32.mrb[55].mxu0 }
 0x1cb   : > { %v1278_v49 = vsel %vm1214_vm9, %v1162_v37, %v1246_v42  ;;  %v1006_v50 = vadd.f32 %v1638_v43, %v2406_v34  ;;  %v1641_v51 = vadd.f32 %v1640_v48, %v1639_v45  ;;  %v1752_v52 = vpop.f32.mrb[55].mxu1 }
 0x1cc   : > { %1310 = vst [vmem:[%s2411_s20 + $0xc8] sm:$0xff] %v1278_v49  ;;  %v1753_v53 = vadd.f32 %v1752_v52, %v1751_v47 }
 0x1cd   : > { %v1167_v54 = vadd.f32 %v1750_v46, %v1006_v50  ;;  %v1009_v55 = vadd.f32 %v1641_v51, %v2406_v34 }
 0x1cf   : > { %vm1215_vm10 = vcmp.ge.f32.partialorder %v1167_v54, 0.0  ;;  %v1247_v56 = vmul.f32 0.01, %v1167_v54  ;;  %v1170_v57 = vadd.f32 %v1753_v53, %v1009_v55  ;;  %v1642_v58 = vpop.f32.mrb[56].mxu0 }
 0x1d0   : > { %v1754_v59 = vpop.f32.mrb[56].mxu1  ;;  %v1643_v60 = vpop.f32.mrb[57].mxu0 }
 0x1d1   : > { %v1279_v61 = vsel %vm1215_vm10, %v1167_v54, %v1247_v56  ;;  %vm1216_vm11 = vcmp.ge.f32.partialorder %v1170_v57, 0.0  ;;  %v1248_v62 = vmul.f32 0.01, %v1170_v57  ;;  %v1644_v63 = vadd.f32 %v1643_v60, %v1642_v58  ;;  %v1755_v0 = vpop.f32.mrb[57].mxu1  ;;  %v1645_v1 = vpop.f32.mrb[58].mxu0 }
 0x1d2   : > { %1311 = vst [vmem:[%s2411_s20 + $0xd0] sm:$0xff] %v1279_v61  ;;  %v1756_v2 = vadd.f32 %v1755_v0, %v1754_v59  ;;  %v1757_v3 = vpop.f32.mrb[58].mxu1  ;;  %v1646_v4 = vpop.f32.mrb[59].mxu0 }
 0x1d3   : > { %v1280_v5 = vsel %vm1216_vm11, %v1170_v57, %v1248_v62  ;;  %v1014_v6 = vadd.f32 %v1644_v63, %v2406_v34  ;;  %v1647_v7 = vadd.f32 %v1646_v4, %v1645_v1  ;;  %v1758_v8 = vpop.f32.mrb[59].mxu1 }
 0x1d4   : > { %1312 = vst [vmem:[%s2411_s20 + $0xd8] sm:$0xff] %v1280_v5  ;;  %v1759_v9 = vadd.f32 %v1758_v8, %v1757_v3 }
 0x1d5   : > { %v1175_v10 = vadd.f32 %v1756_v2, %v1014_v6  ;;  %v1017_v11 = vadd.f32 %v1647_v7, %v2406_v34 }
 0x1d7   : > { %vm1217_vm12 = vcmp.ge.f32.partialorder %v1175_v10, 0.0  ;;  %v1249_v12 = vmul.f32 0.01, %v1175_v10  ;;  %v1178_v13 = vadd.f32 %v1759_v9, %v1017_v11  ;;  %v1648_v14 = vpop.f32.mrb[60].mxu0 }
 0x1d8   : > { %v1760_v15 = vpop.f32.mrb[60].mxu1  ;;  %v1649_v16 = vpop.f32.mrb[61].mxu0 }
 0x1d9   : > { %v1281_v17 = vsel %vm1217_vm12, %v1175_v10, %v1249_v12  ;;  %vm1218_vm13 = vcmp.ge.f32.partialorder %v1178_v13, 0.0  ;;  %v1250_v18 = vmul.f32 0.01, %v1178_v13  ;;  %v1650_v19 = vadd.f32 %v1649_v16, %v1648_v14  ;;  %v1761_v20 = vpop.f32.mrb[61].mxu1  ;;  %v1651_v21 = vpop.f32.mrb[62].mxu0 }
 0x1da   : > { %1313 = vst [vmem:[%s2411_s20 + $0xe0] sm:$0xff] %v1281_v17  ;;  %v1762_v22 = vadd.f32 %v1761_v20, %v1760_v15  ;;  %v1763_v23 = vpop.f32.mrb[62].mxu1  ;;  %v1652_v24 = vpop.f32.mrb[63].mxu0 }
 0x1db   : > { %v1282_v25 = vsel %vm1218_vm13, %v1178_v13, %v1250_v18  ;;  %v1022_v26 = vadd.f32 %v1650_v19, %v2406_v34  ;;  %v1653_v27 = vadd.f32 %v1652_v24, %v1651_v21  ;;  %v1764_v28 = vpop.f32.mrb[63].mxu1 }
 0x1dc   : > { %1314 = vst [vmem:[%s2411_s20 + $0xe8] sm:$0xff] %v1282_v25  ;;  %v1765_v29 = vadd.f32 %v1764_v28, %v1763_v23 }
 0x1dd   : > { %v1183_v30 = vadd.f32 %v1762_v22, %v1022_v26  ;;  %v1025_v31 = vadd.f32 %v1653_v27, %v2406_v34 }
 0x1df   : > { %vm1219_vm14 = vcmp.ge.f32.partialorder %v1183_v30, 0.0  ;;  %v1251_v32 = vmul.f32 0.01, %v1183_v30  ;;  %v1186_v33 = vadd.f32 %v1765_v29, %v1025_v31 }
 0x1e1   : > { %v1283_v35 = vsel %vm1219_vm14, %v1183_v30, %v1251_v32  ;;  %vm1220_vm15 = vcmp.ge.f32.partialorder %v1186_v33, 0.0  ;;  %v1252_v36 = vmul.f32 0.01, %v1186_v33 }
 0x1e2   : > { %1315 = vst [vmem:[%s2411_s20 + $0xf0] sm:$0xff] %v1283_v35 }
 0x1e3   : > { %v1284_v34 = vsel %vm1220_vm15, %v1186_v33, %v1252_v36 }
 0x1e4   : > { %1316 = vst [vmem:[%s2411_s20 + $0xf8] sm:$0xff] %v1284_v34 }
 0x1e5   : > { %2066 = shalt.err (!%p2063_p2)
}
 0x1e6   : > { %s2067_s11 = scalar_lea.hbm %s2478_s23, 4096  ;;  %s2071_s29 = scalar_lea.hbm %s2529_s3, 8192 }
 0x1e7   : > { %p2068_p13 = scmp.ne.s32.totalorder %s2478_s23, %s2067_s11  ;;  %p2072_p4 = scmp.lt.u32.totalorder %s2478_s23, %s2529_s3 }
 0x1e8   : > { %p2073_p5 = scmp.lt.u32.totalorder %s2071_s29, %s2067_s11  ;;  %p2075_p11 = scmp.lt.u32.totalorder %s2067_s11, %s2478_s23 }
 0x1e9   : > { %p2069_p6 = pnand %p2068_p13, %p2543_p0 }
 0x1ea   : > { %p2074_p8 = por %p2073_p5, %p2072_p4 }
 0x1eb   : > { %p2070_p10 = pneg %p2069_p6 }
 0x1ec   : > { %p2076_p1 = por %p2075_p11, %p2074_p8 }
 0x1ee   : > { %p2077_p3 = pnand %p2076_p1, %p2070_p10 }
 0x1f0   : > { %2080 = shalt.err (!%p2077_p3)
}
 0x1f1   : > { %s2133_s18 = smov 128   ;;  %s2134_s20 = smov 8  }
 0x1f2   : > { %1776 = dma.vmem_to_hbm [thread:$0]  (%p2543_p0), %s2480_s26, 4096, %s2478_s23, %s1318_s16, %s2133_s18, %s2133_s18, %s2134_s20  }
 0x1f3 PF: > { %s1346_s21 = sand.u32 1, %s2111_s12   ;;  %p2544_p7 = scmp.ne.s32.totalorder %s2534_s19, 0 }
 0x1f4   : > { %p2545_p9 = scmp.ge.s32.totalorder %s2123_s15, 2  ;;  %s1347_s27 = scalar_lea.sflag [#allocation4], %s1346_s21 }
 0x1f6   : > { %p1790_p12 = pnand %p2545_p9, %p2544_p7 }
 0x1f8   : > { %2106 = dma.done.wait (!%p1790_p12), %s1347_s27, 4096  }
 0x1f9   : > { %2108 = vsyncadd (!%p1790_p12), %s1347_s27, 4294963200  ;;  %p17_p2 = scmp.ge.s32.totalorder %s2266_s5, 4   ;;  %s2546_s12 = smov %s2115_s13 }
 0x1fa   : > { %s2547_s13 = smov %s2119_s14  ;;  %s2548_s14 = smov %s2282_s8 }
 0x1fb   : > { %s2549_s15 = smov %s2266_s5  ;;  %19 = sbr.rel (!%p17_p2) target bundleno = 6 (0x6), region = 85 }
 0x202   :  { %1352 = vsyncpa [#allocation3], 1 }
 0x203   :  { %1354 = vsyncpa [#allocation3 + $0x1], 1 }
 0x204   :  { %1355 = vsyncpa [#allocation6], 1 }
 0x205   :  { %1356 = vsyncpa [#allocation4], 1 }
 0x206   :  { %1358 = vsyncpa [#allocation4 + $0x1], 1 }

// kernel: gcn1_forward.7
= control target key start
LH: loop header
LB: loop body
LE: loop exit
PB: predicated region body
PF: predicated region fallthrough
CT: control target
= control target key end

     0   :  { %8 = vsyncpa [#allocation3], 0  ;;  %s3204_s0 = inlined_call_operand.hbm [shape: bf16[512,512], index: 0, kind: input, shape index: {}]   ;;  %s3205_s1 = inlined_call_operand.hbm [shape: bf16[512,128], index: 1, kind: input, shape index: {}]   ;;  %s3206_s2 = inlined_call_operand.hbm [shape: f32[1,128], index: 2, kind: input, shape index: {}]   ;;  %s3207_s3 = inlined_call_operand.hbm [shape: f32[512,128], index: 3, kind: output, shape index: {}]  }
   0x1   :  { %10 = vsyncpa [#allocation3 + $0x1], 0 }
   0x2   :  { %11 = vsyncpa [#allocation6], 0 }
   0x3   :  { %12 = vsyncpa [#allocation4], 0 }
   0x4   :  { %14 = vsyncpa [#allocation4 + $0x1], 0  ;;  %s2510_s12 = smov 0   ;;  %s2512_s13 = smov 0  }
   0x5   :  { %s2514_s14 = smov 0   ;;  %s2516_s15 = smov 0  }
   0x6 LB: > { %s2531_s16 = sadd.s32 4294967295, %s2478_s15   ;;  %s1650_s17 = sadd.s32 4294967294, %s2478_s15   ;;  %s2478_s15 = sphi %s2516_s15, %s3227_s15   ;;  %s2474_s14 = sphi %s2514_s14, %s3226_s14   ;;  %s2470_s13 = sphi %s2512_s13, %s3225_s13   ;;  %s2466_s12 = sphi %s2510_s12, %s3224_s12  }
   0x7   : > { %p40_p0 = scmp.ne.s32.totalorder %s2470_s13, %s2466_s12  ;;  %p3208_p1 = scmp.eq.s32.totalorder %s2531_s16, 0 }
   0x8   : > { %p112_p3 = scmp.eq.s32.totalorder %s1650_s17, 1  ;;  %p1651_p5 = scmp.ge.s32.totalorder %s2478_s15, 1 }
   0x9   : > { %p2540_p4 = por %p3208_p1, %p40_p0  ;;  %p119_p7 = scmp.lt.s32.totalorder %s2478_s15, 3 }
   0xa   : > { %p2545_p6 = por %p112_p3, %p40_p0  ;;  %s2480_s21 = smov [#allocation5]  }
   0xb   : > { %s3211_s18 = scalar_select %p2540_p4, 1, 0 }
   0xc   : > { %s3212_s19 = scalar_select %p2545_p6, 1, 0 }
   0xd   : > { %p2550_p8 = pnand %p1651_p5, %p119_p7  ;;  %s131_s22 = sshll.u32 %s2480_s21, 4  ;;  %s2554_s22 = int_to_ptr.vmem [resolvable:$true] %s131_s22 }
   0xe   : > { %s2481_s24 = smov [#allocation7]   ;;  %s2322_s28 = scalar_lea.hbm %s3205_s1, 4096 }
   0xf   : > { %p2005_p9 = pneg %p2550_p8  ;;  %s145_s25 = sshll.u32 %s2481_s24, 4  ;;  %s2565_s25 = int_to_ptr.vmem [resolvable:$true] %s145_s25 }
  0x10   : > { %p2323_p12 = scmp.ne.s32.totalorder %s3205_s1, %s2322_s28  ;;  %p2329_p5 = scmp.lt.u32.totalorder %s2322_s28, %s3205_s1 }
  0x11   : > { %p2561_p11 = pnand %p2005_p9, %p3208_p1 }
  0x13   : > { %p2324_p13 = pneg %p2561_p11 }
  0x15   : > { %p2325_p0 = pnand %p2324_p13, %p2323_p12 }
  0x17   : > { %p2326_p3 = pneg %p2325_p0 }
  0x19   : > { %p2331_p7 = pnand %p2329_p5, %p2326_p3 }
  0x1b   : > { %2334 = shalt.err (!%p2331_p7)
}
  0x1c   : > { %s2335_s6 = scalar_lea.vmem %s2554_s22, 4096  ;;  %p2343_p2 = scmp.lt.s32.totalorder %s2554_s22, %s2554_s22 }
  0x1d   : > { %p2336_p9 = scmp.ne.s32.totalorder %s2554_s22, %s2335_s6  ;;  %p2344_p12 = scmp.lt.s32.totalorder %s2335_s6, %s2335_s6 }
  0x1f   : > { %p2338_p10 = pnand %p2336_p9, %p2324_p13  ;;  %p2345_p0 = por %p2344_p12, %p2343_p2 }
  0x21   : > { %p2339_p1 = pneg %p2338_p10 }
  0x23   : > { %p2346_p6 = pnand %p2345_p0, %p2339_p1 }
  0x25   : > { %2349 = shalt.err (!%p2346_p6)
}
  0x26   : > { %s2482_s7 = smov 64   ;;  %s2483_s8 = smov 4  }
  0x27   : > { %2008 = dma.hbm_to_vmem [thread:$0]  (!%p2561_p11), %s3205_s1, 4096, %s2554_s22, [#allocation6], %s2482_s7, %s2482_s7, %s2483_s8  }
  0x28   : > { %s2350_s21 = scalar_lea.hbm %s3206_s2, 16 }
  0x29   : > { %p2351_p2 = scmp.ne.s32.totalorder %s3206_s2, %s2350_s21  ;;  %p2357_p10 = scmp.lt.u32.totalorder %s2350_s21, %s3206_s2 }
  0x2b   : > { %p2353_p1 = pnand %p2351_p2, %p2324_p13 }
  0x2d   : > { %p2354_p6 = pneg %p2353_p1 }
  0x2f   : > { %p2359_p3 = pnand %p2357_p10, %p2354_p6 }
  0x31   : > { %2362 = shalt.err (!%p2359_p3)
}
  0x32   : > { %s2363_s22 = scalar_lea.vmem %s2565_s25, 16  ;;  %s2370_s29 = scalar_lea.vmem %s2565_s25, 32 }
  0x33   : > { %p2364_p5 = scmp.ne.s32.totalorder %s2565_s25, %s2363_s22  ;;  %p2371_p12 = scmp.lt.s32.totalorder %s2565_s25, %s2565_s25 }
  0x34   : > { %p2372_p0 = scmp.lt.s32.totalorder %s2370_s29, %s2363_s22 }
  0x35   : > { %p2366_p7 = pnand %p2364_p5, %p2324_p13 }
  0x36   : > { %p2373_p2 = por %p2372_p0, %p2371_p12 }
  0x37   : > { %p2367_p9 = pneg %p2366_p7 }
  0x39   : > { %p2374_p1 = pnand %p2373_p2, %p2367_p9 }
  0x3b   : > { %2377 = shalt.err (!%p2374_p1)
}
  0x3c   : > { %2011 = dma.hbm_to_vmem [thread:$0]  (!%p2561_p11), %s3206_s2, 16, %s2565_s25, [#allocation6]  }
  0x3d   : > { %s2621_s5 = sadd.s32 1, %s2478_s15   ;;  %s27_s23 = sadd.s32 1, %s2474_s14 }
  0x3e   : > { %s24_s6 = ssub.s32 %s2478_s15, %s2621_s5  ;;  %p34_p13 = scmp.ne.s32.totalorder %s2474_s14, %s2470_s13 }
  0x3f   : > { %p25_p6 = scmp.eq.s32.totalorder %s24_s6, 0  ;;  %p35_p10 = scmp.eq.s32.totalorder %s2478_s15, 0 }
  0x40   : > { %p3215_p3 = scmp.eq.s32.totalorder %s2531_s16, 1  ;;  %p2022_p7 = scmp.lt.s32.totalorder %s2478_s15, 2 }
  0x41   : > { %s2637_s8 = scalar_select %p25_p6, %s2474_s14, %s27_s23  }
  0x42   : > { %p2631_p5 = por %p3215_p3, %p34_p13  ;;  %p36_p9 = por %p35_p10, %p34_p13 }
  0x43   : > { %s156_s9 = sand.u32 1, %s2474_s14   ;;  %s1767_s25 = sshll.u32 %s2478_s15, 13 }
  0x44   : > { %s3216_s7 = scalar_select %p2631_p5, 1, 0 }
  0x45   : > { %s1655_s10 = sshll.u32 %s156_s9, 9  ;;  %s2644_s21 = scalar_lea.hbm %s3204_s0, %s1767_s25 }
  0x46   : > { %s160_s24 = scalar_lea.vmem [#allocation2], %s1655_s10  ;;  %p2648_p11 = pnand %p2022_p7, %p36_p9 }
  0x47   : > { %s168_s26 = sshll.u32 %s160_s24, 4  ;;  %s2652_s28 = scalar_lea.sflag [#allocation3], %s156_s9  ;;  %s2646_s26 = int_to_ptr.vmem [resolvable:$true] %s168_s26 }
  0x48   : > { %s2378_s22 = scalar_lea.hbm %s2644_s21, 8192  ;;  %p2380_p0 = pneg %p2648_p11 }
  0x49   : > { %p2379_p12 = scmp.ne.s32.totalorder %s2644_s21, %s2378_s22  ;;  %s2383_s4 = scalar_lea.hbm %s3204_s0, 16384 }
  0x4a   : > { %p2384_p13 = scmp.lt.u32.totalorder %s2644_s21, %s3204_s0  ;;  %p2385_p6 = scmp.lt.u32.totalorder %s2383_s4, %s2378_s22 }
  0x4b   : > { %p2381_p2 = pnand %p2380_p0, %p2379_p12  ;;  %p2387_p3 = scmp.lt.u32.totalorder %s2378_s22, %s2644_s21 }
  0x4c   : > { %p2386_p10 = por %p2385_p6, %p2384_p13 }
  0x4d   : > { %p2382_p1 = pneg %p2381_p2 }
  0x4e   : > { %p2388_p7 = por %p2387_p3, %p2386_p10 }
  0x50   : > { %p2389_p9 = pnand %p2388_p7, %p2382_p1 }
  0x52   : > { %2392 = shalt.err (!%p2389_p9)
}
  0x53   : > { %s2393_s9 = scalar_lea.vmem %s2646_s26, 8192  ;;  %s2484_s10 = smov [#allocation2]  }
  0x54   : > { %p2394_p12 = scmp.ne.s32.totalorder %s2646_s26, %s2393_s9  ;;  %s2398_s25 = sshll.u32 %s2484_s10, 4  ;;  %s2399_s25 = int_to_ptr.vmem [resolvable:$false] %s2398_s25 }
  0x55   : > { %s2400_s11 = scalar_lea.vmem %s2399_s25, 16384  ;;  %p2401_p4 = scmp.lt.s32.totalorder %s2646_s26, %s2399_s25 }
  0x56   : > { %p2396_p2 = pnand %p2394_p12, %p2380_p0  ;;  %p2402_p13 = scmp.lt.s32.totalorder %s2400_s11, %s2393_s9 }
  0x58   : > { %p2397_p5 = pneg %p2396_p2  ;;  %p2403_p6 = por %p2402_p13, %p2401_p4 }
  0x5a   : > { %p2404_p10 = pnand %p2403_p6, %p2397_p5 }
  0x5c   : > { %2407 = shalt.err (!%p2404_p10)
}
  0x5d   : > { %s2485_s17 = smov 256   ;;  %s2486_s24 = smov 16  }
  0x5e   : > { %2015 = dma.hbm_to_vmem [thread:$0]  (!%p2648_p11), %s2644_s21, 8192, %s2646_s26, %s2652_s28, %s2485_s17, %s2485_s17, %s2486_s24  }
  0x5f   : > { %180 = sbr.rel (%p2550_p8) target bundleno = 809 (0x329), region = 32  ;;  %s2683_s22 = sand.u32 (!%p2550_p8), 1, %s2470_s13  }
  0x60   : > { %s1660_s29 = sshll.u32 (!%p2550_p8), %s2683_s22, 9  ;;  %s183_s30 = scalar_lea.sflag (!%p2550_p8), [#allocation3], %s2683_s22 }
  0x61   : > { %s2687_s4 = scalar_lea.vmem (!%p2550_p8), [#allocation2], %s1660_s29  ;;  %p3218_p4 = scmp.ne.s32.totalorder (!%p2550_p8), %s3211_s18, 0 }
  0x66   : > { %2453 = dma.done.wait (%p3218_p4), %s183_s30, 8192  }
  0x67   : > { %2455 = vsyncadd (%p3218_p4), %s183_s30, 4294959104  ;;  %p3219_p5 = scmp.eq.s32.totalorder %s2531_s16, 0 }
  0x69   : > { %2457 = dma.done.wait (%p3219_p5), [#allocation6], 4112   ;;  %p3220_p8 = pmov %p3219_p5 }
  0x6a   : > { %v2066_v0 = vld [vmem:[#allocation5 + $0x40] sm:$0xff]   ;;  %v2070_v4 = vld [vmem:[#allocation5 + $0x48] sm:$0xff]   ;;  %v2074_v8 = vld [vmem:[#allocation5 + $0x50] sm:$0xff]   ;;  %s1663_s18 = sshll.u32 %s2683_s22, 8  ;;  %s1768_s21 = sshll.u32 %s2531_s16, 12 }
  0x6b   : > { %2459 = vsyncadd (%p3220_p8), [#allocation6], 4294963184  ;;  %v2067_v1 = vld [vmem:[#allocation5 + $0xc0] sm:$0xff]   ;;  %1769 = vmatprep.subr.bf16.mxu0 %v2066_v0  ;;  %v2071_v5 = vld [vmem:[#allocation5 + $0xc8] sm:$0xff]   ;;  %s3088_s20 = scalar_lea.vmem [#allocation8], %s1663_s18  ;;  %s3155_s23 = scalar_lea.hbm %s3207_s3, %s1768_s21 }
  0x6c   : > { %v2068_v2 = vld [vmem:[#allocation5] sm:$0xff]   ;;  %1881 = vmatprep.subr.bf16.mxu1 %v2067_v1  ;;  %v2072_v6 = vld [vmem:[#allocation5 + $0x8] sm:$0xff]   ;;  %v2075_v9 = vld [vmem:[#allocation5 + $0xd0] sm:$0xff]   ;;  %s1558_s26 = sshll.u32 %s3088_s20, 4  ;;  %s1545_s16 = scalar_lea.sflag [#allocation4], %s2683_s22  ;;  %s3157_s26 = int_to_ptr.vmem [resolvable:$true] %s1558_s26 }
  0x6d   : > { %v2069_v3 = vld [vmem:[#allocation5 + $0x80] sm:$0xff]   ;;  %1770 = vmatpush3.bf16.msra.mxu0 %v2068_v2  ;;  %v2073_v7 = vld [vmem:[#allocation5 + $0x88] sm:$0xff]   ;;  %v2076_v10 = vld [vmem:[#allocation5 + $0x10] sm:$0xff]   ;;  %s2408_s6 = scalar_lea.vmem %s3157_s26, 4096  ;;  %p3221_p0 = scmp.ne.s32.totalorder %s3216_s7, 0 }
  0x6e   : > { %1882 = vmatpush3.bf16.msra.mxu1 %v2069_v3  ;;  %1771 = vmatprep.subr.bf16.mxu0 %v2070_v4  ;;  %v2077_v11 = vld [vmem:[#allocation5 + $0x90] sm:$0xff]   ;;  %v2078_v12 = vld [vmem:[#allocation5 + $0x58] sm:$0xff]   ;;  %v2082_v16 = vld [vmem:[#allocation5 + $0x60] sm:$0xff]   ;;  %p2409_p11 = scmp.ne.s32.totalorder %s3157_s26, %s2408_s6  ;;  %s2487_s9 = smov [#allocation8]  }
  0x6f   : > { %1883 = vmatprep.subr.bf16.mxu1 %v2071_v5  ;;  %v2079_v13 = vld [vmem:[#allocation5 + $0xd8] sm:$0xff]   ;;  %v2083_v17 = vld [vmem:[#allocation5 + $0xe0] sm:$0xff]   ;;  %v2086_v20 = vld [vmem:[#allocation5 + $0x68] sm:$0xff]   ;;  %s2412_s10 = sshll.u32 %s2487_s9, 4  ;;  %s2413_s10 = int_to_ptr.vmem [resolvable:$false] %s2412_s10 }
  0x70   : > { %v2080_v14 = vld [vmem:[#allocation5 + $0x18] sm:$0xff]   ;;  %v2084_v18 = vld [vmem:[#allocation5 + $0x20] sm:$0xff]   ;;  %v2087_v21 = vld [vmem:[#allocation5 + $0xe8] sm:$0xff]   ;;  %p2410_p1 = pnand %p2409_p11, %p3221_p0  ;;  %s2414_s25 = scalar_lea.vmem %s2413_s10, 8192 }
  0x71   : > { %1772 = vmatpush3.bf16.msra.mxu0 %v2072_v6  ;;  %v2081_v15 = vld [vmem:[#allocation5 + $0x98] sm:$0xff]   ;;  %v2085_v19 = vld [vmem:[#allocation5 + $0xa0] sm:$0xff]   ;;  %v2088_v22 = vld [vmem:[#allocation5 + $0x28] sm:$0xff]   ;;  %p2415_p7 = scmp.lt.s32.totalorder %s3157_s26, %s2413_s10  ;;  %p2416_p9 = scmp.lt.s32.totalorder %s2414_s25, %s2408_s6 }
  0x72   : > { %1884 = vmatpush3.bf16.msra.mxu1 %v2073_v7  ;;  %1773 = vmatprep.subr.bf16.mxu0 %v2074_v8  ;;  %v2089_v23 = vld [vmem:[#allocation5 + $0xa8] sm:$0xff]   ;;  %v2090_v24 = vld [vmem:[#allocation5 + $0x70] sm:$0xff]   ;;  %v2094_v28 = vld [vmem:[#allocation5 + $0x78] sm:$0xff]   ;;  %p2411_p3 = pneg %p2410_p1 }
  0x73   : > { %1885 = vmatprep.subr.bf16.mxu1 %v2075_v9  ;;  %v2091_v25 = vld [vmem:[#allocation5 + $0xf0] sm:$0xff]   ;;  %v2095_v29 = vld [vmem:[#allocation5 + $0xf8] sm:$0xff]   ;;  %p2417_p12 = por %p2416_p9, %p2415_p7 }
  0x74   : > { %v2092_v26 = vld [vmem:[#allocation5 + $0x30] sm:$0xff]   ;;  %v2096_v30 = vld [vmem:[#allocation5 + $0x38] sm:$0xff]  }
  0x75   : > { %1774 = vmatpush3.bf16.msra.mxu0 %v2076_v10  ;;  %v2093_v27 = vld [vmem:[#allocation5 + $0xb0] sm:$0xff]   ;;  %v2097_v31 = vld [vmem:[#allocation5 + $0xb8] sm:$0xff]   ;;  %p2418_p2 = pnand %p2417_p12, %p2411_p3 }
  0x76   : > { %1886 = vmatpush3.bf16.msra.mxu1 %v2077_v11  ;;  %1775 = vmatprep.subr.bf16.mxu0 %v2078_v12  ;;  %v2098_v32 = vld [vmem:[%s2687_s4] ss:$16 sps:$4 sm:$0xff]   ;;  %v2100_v33 = vld [vmem:[%s2687_s4 + $0x4] ss:$16 sps:$4 sm:$0xff]   ;;  %v2101_v34 = vld [vmem:[%s2687_s4 + $0x8] ss:$16 sps:$4 sm:$0xff]  }
  0x77   : > { %1887 = vmatprep.subr.bf16.mxu1 %v2079_v13  ;;  %v2103_v35 = vld [vmem:[%s2687_s4 + $0xc] ss:$16 sps:$4 sm:$0xff]   ;;  %899 = vmatprep.mubr.bf16.mxu0 %v2100_v33  ;;  %v2104_v36 = vld [vmem:[%s2687_s4 + $0x24] ss:$16 sps:$4 sm:$0xff]   ;;  %v2108_v38 = vld [vmem:[%s2687_s4 + $0x20] ss:$16 sps:$4 sm:$0xff]  }
  0x78   : > { %1060 = vmatprep.mubr.bf16.mxu1 %v2103_v35  ;;  %v2106_v37 = vld [vmem:[%s2687_s4 + $0x2c] ss:$16 sps:$4 sm:$0xff]   ;;  %v2109_v39 = vld [vmem:[%s2687_s4 + $0x28] ss:$16 sps:$4 sm:$0xff]   ;;  %v2110_v40 = vld [vmem:[%s2687_s4 + $0x44] ss:$16 sps:$4 sm:$0xff]  }
  0x79   : > { %1776 = vmatpush3.bf16.msra.mxu0 %v2080_v14  ;;  %v2112_v41 = vld [vmem:[%s2687_s4 + $0x4c] ss:$16 sps:$4 sm:$0xff]   ;;  %v2114_v42 = vld [vmem:[%s2687_s4 + $0x40] ss:$16 sps:$4 sm:$0xff]   ;;  %v2115_v43 = vld [vmem:[%s2687_s4 + $0x48] ss:$16 sps:$4 sm:$0xff]  }
  0x7a   : > { %1888 = vmatpush3.bf16.msra.mxu1 %v2081_v15  ;;  %1777 = vmatprep.subr.bf16.mxu0 %v2082_v16  ;;  %v2116_v44 = vld [vmem:[%s2687_s4 + $0x64] ss:$16 sps:$4 sm:$0xff]   ;;  %v2118_v45 = vld [vmem:[%s2687_s4 + $0x6c] ss:$16 sps:$4 sm:$0xff]   ;;  %v2120_v46 = vld [vmem:[%s2687_s4 + $0x60] ss:$16 sps:$4 sm:$0xff]  }
  0x7b   : > { %1889 = vmatprep.subr.bf16.mxu1 %v2083_v17  ;;  %v2121_v47 = vld [vmem:[%s2687_s4 + $0x68] ss:$16 sps:$4 sm:$0xff]   ;;  %v2122_v48 = vld [vmem:[%s2687_s4 + $0x84] ss:$16 sps:$4 sm:$0xff]   ;;  %v2124_v49 = vld [vmem:[%s2687_s4 + $0x8c] ss:$16 sps:$4 sm:$0xff]  }
  0x7c   : > { %v2126_v50 = vld [vmem:[%s2687_s4 + $0x80] ss:$16 sps:$4 sm:$0xff]   ;;  %v2127_v51 = vld [vmem:[%s2687_s4 + $0x88] ss:$16 sps:$4 sm:$0xff]   ;;  %v2128_v52 = vld [vmem:[%s2687_s4 + $0xa4] ss:$16 sps:$4 sm:$0xff]  }
  0x7d   : > { %1778 = vmatpush3.bf16.msra.mxu0 %v2084_v18  ;;  %v2130_v53 = vld [vmem:[%s2687_s4 + $0xac] ss:$16 sps:$4 sm:$0xff]   ;;  %v2132_v54 = vld [vmem:[%s2687_s4 + $0xa0] ss:$16 sps:$4 sm:$0xff]   ;;  %v2133_v55 = vld [vmem:[%s2687_s4 + $0xa8] ss:$16 sps:$4 sm:$0xff]  }
  0x7e   : > { %1890 = vmatpush3.bf16.msra.mxu1 %v2085_v19  ;;  %1779 = vmatprep.subr.bf16.mxu0 %v2086_v20  ;;  %v2134_v56 = vld [vmem:[%s2687_s4 + $0xc4] ss:$16 sps:$4 sm:$0xff]   ;;  %v2136_v57 = vld [vmem:[%s2687_s4 + $0xcc] ss:$16 sps:$4 sm:$0xff]   ;;  %v2138_v58 = vld [vmem:[%s2687_s4 + $0xc0] ss:$16 sps:$4 sm:$0xff]  }
  0x7f   : > { %1891 = vmatprep.subr.bf16.mxu1 %v2087_v21  ;;  %v2139_v59 = vld [vmem:[%s2687_s4 + $0xc8] ss:$16 sps:$4 sm:$0xff]   ;;  %v2140_v60 = vld [vmem:[%s2687_s4 + $0xe4] ss:$16 sps:$4 sm:$0xff]   ;;  %v2142_v61 = vld [vmem:[%s2687_s4 + $0xec] ss:$16 sps:$4 sm:$0xff]  }
  0x80   : > { %v2144_v62 = vld [vmem:[%s2687_s4 + $0xe0] ss:$16 sps:$4 sm:$0xff]   ;;  %v2145_v63 = vld [vmem:[%s2687_s4 + $0xe8] ss:$16 sps:$4 sm:$0xff]   ;;  %v2146_v0 = vld [vmem:[%s2687_s4 + $0x104] ss:$16 sps:$4 sm:$0xff]  }
  0x81   : > { %1780 = vmatpush3.bf16.msra.mxu0 %v2088_v22  ;;  %v2148_v1 = vld [vmem:[%s2687_s4 + $0x10c] ss:$16 sps:$4 sm:$0xff]   ;;  %v2150_v2 = vld [vmem:[%s2687_s4 + $0x100] ss:$16 sps:$4 sm:$0xff]   ;;  %v2151_v3 = vld [vmem:[%s2687_s4 + $0x108] ss:$16 sps:$4 sm:$0xff]  }
  0x82   : > { %1892 = vmatpush3.bf16.msra.mxu1 %v2089_v23  ;;  %1781 = vmatprep.subr.bf16.mxu0 %v2090_v24  ;;  %v2152_v4 = vld [vmem:[%s2687_s4 + $0x124] ss:$16 sps:$4 sm:$0xff]   ;;  %v2154_v5 = vld [vmem:[%s2687_s4 + $0x12c] ss:$16 sps:$4 sm:$0xff]   ;;  %v2156_v6 = vld [vmem:[%s2687_s4 + $0x120] ss:$16 sps:$4 sm:$0xff]  }
  0x83   : > { %1893 = vmatprep.subr.bf16.mxu1 %v2091_v25  ;;  %v2157_v7 = vld [vmem:[%s2687_s4 + $0x128] ss:$16 sps:$4 sm:$0xff]   ;;  %v2158_v8 = vld [vmem:[%s2687_s4 + $0x144] ss:$16 sps:$4 sm:$0xff]   ;;  %v2160_v9 = vld [vmem:[%s2687_s4 + $0x14c] ss:$16 sps:$4 sm:$0xff]  }
  0x84   : > { %v2162_v10 = vld [vmem:[%s2687_s4 + $0x140] ss:$16 sps:$4 sm:$0xff]   ;;  %v2163_v11 = vld [vmem:[%s2687_s4 + $0x148] ss:$16 sps:$4 sm:$0xff]   ;;  %v2164_v12 = vld [vmem:[%s2687_s4 + $0x164] ss:$16 sps:$4 sm:$0xff]  }
  0x85   : > { %1782 = vmatpush3.bf16.msra.mxu0 %v2092_v26  ;;  %v2166_v13 = vld [vmem:[%s2687_s4 + $0x16c] ss:$16 sps:$4 sm:$0xff]   ;;  %v2168_v14 = vld [vmem:[%s2687_s4 + $0x160] ss:$16 sps:$4 sm:$0xff]   ;;  %v2169_v15 = vld [vmem:[%s2687_s4 + $0x168] ss:$16 sps:$4 sm:$0xff]  }
  0x86   : > { %1894 = vmatpush3.bf16.msra.mxu1 %v2093_v27  ;;  %1783 = vmatprep.subr.bf16.mxu0 %v2094_v28  ;;  %v2170_v16 = vld [vmem:[%s2687_s4 + $0x184] ss:$16 sps:$4 sm:$0xff]   ;;  %v2172_v17 = vld [vmem:[%s2687_s4 + $0x18c] ss:$16 sps:$4 sm:$0xff]   ;;  %v2174_v18 = vld [vmem:[%s2687_s4 + $0x180] ss:$16 sps:$4 sm:$0xff]  }
  0x87   : > { %1895 = vmatprep.subr.bf16.mxu1 %v2095_v29  ;;  %v2175_v19 = vld [vmem:[%s2687_s4 + $0x188] ss:$16 sps:$4 sm:$0xff]   ;;  %v2176_v20 = vld [vmem:[%s2687_s4 + $0x1a4] ss:$16 sps:$4 sm:$0xff]   ;;  %v2178_v21 = vld [vmem:[%s2687_s4 + $0x1ac] ss:$16 sps:$4 sm:$0xff]  }
  0x88   : > { %v2180_v22 = vld [vmem:[%s2687_s4 + $0x1a0] ss:$16 sps:$4 sm:$0xff]   ;;  %v2181_v23 = vld [vmem:[%s2687_s4 + $0x1a8] ss:$16 sps:$4 sm:$0xff]   ;;  %v2182_v24 = vld [vmem:[%s2687_s4 + $0x1c4] ss:$16 sps:$4 sm:$0xff]  }
  0x89   : > { %1784 = vmatpush3.bf16.msra.mxu0 %v2096_v30  ;;  %v2184_v25 = vld [vmem:[%s2687_s4 + $0x1cc] ss:$16 sps:$4 sm:$0xff]   ;;  %v2186_v26 = vld [vmem:[%s2687_s4 + $0x1c0] ss:$16 sps:$4 sm:$0xff]   ;;  %v2187_v27 = vld [vmem:[%s2687_s4 + $0x1c8] ss:$16 sps:$4 sm:$0xff]  }
  0x8a   : > { %1896 = vmatpush3.bf16.msra.mxu1 %v2097_v31  ;;  %v2188_v28 = vld [vmem:[%s2687_s4 + $0x1e4] ss:$16 sps:$4 sm:$0xff]   ;;  %v2190_v29 = vld [vmem:[%s2687_s4 + $0x1ec] ss:$16 sps:$4 sm:$0xff]   ;;  %v2192_v30 = vld [vmem:[%s2687_s4 + $0x1e0] ss:$16 sps:$4 sm:$0xff]  }
  0x8b   : > { %v2193_v31 = vld [vmem:[%s2687_s4 + $0x1e8] ss:$16 sps:$4 sm:$0xff]   ;;  %v2761_v35 = vld [vmem:[#allocation7] ss:$0 sm:$0xff] }
  0x8c   : > { %900 = vmatmul.mubr.bf16.vlgmr.msra.gmra.mrb[0].mxu0 %v2098_v32  ;;  %v1189_v32 = vlaneseq }
  0x8d   : > { %1061 = vmatmul.mubr.bf16.vlgmr.msra.gmra.mrb[0].mxu1 %v2101_v34  ;;  %907 = vmatprep.mubr.bf16.mxu0 %v2104_v36 }
  0x8e   : > { %1068 = vmatprep.mubr.bf16.mxu1 %v2106_v37  ;;  %v2763_v37 = vand.u32 127, %v1189_v32 }
  0x90   : > { %vm1191_vm0 = vcmp.lt.s32.totalorder %v2763_v37, 8 }
  0x94   : > { %908 = vmatmul.mubr.bf16.gmra.mrb[4].mxu0 %v2108_v38 }
  0x95   : > { %1069 = vmatmul.mubr.bf16.gmra.mrb[4].mxu1 %v2109_v39  ;;  %915 = vmatprep.mubr.bf16.mxu0 %v2110_v40 }
  0x96   : > { %1076 = vmatprep.mubr.bf16.mxu1 %v2112_v41 }
  0x9c   : > { %916 = vmatmul.mubr.bf16.gmra.mrb[8].mxu0 %v2114_v42 }
  0x9d   : > { %1077 = vmatmul.mubr.bf16.gmra.mrb[8].mxu1 %v2115_v43  ;;  %923 = vmatprep.mubr.bf16.mxu0 %v2116_v44 }
  0x9e   : > { %1084 = vmatprep.mubr.bf16.mxu1 %v2118_v45 }
  0xa4   : > { %924 = vmatmul.mubr.bf16.gmra.mrb[12].mxu0 %v2120_v46 }
  0xa5   : > { %1085 = vmatmul.mubr.bf16.gmra.mrb[12].mxu1 %v2121_v47  ;;  %931 = vmatprep.mubr.bf16.mxu0 %v2122_v48 }
  0xa6   : > { %1092 = vmatprep.mubr.bf16.mxu1 %v2124_v49 }
  0xac   : > { %932 = vmatmul.mubr.bf16.gmra.mrb[16].mxu0 %v2126_v50 }
  0xad   : > { %1093 = vmatmul.mubr.bf16.gmra.mrb[16].mxu1 %v2127_v51  ;;  %939 = vmatprep.mubr.bf16.mxu0 %v2128_v52 }
  0xae   : > { %1100 = vmatprep.mubr.bf16.mxu1 %v2130_v53 }
  0xb4   : > { %940 = vmatmul.mubr.bf16.gmra.mrb[20].mxu0 %v2132_v54 }
  0xb5   : > { %1101 = vmatmul.mubr.bf16.gmra.mrb[20].mxu1 %v2133_v55  ;;  %947 = vmatprep.mubr.bf16.mxu0 %v2134_v56 }
  0xb6   : > { %1108 = vmatprep.mubr.bf16.mxu1 %v2136_v57 }
  0xbc   : > { %948 = vmatmul.mubr.bf16.gmra.mrb[24].mxu0 %v2138_v58 }
  0xbd   : > { %1109 = vmatmul.mubr.bf16.gmra.mrb[24].mxu1 %v2139_v59  ;;  %955 = vmatprep.mubr.bf16.mxu0 %v2140_v60 }
  0xbe   : > { %1116 = vmatprep.mubr.bf16.mxu1 %v2142_v61 }
  0xc4   : > { %956 = vmatmul.mubr.bf16.gmra.mrb[28].mxu0 %v2144_v62 }
  0xc5   : > { %1117 = vmatmul.mubr.bf16.gmra.mrb[28].mxu1 %v2145_v63  ;;  %963 = vmatprep.mubr.bf16.mxu0 %v2146_v0 }
  0xc6   : > { %1124 = vmatprep.mubr.bf16.mxu1 %v2148_v1 }
  0xcc   : > { %964 = vmatmul.mubr.bf16.gmra.mrb[32].mxu0 %v2150_v2 }
  0xcd   : > { %1125 = vmatmul.mubr.bf16.gmra.mrb[32].mxu1 %v2151_v3  ;;  %971 = vmatprep.mubr.bf16.mxu0 %v2152_v4 }
  0xce   : > { %1132 = vmatprep.mubr.bf16.mxu1 %v2154_v5 }
  0xd4   : > { %972 = vmatmul.mubr.bf16.gmra.mrb[36].mxu0 %v2156_v6 }
  0xd5   : > { %1133 = vmatmul.mubr.bf16.gmra.mrb[36].mxu1 %v2157_v7  ;;  %979 = vmatprep.mubr.bf16.mxu0 %v2158_v8 }
  0xd6   : > { %1140 = vmatprep.mubr.bf16.mxu1 %v2160_v9 }
  0xdc   : > { %980 = vmatmul.mubr.bf16.gmra.mrb[40].mxu0 %v2162_v10 }
  0xdd   : > { %1141 = vmatmul.mubr.bf16.gmra.mrb[40].mxu1 %v2163_v11  ;;  %987 = vmatprep.mubr.bf16.mxu0 %v2164_v12 }
  0xde   : > { %1148 = vmatprep.mubr.bf16.mxu1 %v2166_v13 }
  0xe4   : > { %988 = vmatmul.mubr.bf16.gmra.mrb[44].mxu0 %v2168_v14 }
  0xe5   : > { %1149 = vmatmul.mubr.bf16.gmra.mrb[44].mxu1 %v2169_v15  ;;  %995 = vmatprep.mubr.bf16.mxu0 %v2170_v16 }
  0xe6   : > { %1156 = vmatprep.mubr.bf16.mxu1 %v2172_v17 }
  0xec   : > { %996 = vmatmul.mubr.bf16.gmra.mrb[48].mxu0 %v2174_v18 }
  0xed   : > { %1157 = vmatmul.mubr.bf16.gmra.mrb[48].mxu1 %v2175_v19  ;;  %1003 = vmatprep.mubr.bf16.mxu0 %v2176_v20 }
  0xee   : > { %1164 = vmatprep.mubr.bf16.mxu1 %v2178_v21 }
  0xf4   : > { %1004 = vmatmul.mubr.bf16.gmra.mrb[52].mxu0 %v2180_v22 }
  0xf5   : > { %1165 = vmatmul.mubr.bf16.gmra.mrb[52].mxu1 %v2181_v23  ;;  %1011 = vmatprep.mubr.bf16.mxu0 %v2182_v24 }
  0xf6   : > { %1172 = vmatprep.mubr.bf16.mxu1 %v2184_v25 }
  0xfc   : > { %1012 = vmatmul.mubr.bf16.gmra.mrb[56].mxu0 %v2186_v26 }
  0xfd   : > { %1173 = vmatmul.mubr.bf16.gmra.mrb[56].mxu1 %v2187_v27  ;;  %1019 = vmatprep.mubr.bf16.mxu0 %v2188_v28 }
  0xfe   : > { %1180 = vmatprep.mubr.bf16.mxu1 %v2190_v29 }
 0x104   : > { %1020 = vmatmul.mubr.bf16.gmra.mrb[60].mxu0 %v2192_v30 }
 0x105   : > { %1181 = vmatmul.mubr.bf16.gmra.mrb[60].mxu1 %v2193_v31 }
 0x15f   : > { %v1785_v33 = vpop.f32.mrb[0].mxu0 }
 0x160   : > { %v1897_v34 = vpop.f32.mrb[0].mxu1  ;;  %v1786_v36 = vpop.f32.mrb[1].mxu0 }
 0x161   : > { %v1787_v38 = vadd.f32 %v1786_v36, %v1785_v33  ;;  %v1898_v39 = vpop.f32.mrb[1].mxu1  ;;  %v1788_v40 = vpop.f32.mrb[2].mxu0 }
 0x162   : > { %v1899_v41 = vadd.f32 %v1898_v39, %v1897_v34  ;;  %v1900_v42 = vpop.f32.mrb[2].mxu1  ;;  %v1789_v43 = vpop.f32.mrb[3].mxu0 }
 0x163   : > { %v902_v44 = vadd.f32 %v1787_v38, %v2761_v35  ;;  %v1790_v45 = vadd.f32 %v1789_v43, %v1788_v40  ;;  %v1901_v46 = vpop.f32.mrb[3].mxu1 }
 0x164   : > { %v1902_v47 = vadd.f32 %v1901_v46, %v1900_v42 }
 0x165   : > { %v905_v48 = vadd.f32 %v1790_v45, %v2761_v35  ;;  %v1063_v49 = vadd.f32 %v1899_v41, %v902_v44 }
 0x167   : > { %v1791_v50 = vpop.f32.mrb[4].mxu0  ;;  %v2770_v51 = vsel %vm1191_vm0, %v1063_v49, -inf  ;;  %v1066_v52 = vadd.f32 %v1902_v47, %v905_v48 }
 0x168   : > { %v1903_v53 = vpop.f32.mrb[4].mxu1  ;;  %v1792_v54 = vpop.f32.mrb[5].mxu0  ;;  %1224 = vmax.xlane.f32.xlu0 %v2770_v51 }
 0x169   : > { %v1793_v55 = vadd.f32 %v1792_v54, %v1791_v50  ;;  %v1904_v56 = vpop.f32.mrb[5].mxu1  ;;  %v1794_v57 = vpop.f32.mrb[6].mxu0  ;;  %v2776_v0 = vsel %vm1191_vm0, %v1066_v52, -inf }
 0x16a   : > { %v1905_v58 = vadd.f32 %v1904_v56, %v1903_v53  ;;  %v1906_v59 = vpop.f32.mrb[6].mxu1  ;;  %v1795_v60 = vpop.f32.mrb[7].mxu0 }
 0x16b   : > { %v910_v61 = vadd.f32 %v1793_v55, %v2761_v35  ;;  %v1796_v62 = vadd.f32 %v1795_v60, %v1794_v57  ;;  %v1907_v63 = vpop.f32.mrb[7].mxu1 }
 0x16c   : > { %v1908_v1 = vadd.f32 %v1907_v63, %v1906_v59  ;;  %1226 = vmax.xlane.f32.xlu0 %v2776_v0 }
 0x16d   : > { %v913_v2 = vadd.f32 %v1796_v62, %v2761_v35  ;;  %v1071_v3 = vadd.f32 %v1905_v58, %v910_v61 }
 0x16f   : > { %v1797_v4 = vpop.f32.mrb[8].mxu0  ;;  %v2782_v5 = vsel %vm1191_vm0, %v1071_v3, -inf  ;;  %v1074_v6 = vadd.f32 %v1908_v1, %v913_v2 }
 0x170   : > { %v1909_v7 = vpop.f32.mrb[8].mxu1  ;;  %v1798_v8 = vpop.f32.mrb[9].mxu0  ;;  %1228 = vmax.xlane.f32.xlu1 %v2782_v5 }
 0x171   : > { %v1799_v9 = vadd.f32 %v1798_v8, %v1797_v4  ;;  %v1910_v10 = vpop.f32.mrb[9].mxu1  ;;  %v1800_v11 = vpop.f32.mrb[10].mxu0  ;;  %v2788_v18 = vsel %vm1191_vm0, %v1074_v6, -inf }
 0x172   : > { %v1911_v12 = vadd.f32 %v1910_v10, %v1909_v7  ;;  %v1912_v13 = vpop.f32.mrb[10].mxu1  ;;  %v1801_v14 = vpop.f32.mrb[11].mxu0 }
 0x173   : > { %v918_v15 = vadd.f32 %v1799_v9, %v2761_v35  ;;  %v1802_v16 = vadd.f32 %v1801_v14, %v1800_v11  ;;  %v1913_v17 = vpop.f32.mrb[11].mxu1 }
 0x174   : > { %v1914_v19 = vadd.f32 %v1913_v17, %v1912_v13  ;;  %1230 = vmax.xlane.f32.xlu1 %v2788_v18 }
 0x175   : > { %v921_v20 = vadd.f32 %v1802_v16, %v2761_v35  ;;  %v1079_v21 = vadd.f32 %v1911_v12, %v918_v15 }
 0x177   : > { %v1803_v22 = vpop.f32.mrb[12].mxu0  ;;  %v2794_v23 = vsel %vm1191_vm0, %v1079_v21, -inf  ;;  %v1082_v24 = vadd.f32 %v1914_v19, %v921_v20 }
 0x178   : > { %v1915_v25 = vpop.f32.mrb[12].mxu1  ;;  %v1804_v26 = vpop.f32.mrb[13].mxu0  ;;  %1232 = vmax.xlane.f32.xlu0 %v2794_v23 }
 0x179   : > { %v1805_v27 = vadd.f32 %v1804_v26, %v1803_v22  ;;  %v1916_v28 = vpop.f32.mrb[13].mxu1  ;;  %v1806_v29 = vpop.f32.mrb[14].mxu0  ;;  %v2799_v30 = vsel %vm1191_vm0, %v1082_v24, -inf }
 0x17a   : > { %v1917_v31 = vadd.f32 %v1916_v28, %v1915_v25  ;;  %v1918_v32 = vpop.f32.mrb[14].mxu1  ;;  %v1807_v33 = vpop.f32.mrb[15].mxu0  ;;  %1234 = vmax.xlane.f32.xlu1 %v2799_v30 }
 0x17b   : > { %v926_v34 = vadd.f32 %v1805_v27, %v2761_v35  ;;  %v1808_v36 = vadd.f32 %v1807_v33, %v1806_v29  ;;  %v1919_v38 = vpop.f32.mrb[15].mxu1 }
 0x17c   : > { %v1920_v39 = vadd.f32 %v1919_v38, %v1918_v32 }
 0x17d   : > { %v929_v40 = vadd.f32 %v1808_v36, %v2761_v35  ;;  %v1087_v41 = vadd.f32 %v1917_v31, %v926_v34 }
 0x17f   : > { %v1809_v42 = vpop.f32.mrb[16].mxu0  ;;  %v2806_v43 = vsel %vm1191_vm0, %v1087_v41, -inf  ;;  %v1090_v44 = vadd.f32 %v1920_v39, %v929_v40 }
 0x180   : > { %v1921_v45 = vpop.f32.mrb[16].mxu1  ;;  %v1810_v46 = vpop.f32.mrb[17].mxu0  ;;  %1236 = vmax.xlane.f32.xlu0 %v2806_v43 }
 0x181   : > { %v1811_v47 = vadd.f32 %v1810_v46, %v1809_v42  ;;  %v1922_v48 = vpop.f32.mrb[17].mxu1  ;;  %v1812_v49 = vpop.f32.mrb[18].mxu0  ;;  %v2811_v50 = vsel %vm1191_vm0, %v1090_v44, -inf }
 0x182   : > { %v1923_v52 = vadd.f32 %v1922_v48, %v1921_v45  ;;  %v1924_v53 = vpop.f32.mrb[18].mxu1  ;;  %v1813_v54 = vpop.f32.mrb[19].mxu0  ;;  %1238 = vmax.xlane.f32.xlu1 %v2811_v50 }
 0x183   : > { %v934_v55 = vadd.f32 %v1811_v47, %v2761_v35  ;;  %v1814_v56 = vadd.f32 %v1813_v54, %v1812_v49  ;;  %v1925_v57 = vpop.f32.mrb[19].mxu1 }
 0x184   : > { %v1926_v58 = vadd.f32 %v1925_v57, %v1924_v53 }
 0x185   : > { %v937_v59 = vadd.f32 %v1814_v56, %v2761_v35  ;;  %v1095_v60 = vadd.f32 %v1923_v52, %v934_v55 }
 0x187   : > { %v1815_v61 = vpop.f32.mrb[20].mxu0  ;;  %v2818_v62 = vsel %vm1191_vm0, %v1095_v60, -inf  ;;  %v1098_v63 = vadd.f32 %v1926_v58, %v937_v59 }
 0x188   : > { %v1927_v1 = vpop.f32.mrb[20].mxu1  ;;  %v1816_v2 = vpop.f32.mrb[21].mxu0  ;;  %1240 = vmax.xlane.f32.xlu0 %v2818_v62 }
 0x189   : > { %v1817_v3 = vadd.f32 %v1816_v2, %v1815_v61  ;;  %v1928_v4 = vpop.f32.mrb[21].mxu1  ;;  %v1818_v6 = vpop.f32.mrb[22].mxu0  ;;  %v2823_v7 = vsel %vm1191_vm0, %v1098_v63, -inf }
 0x18a   : > { %v1929_v8 = vadd.f32 %v1928_v4, %v1927_v1  ;;  %v1930_v9 = vpop.f32.mrb[22].mxu1  ;;  %v1819_v10 = vpop.f32.mrb[23].mxu0  ;;  %1242 = vmax.xlane.f32.xlu1 %v2823_v7 }
 0x18b   : > { %v942_v11 = vadd.f32 %v1817_v3, %v2761_v35  ;;  %v1820_v12 = vadd.f32 %v1819_v10, %v1818_v6  ;;  %v1931_v13 = vpop.f32.mrb[23].mxu1 }
 0x18c   : > { %v1932_v14 = vadd.f32 %v1931_v13, %v1930_v9 }
 0x18d   : > { %v945_v15 = vadd.f32 %v1820_v12, %v2761_v35  ;;  %v1103_v16 = vadd.f32 %v1929_v8, %v942_v11 }
 0x18f   : > { %v1821_v17 = vpop.f32.mrb[24].mxu0  ;;  %v2830_v19 = vsel %vm1191_vm0, %v1103_v16, -inf  ;;  %v1106_v20 = vadd.f32 %v1932_v14, %v945_v15 }
 0x190   : > { %v1933_v21 = vpop.f32.mrb[24].mxu1  ;;  %v1822_v22 = vpop.f32.mrb[25].mxu0  ;;  %1244 = vmax.xlane.f32.xlu0 %v2830_v19 }
 0x191   : > { %v1823_v24 = vadd.f32 %v1822_v22, %v1821_v17  ;;  %v1934_v25 = vpop.f32.mrb[25].mxu1  ;;  %v1824_v26 = vpop.f32.mrb[26].mxu0  ;;  %v2835_v27 = vsel %vm1191_vm0, %v1106_v20, -inf }
 0x192   : > { %v1935_v28 = vadd.f32 %v1934_v25, %v1933_v21  ;;  %v1936_v29 = vpop.f32.mrb[26].mxu1  ;;  %v1825_v31 = vpop.f32.mrb[27].mxu0  ;;  %1246 = vmax.xlane.f32.xlu1 %v2835_v27 }
 0x193   : > { %v950_v32 = vadd.f32 %v1823_v24, %v2761_v35  ;;  %v1826_v33 = vadd.f32 %v1825_v31, %v1824_v26  ;;  %v1937_v34 = vpop.f32.mrb[27].mxu1 }
 0x194   : > { %v1938_v36 = vadd.f32 %v1937_v34, %v1936_v29 }
 0x195   : > { %v953_v38 = vadd.f32 %v1826_v33, %v2761_v35  ;;  %v1111_v39 = vadd.f32 %v1935_v28, %v950_v32 }
 0x197   : > { %v1827_v40 = vpop.f32.mrb[28].mxu0  ;;  %v2842_v41 = vsel %vm1191_vm0, %v1111_v39, -inf  ;;  %v1114_v42 = vadd.f32 %v1938_v36, %v953_v38 }
 0x198   : > { %v1939_v44 = vpop.f32.mrb[28].mxu1  ;;  %v1828_v45 = vpop.f32.mrb[29].mxu0  ;;  %1248 = vmax.xlane.f32.xlu0 %v2842_v41 }
 0x199   : > { %v1829_v46 = vadd.f32 %v1828_v45, %v1827_v40  ;;  %v1940_v47 = vpop.f32.mrb[29].mxu1  ;;  %v1830_v48 = vpop.f32.mrb[30].mxu0  ;;  %v2847_v49 = vsel %vm1191_vm0, %v1114_v42, -inf }
 0x19a   : > { %v1941_v52 = vadd.f32 %v1940_v47, %v1939_v44  ;;  %v1942_v53 = vpop.f32.mrb[30].mxu1  ;;  %v1831_v54 = vpop.f32.mrb[31].mxu0  ;;  %1250 = vmax.xlane.f32.xlu1 %v2847_v49 }
 0x19b   : > { %v958_v55 = vadd.f32 %v1829_v46, %v2761_v35  ;;  %v1832_v56 = vadd.f32 %v1831_v54, %v1830_v48  ;;  %v1943_v57 = vpop.f32.mrb[31].mxu1 }
 0x19c   : > { %v1944_v58 = vadd.f32 %v1943_v57, %v1942_v53 }
 0x19d   : > { %v961_v59 = vadd.f32 %v1832_v56, %v2761_v35  ;;  %v1119_v60 = vadd.f32 %v1941_v52, %v958_v55 }
 0x19f   : > { %v1833_v61 = vpop.f32.mrb[32].mxu0  ;;  %v2854_v63 = vsel %vm1191_vm0, %v1119_v60, -inf  ;;  %v1122_v1 = vadd.f32 %v1944_v58, %v961_v59 }
 0x1a0   : > { %v1945_v2 = vpop.f32.mrb[32].mxu1  ;;  %v1834_v3 = vpop.f32.mrb[33].mxu0  ;;  %1252 = vmax.xlane.f32.xlu0 %v2854_v63 }
 0x1a1   : > { %v1835_v4 = vadd.f32 %v1834_v3, %v1833_v61  ;;  %v1946_v6 = vpop.f32.mrb[33].mxu1  ;;  %v1836_v8 = vpop.f32.mrb[34].mxu0  ;;  %v2859_v9 = vsel %vm1191_vm0, %v1122_v1, -inf }
 0x1a2   : > { %v1947_v10 = vadd.f32 %v1946_v6, %v1945_v2  ;;  %v1948_v11 = vpop.f32.mrb[34].mxu1  ;;  %v1837_v12 = vpop.f32.mrb[35].mxu0  ;;  %1254 = vmax.xlane.f32.xlu1 %v2859_v9 }
 0x1a3   : > { %v966_v13 = vadd.f32 %v1835_v4, %v2761_v35  ;;  %v1838_v14 = vadd.f32 %v1837_v12, %v1836_v8  ;;  %v1949_v15 = vpop.f32.mrb[35].mxu1 }
 0x1a4   : > { %v1950_v16 = vadd.f32 %v1949_v15, %v1948_v11 }
 0x1a5   : > { %v969_v17 = vadd.f32 %v1838_v14, %v2761_v35  ;;  %v1127_v20 = vadd.f32 %v1947_v10, %v966_v13 }
 0x1a7   : > { %v1839_v21 = vpop.f32.mrb[36].mxu0  ;;  %v2866_v22 = vsel %vm1191_vm0, %v1127_v20, -inf  ;;  %v1130_v24 = vadd.f32 %v1950_v16, %v969_v17 }
 0x1a8   : > { %v1951_v25 = vpop.f32.mrb[36].mxu1  ;;  %v1840_v26 = vpop.f32.mrb[37].mxu0  ;;  %1256 = vmax.xlane.f32.xlu0 %v2866_v22 }
 0x1a9   : > { %v1841_v28 = vadd.f32 %v1840_v26, %v1839_v21  ;;  %v1952_v29 = vpop.f32.mrb[37].mxu1  ;;  %v1842_v31 = vpop.f32.mrb[38].mxu0  ;;  %v2871_v32 = vsel %vm1191_vm0, %v1130_v24, -inf }
 0x1aa   : > { %v1953_v33 = vadd.f32 %v1952_v29, %v1951_v25  ;;  %v1954_v34 = vpop.f32.mrb[38].mxu1  ;;  %v1843_v36 = vpop.f32.mrb[39].mxu0  ;;  %1258 = vmax.xlane.f32.xlu1 %v2871_v32 }
 0x1ab   : > { %v974_v38 = vadd.f32 %v1841_v28, %v2761_v35  ;;  %v1844_v39 = vadd.f32 %v1843_v36, %v1842_v31  ;;  %v1955_v40 = vpop.f32.mrb[39].mxu1 }
 0x1ac   : > { %v1956_v42 = vadd.f32 %v1955_v40, %v1954_v34 }
 0x1ad   : > { %v977_v44 = vadd.f32 %v1844_v39, %v2761_v35  ;;  %v1135_v45 = vadd.f32 %v1953_v33, %v974_v38 }
 0x1af   : > { %v1845_v46 = vpop.f32.mrb[40].mxu0  ;;  %v2878_v47 = vsel %vm1191_vm0, %v1135_v45, -inf  ;;  %v1138_v48 = vadd.f32 %v1956_v42, %v977_v44 }
 0x1b0   : > { %v1957_v52 = vpop.f32.mrb[40].mxu1  ;;  %v1846_v53 = vpop.f32.mrb[41].mxu0  ;;  %1260 = vmax.xlane.f32.xlu0 %v2878_v47 }
 0x1b1   : > { %v1847_v54 = vadd.f32 %v1846_v53, %v1845_v46  ;;  %v1958_v55 = vpop.f32.mrb[41].mxu1  ;;  %v1848_v56 = vpop.f32.mrb[42].mxu0  ;;  %v2883_v57 = vsel %vm1191_vm0, %v1138_v48, -inf }
 0x1b2   : > { %v1959_v58 = vadd.f32 %v1958_v55, %v1957_v52  ;;  %v1960_v59 = vpop.f32.mrb[42].mxu1  ;;  %v1849_v60 = vpop.f32.mrb[43].mxu0  ;;  %1262 = vmax.xlane.f32.xlu1 %v2883_v57 }
 0x1b3   : > { %v982_v61 = vadd.f32 %v1847_v54, %v2761_v35  ;;  %v1850_v1 = vadd.f32 %v1849_v60, %v1848_v56  ;;  %v1961_v2 = vpop.f32.mrb[43].mxu1 }
 0x1b4   : > { %v1962_v3 = vadd.f32 %v1961_v2, %v1960_v59 }
 0x1b5   : > { %v985_v4 = vadd.f32 %v1850_v1, %v2761_v35  ;;  %v1143_v6 = vadd.f32 %v1959_v58, %v982_v61 }
 0x1b7   : > { %v1851_v8 = vpop.f32.mrb[44].mxu0  ;;  %v2890_v10 = vsel %vm1191_vm0, %v1143_v6, -inf  ;;  %v1146_v11 = vadd.f32 %v1962_v3, %v985_v4 }
 0x1b8   : > { %v1963_v12 = vpop.f32.mrb[44].mxu1  ;;  %v1852_v13 = vpop.f32.mrb[45].mxu0  ;;  %1264 = vmax.xlane.f32.xlu0 %v2890_v10 }
 0x1b9   : > { %v1853_v14 = vadd.f32 %v1852_v13, %v1851_v8  ;;  %v1964_v15 = vpop.f32.mrb[45].mxu1  ;;  %v1854_v16 = vpop.f32.mrb[46].mxu0  ;;  %v2895_v17 = vsel %vm1191_vm0, %v1146_v11, -inf }
 0x1ba   : > { %v1965_v20 = vadd.f32 %v1964_v15, %v1963_v12  ;;  %v1966_v21 = vpop.f32.mrb[46].mxu1  ;;  %v1855_v24 = vpop.f32.mrb[47].mxu0  ;;  %1266 = vmax.xlane.f32.xlu1 %v2895_v17 }
 0x1bb   : > { %v990_v25 = vadd.f32 %v1853_v14, %v2761_v35  ;;  %v1856_v26 = vadd.f32 %v1855_v24, %v1854_v16  ;;  %v1967_v28 = vpop.f32.mrb[47].mxu1 }
 0x1bc   : > { %v1968_v29 = vadd.f32 %v1967_v28, %v1966_v21 }
 0x1bd   : > { %v993_v31 = vadd.f32 %v1856_v26, %v2761_v35  ;;  %v1151_v33 = vadd.f32 %v1965_v20, %v990_v25 }
 0x1bf   : > { %v1857_v34 = vpop.f32.mrb[48].mxu0  ;;  %v2902_v36 = vsel %vm1191_vm0, %v1151_v33, -inf  ;;  %v1154_v38 = vadd.f32 %v1968_v29, %v993_v31 }
 0x1c0   : > { %v1969_v39 = vpop.f32.mrb[48].mxu1  ;;  %v1858_v40 = vpop.f32.mrb[49].mxu0  ;;  %1268 = vmax.xlane.f32.xlu0 %v2902_v36 }
 0x1c1   : > { %v1859_v42 = vadd.f32 %v1858_v40, %v1857_v34  ;;  %v1970_v44 = vpop.f32.mrb[49].mxu1  ;;  %v1860_v45 = vpop.f32.mrb[50].mxu0  ;;  %v2907_v46 = vsel %vm1191_vm0, %v1154_v38, -inf }
 0x1c2   : > { %v1971_v48 = vadd.f32 %v1970_v44, %v1969_v39  ;;  %v1972_v52 = vpop.f32.mrb[50].mxu1  ;;  %v1861_v53 = vpop.f32.mrb[51].mxu0  ;;  %1270 = vmax.xlane.f32.xlu1 %v2907_v46 }
 0x1c3   : > { %v998_v54 = vadd.f32 %v1859_v42, %v2761_v35  ;;  %v1862_v55 = vadd.f32 %v1861_v53, %v1860_v45  ;;  %v1973_v56 = vpop.f32.mrb[51].mxu1 }
 0x1c4   : > { %v1974_v58 = vadd.f32 %v1973_v56, %v1972_v52 }
 0x1c5   : > { %v1001_v59 = vadd.f32 %v1862_v55, %v2761_v35  ;;  %v1159_v60 = vadd.f32 %v1971_v48, %v998_v54 }
 0x1c7   : > { %v1863_v61 = vpop.f32.mrb[52].mxu0  ;;  %v2914_v1 = vsel %vm1191_vm0, %v1159_v60, -inf  ;;  %v1162_v2 = vadd.f32 %v1974_v58, %v1001_v59 }
 0x1c8   : > { %v1975_v3 = vpop.f32.mrb[52].mxu1  ;;  %v1864_v4 = vpop.f32.mrb[53].mxu0  ;;  %1272 = vmax.xlane.f32.xlu0 %v2914_v1 }
 0x1c9   : > { %v1865_v6 = vadd.f32 %v1864_v4, %v1863_v61  ;;  %v1976_v8 = vpop.f32.mrb[53].mxu1  ;;  %v1866_v11 = vpop.f32.mrb[54].mxu0  ;;  %v2919_v12 = vsel %vm1191_vm0, %v1162_v2, -inf }
 0x1ca   : > { %v1977_v13 = vadd.f32 %v1976_v8, %v1975_v3  ;;  %v1978_v14 = vpop.f32.mrb[54].mxu1  ;;  %v1867_v15 = vpop.f32.mrb[55].mxu0  ;;  %1274 = vmax.xlane.f32.xlu1 %v2919_v12 }
 0x1cb   : > { %v1006_v16 = vadd.f32 %v1865_v6, %v2761_v35  ;;  %v1868_v20 = vadd.f32 %v1867_v15, %v1866_v11  ;;  %v1979_v21 = vpop.f32.mrb[55].mxu1 }
 0x1cc   : > { %v1980_v24 = vadd.f32 %v1979_v21, %v1978_v14 }
 0x1cd   : > { %v1009_v25 = vadd.f32 %v1868_v20, %v2761_v35  ;;  %v1167_v26 = vadd.f32 %v1977_v13, %v1006_v16 }
 0x1cf   : > { %v1869_v28 = vpop.f32.mrb[56].mxu0  ;;  %v2926_v29 = vsel %vm1191_vm0, %v1167_v26, -inf  ;;  %v1170_v31 = vadd.f32 %v1980_v24, %v1009_v25 }
 0x1d0   : > { %v1981_v33 = vpop.f32.mrb[56].mxu1  ;;  %v1870_v34 = vpop.f32.mrb[57].mxu0  ;;  %1276 = vmax.xlane.f32.xlu0 %v2926_v29 }
 0x1d1   : > { %v1871_v38 = vadd.f32 %v1870_v34, %v1869_v28  ;;  %v1982_v39 = vpop.f32.mrb[57].mxu1  ;;  %v1872_v40 = vpop.f32.mrb[58].mxu0  ;;  %v2931_v42 = vsel %vm1191_vm0, %v1170_v31, -inf }
 0x1d2   : > { %v1983_v44 = vadd.f32 %v1982_v39, %v1981_v33  ;;  %v1984_v45 = vpop.f32.mrb[58].mxu1  ;;  %v1873_v48 = vpop.f32.mrb[59].mxu0  ;;  %1278 = vmax.xlane.f32.xlu1 %v2931_v42 }
 0x1d3   : > { %v1014_v52 = vadd.f32 %v1871_v38, %v2761_v35  ;;  %v1874_v53 = vadd.f32 %v1873_v48, %v1872_v40  ;;  %v1985_v54 = vpop.f32.mrb[59].mxu1 }
 0x1d4   : > { %v1986_v55 = vadd.f32 %v1985_v54, %v1984_v45 }
 0x1d5   : > { %v1017_v56 = vadd.f32 %v1874_v53, %v2761_v35  ;;  %v1175_v58 = vadd.f32 %v1983_v44, %v1014_v52 }
 0x1d7   : > { %v1875_v59 = vpop.f32.mrb[60].mxu0  ;;  %v2938_v60 = vsel %vm1191_vm0, %v1175_v58, -inf  ;;  %v1178_v61 = vadd.f32 %v1986_v55, %v1017_v56 }
 0x1d8   : > { %v1987_v2 = vpop.f32.mrb[60].mxu1  ;;  %v1876_v3 = vpop.f32.mrb[61].mxu0  ;;  %1280 = vmax.xlane.f32.xlu0 %v2938_v60 }
 0x1d9   : > { %v1877_v4 = vadd.f32 %v1876_v3, %v1875_v59  ;;  %v1988_v6 = vpop.f32.mrb[61].mxu1  ;;  %v1878_v8 = vpop.f32.mrb[62].mxu0  ;;  %v2943_v11 = vsel %vm1191_vm0, %v1178_v61, -inf }
 0x1da   : > { %v1989_v13 = vadd.f32 %v1988_v6, %v1987_v2  ;;  %v1990_v14 = vpop.f32.mrb[62].mxu1  ;;  %v1879_v15 = vpop.f32.mrb[63].mxu0  ;;  %1282 = vmax.xlane.f32.xlu1 %v2943_v11 }
 0x1db   : > { %v1022_v16 = vadd.f32 %v1877_v4, %v2761_v35  ;;  %v1880_v20 = vadd.f32 %v1879_v15, %v1878_v8  ;;  %v1991_v21 = vpop.f32.mrb[63].mxu1 }
 0x1dc   : > { %v1992_v24 = vadd.f32 %v1991_v21, %v1990_v14 }
 0x1dd   : > { %v1025_v25 = vadd.f32 %v1880_v20, %v2761_v35  ;;  %v1183_v26 = vadd.f32 %v1989_v13, %v1022_v16 }
 0x1df   : > { %v2950_v28 = vsel %vm1191_vm0, %v1183_v26, -inf  ;;  %v1186_v31 = vadd.f32 %v1992_v24, %v1025_v25 }
 0x1e0   : > { %1284 = vmax.xlane.f32.xlu0 %v2950_v28 }
 0x1e1   : > { %v2955_v33 = vsel %vm1191_vm0, %v1186_v31, -inf }
 0x1e2   : > { %1286 = vmax.xlane.f32.xlu1 %v2955_v33 }
 0x1f5   : > { %v1225_v34 = vpop.xlane.xlu0 %1224 }
 0x1f6   : > { %v1288_v38 = vsub.f32 %v2770_v51, %v1225_v34 }
 0x1f8   : > { %v1320_v39 = vmul.f32 1.442695, %v1288_v38 }
 0x1f9   : > { %v1227_v40 = vpop.xlane.xlu0 %1226 }
 0x1fa   : > { %2194 = vpow2.f32 %v1320_v39  ;;  %v1289_v35 = vsub.f32 %v2776_v0, %v1227_v40 }
 0x1fc   : > { %v1322_v44 = vmul.f32 1.442695, %v1289_v35 }
 0x1fd   : > { %v1229_v45 = vpop.xlane.xlu1 %1228 }
 0x1fe   : > { %2196 = vpow2.f32 %v1322_v44  ;;  %v1290_v48 = vsub.f32 %v2782_v5, %v1229_v45 }
 0x200   : > { %v1324_v52 = vmul.f32 1.442695, %v1290_v48 }
 0x201   : > { %v1231_v53 = vpop.xlane.xlu1 %1230 }
 0x202   : > { %2198 = vpow2.f32 %v1324_v52  ;;  %v1291_v37 = vsub.f32 %v2788_v18, %v1231_v53 }
 0x204   : > { %v2962_v54 = vpop.eup %2194  ;;  %v1326_v55 = vmul.f32 1.442695, %v1291_v37 }
 0x205   : > { %1384 = vadd.xlane.f32.xlu0 %v2962_v54  ;;  %v1233_v51 = vpop.xlane.xlu0 %1232 }
 0x206   : > { %2200 = vpow2.f32 %v1326_v55  ;;  %v1292_v56 = vsub.f32 %v2794_v23, %v1233_v51 }
 0x207   : > { %v1235_v0 = vpop.xlane.xlu1 %1234 }
 0x208   : > { %v2966_v58 = vpop.eup %2196  ;;  %v1328_v59 = vmul.f32 1.442695, %v1292_v56  ;;  %v1293_v5 = vsub.f32 %v2799_v30, %v1235_v0 }
 0x209   : > { %1386 = vadd.xlane.f32.xlu1 %v2966_v58 }
 0x20a   : > { %2202 = vpow2.f32 %v1328_v59  ;;  %v1330_v61 = vmul.f32 1.442695, %v1293_v5 }
 0x20c   : > { %v2970_v18 = vpop.eup %2198  ;;  %2204 = vpow2.f32 %v1330_v61 }
 0x20d   : > { %1388 = vadd.xlane.f32.xlu0 %v2970_v18  ;;  %v1237_v2 = vpop.xlane.xlu0 %1236 }
 0x20e   : > { %v1294_v3 = vsub.f32 %v2806_v43, %v1237_v2 }
 0x20f   : > { %v1239_v4 = vpop.xlane.xlu1 %1238 }
 0x210   : > { %v2974_v23 = vpop.eup %2200  ;;  %v1332_v6 = vmul.f32 1.442695, %v1294_v3  ;;  %v1295_v8 = vsub.f32 %v2811_v50, %v1239_v4 }
 0x211   : > { %1390 = vadd.xlane.f32.xlu1 %v2974_v23 }
 0x212   : > { %2206 = vpow2.f32 %v1332_v6  ;;  %v1334_v30 = vmul.f32 1.442695, %v1295_v8 }
 0x214   : > { %v2978_v13 = vpop.eup %2202  ;;  %2208 = vpow2.f32 %v1334_v30 }
 0x215   : > { %1392 = vadd.xlane.f32.xlu0 %v2978_v13  ;;  %v1241_v14 = vpop.xlane.xlu0 %1240 }
 0x216   : > { %v2981_v15 = vpop.eup %2204  ;;  %v1296_v43 = vsub.f32 %v2818_v62, %v1241_v14 }
 0x217   : > { %v1243_v16 = vpop.xlane.xlu1 %1242  ;;  %1394 = vadd.xlane.f32.xlu1 %v2981_v15 }
 0x218   : > { %v1336_v20 = vmul.f32 1.442695, %v1296_v43  ;;  %v1297_v50 = vsub.f32 %v2823_v7, %v1243_v16 }
 0x21a   : > { %2210 = vpow2.f32 %v1336_v20  ;;  %v1338_v21 = vmul.f32 1.442695, %v1297_v50 }
 0x21c   : > { %v2986_v24 = vpop.eup %2206  ;;  %2212 = vpow2.f32 %v1338_v21 }
 0x21d   : > { %1396 = vadd.xlane.f32.xlu0 %v2986_v24  ;;  %v1245_v25 = vpop.xlane.xlu0 %1244 }
 0x21e   : > { %v2989_v26 = vpop.eup %2208  ;;  %v1298_v31 = vsub.f32 %v2830_v19, %v1245_v25 }
 0x21f   : > { %v1247_v34 = vpop.xlane.xlu1 %1246  ;;  %1398 = vadd.xlane.f32.xlu1 %v2989_v26 }
 0x220   : > { %v1340_v62 = vmul.f32 1.442695, %v1298_v31  ;;  %v1299_v38 = vsub.f32 %v2835_v27, %v1247_v34 }
 0x222   : > { %2214 = vpow2.f32 %v1340_v62  ;;  %v1342_v7 = vmul.f32 1.442695, %v1299_v38 }
 0x224   : > { %v2994_v39 = vpop.eup %2210  ;;  %2216 = vpow2.f32 %v1342_v7 }
 0x225   : > { %1400 = vadd.xlane.f32.xlu0 %v2994_v39  ;;  %v1249_v40 = vpop.xlane.xlu0 %1248 }
 0x226   : > { %v2997_v35 = vpop.eup %2212  ;;  %v1300_v44 = vsub.f32 %v2842_v41, %v1249_v40 }
 0x227   : > { %v1251_v45 = vpop.xlane.xlu1 %1250  ;;  %1402 = vadd.xlane.f32.xlu1 %v2997_v35 }
 0x228   : > { %v1344_v19 = vmul.f32 1.442695, %v1300_v44  ;;  %v1301_v48 = vsub.f32 %v2847_v49, %v1251_v45 }
 0x22a   : > { %2218 = vpow2.f32 %v1344_v19  ;;  %v1346_v27 = vmul.f32 1.442695, %v1301_v48 }
 0x22c   : > { %v3002_v52 = vpop.eup %2214  ;;  %2220 = vpow2.f32 %v1346_v27 }
 0x22d   : > { %1404 = vadd.xlane.f32.xlu0 %v3002_v52  ;;  %v1253_v53 = vpop.xlane.xlu0 %1252 }
 0x22e   : > { %v3005_v37 = vpop.eup %2216  ;;  %v1302_v55 = vsub.f32 %v2854_v63, %v1253_v53 }
 0x22f   : > { %v1255_v51 = vpop.xlane.xlu1 %1254  ;;  %1406 = vadd.xlane.f32.xlu1 %v3005_v37 }
 0x230   : > { %v1348_v41 = vmul.f32 1.442695, %v1302_v55  ;;  %v1303_v56 = vsub.f32 %v2859_v9, %v1255_v51 }
 0x232   : > { %2222 = vpow2.f32 %v1348_v41  ;;  %v1350_v49 = vmul.f32 1.442695, %v1303_v56 }
 0x234   : > { %v3010_v0 = vpop.eup %2218  ;;  %2224 = vpow2.f32 %v1350_v49 }
 0x235   : > { %1408 = vadd.xlane.f32.xlu0 %v3010_v0  ;;  %v1257_v59 = vpop.xlane.xlu0 %1256 }
 0x236   : > { %v3013_v5 = vpop.eup %2220  ;;  %v1304_v61 = vsub.f32 %v2866_v22, %v1257_v59 }
 0x237   : > { %v1259_v2 = vpop.xlane.xlu1 %1258  ;;  %1410 = vadd.xlane.f32.xlu1 %v3013_v5 }
 0x238   : > { %v1352_v63 = vmul.f32 1.442695, %v1304_v61  ;;  %v1305_v3 = vsub.f32 %v2871_v32, %v1259_v2 }
 0x23a   : > { %2226 = vpow2.f32 %v1352_v63  ;;  %v1354_v9 = vmul.f32 1.442695, %v1305_v3 }
 0x23c   : > { %v3018_v4 = vpop.eup %2222  ;;  %2228 = vpow2.f32 %v1354_v9 }
 0x23d   : > { %1412 = vadd.xlane.f32.xlu0 %v3018_v4  ;;  %v1261_v6 = vpop.xlane.xlu0 %1260 }
 0x23e   : > { %v3021_v8 = vpop.eup %2224  ;;  %v1306_v30 = vsub.f32 %v2878_v47, %v1261_v6 }
 0x23f   : > { %v1263_v14 = vpop.xlane.xlu1 %1262  ;;  %1414 = vadd.xlane.f32.xlu1 %v3021_v8 }
 0x240   : > { %v1356_v22 = vmul.f32 1.442695, %v1306_v30  ;;  %v1307_v43 = vsub.f32 %v2883_v57, %v1263_v14 }
 0x242   : > { %2230 = vpow2.f32 %v1356_v22  ;;  %v1358_v32 = vmul.f32 1.442695, %v1307_v43 }
 0x244   : > { %v3026_v16 = vpop.eup %2226  ;;  %2232 = vpow2.f32 %v1358_v32 }
 0x245   : > { %1416 = vadd.xlane.f32.xlu0 %v3026_v16  ;;  %v1265_v20 = vpop.xlane.xlu0 %1264 }
 0x246   : > { %v3029_v50 = vpop.eup %2228  ;;  %v1308_v21 = vsub.f32 %v2890_v10, %v1265_v20 }
 0x247   : > { %v1267_v25 = vpop.xlane.xlu1 %1266  ;;  %1418 = vadd.xlane.f32.xlu1 %v3029_v50 }
 0x248   : > { %v1360_v47 = vmul.f32 1.442695, %v1308_v21  ;;  %v1309_v31 = vsub.f32 %v2895_v17, %v1267_v25 }
 0x24a   : > { %2234 = vpow2.f32 %v1360_v47  ;;  %v1362_v57 = vmul.f32 1.442695, %v1309_v31 }
 0x24c   : > { %v3034_v34 = vpop.eup %2230  ;;  %2236 = vpow2.f32 %v1362_v57 }
 0x24d   : > { %1420 = vadd.xlane.f32.xlu0 %v3034_v34  ;;  %v1269_v62 = vpop.xlane.xlu0 %1268 }
 0x24e   : > { %v3037_v38 = vpop.eup %2232  ;;  %v1310_v7 = vsub.f32 %v2902_v36, %v1269_v62 }
 0x24f   : > { %v1271_v40 = vpop.xlane.xlu1 %1270  ;;  %1422 = vadd.xlane.f32.xlu1 %v3037_v38 }
 0x250   : > { %v1364_v10 = vmul.f32 1.442695, %v1310_v7  ;;  %v1311_v44 = vsub.f32 %v2907_v46, %v1271_v40 }
 0x252   : > { %2238 = vpow2.f32 %v1364_v10  ;;  %v1366_v17 = vmul.f32 1.442695, %v1311_v44 }
 0x254   : > { %v3042_v45 = vpop.eup %2234  ;;  %2240 = vpow2.f32 %v1366_v17 }
 0x255   : > { %1424 = vadd.xlane.f32.xlu0 %v3042_v45  ;;  %v1273_v19 = vpop.xlane.xlu0 %1272 }
 0x256   : > { %v3045_v48 = vpop.eup %2236  ;;  %v1312_v27 = vsub.f32 %v2914_v1, %v1273_v19 }
 0x257   : > { %v1275_v53 = vpop.xlane.xlu1 %1274  ;;  %1426 = vadd.xlane.f32.xlu1 %v3045_v48 }
 0x258   : > { %v1368_v36 = vmul.f32 1.442695, %v1312_v27  ;;  %v1313_v55 = vsub.f32 %v2919_v12, %v1275_v53 }
 0x25a   : > { %2242 = vpow2.f32 %v1368_v36  ;;  %v1370_v46 = vmul.f32 1.442695, %v1313_v55 }
 0x25c   : > { %v3050_v51 = vpop.eup %2238  ;;  %2244 = vpow2.f32 %v1370_v46 }
 0x25d   : > { %1428 = vadd.xlane.f32.xlu0 %v3050_v51  ;;  %v1277_v41 = vpop.xlane.xlu0 %1276 }
 0x25e   : > { %v3053_v56 = vpop.eup %2240  ;;  %v1314_v49 = vsub.f32 %v2926_v29, %v1277_v41 }
 0x25f   : > { %v1279_v59 = vpop.xlane.xlu1 %1278  ;;  %1430 = vadd.xlane.f32.xlu1 %v3053_v56 }
 0x260   : > { %v1372_v1 = vmul.f32 1.442695, %v1314_v49  ;;  %v1315_v61 = vsub.f32 %v2931_v42, %v1279_v59 }
 0x262   : > { %2246 = vpow2.f32 %v1372_v1  ;;  %v1374_v12 = vmul.f32 1.442695, %v1315_v61 }
 0x264   : > { %v3058_v2 = vpop.eup %2242  ;;  %2248 = vpow2.f32 %v1374_v12 }
 0x265   : > { %1432 = vadd.xlane.f32.xlu0 %v3058_v2  ;;  %v1281_v63 = vpop.xlane.xlu0 %1280 }
 0x266   : > { %v3061_v3 = vpop.eup %2244  ;;  %v1316_v9 = vsub.f32 %v2938_v60, %v1281_v63 }
 0x267   : > { %v1283_v6 = vpop.xlane.xlu1 %1282  ;;  %1434 = vadd.xlane.f32.xlu1 %v3061_v3 }
 0x268   : > { %v1376_v29 = vmul.f32 1.442695, %v1316_v9  ;;  %v1317_v30 = vsub.f32 %v2943_v11, %v1283_v6 }
 0x26a   : > { %2250 = vpow2.f32 %v1376_v29  ;;  %v1378_v42 = vmul.f32 1.442695, %v1317_v30 }
 0x26c   : > { %v3066_v14 = vpop.eup %2246  ;;  %2252 = vpow2.f32 %v1378_v42 }
 0x26d   : > { %1436 = vadd.xlane.f32.xlu0 %v3066_v14  ;;  %v1285_v22 = vpop.xlane.xlu0 %1284 }
 0x26e   : > { %v3069_v43 = vpop.eup %2248  ;;  %v1318_v32 = vsub.f32 %v2950_v28, %v1285_v22 }
 0x26f   : > { %v1287_v20 = vpop.xlane.xlu1 %1286  ;;  %1438 = vadd.xlane.f32.xlu1 %v3069_v43 }
 0x270   : > { %v1380_v60 = vmul.f32 1.442695, %v1318_v32  ;;  %v1319_v21 = vsub.f32 %v2955_v33, %v1287_v20 }
 0x272   : > { %2254 = vpow2.f32 %v1380_v60  ;;  %v1382_v11 = vmul.f32 1.442695, %v1319_v21 }
 0x274   : > { %v3074_v25 = vpop.eup %2250  ;;  %2256 = vpow2.f32 %v1382_v11 }
 0x275   : > { %1440 = vadd.xlane.f32.xlu0 %v3074_v25 }
 0x276   : > { %v3077_v47 = vpop.eup %2252 }
 0x277   : > { %1442 = vadd.xlane.f32.xlu1 %v3077_v47 }
 0x27c   : > { %v3080_v31 = vpop.eup %2254 }
 0x27d   : > { %1444 = vadd.xlane.f32.xlu0 %v3080_v31 }
 0x27e   : > { %v3083_v28 = vpop.eup %2256 }
 0x27f   : > { %1446 = vadd.xlane.f32.xlu1 %v3083_v28 }
 0x292   : > { %v1385_v33 = vpop.xlane.xlu0 %1384 }
 0x293   : > { %2258 = vrcp.f32 %v1385_v33 }
 0x296   : > { %v1387_v57 = vpop.xlane.xlu1 %1386 }
 0x297   : > { %2260 = vrcp.f32 %v1387_v57 }
 0x29a   : > { %v1389_v62 = vpop.xlane.xlu0 %1388 }
 0x29b   : > { %2262 = vrcp.f32 %v1389_v62 }
 0x29d   : > { %v2259_v7 = vpop.eup %2258 }
 0x29e   : > { %v1480_v40 = vmul.f32 %v2259_v7, %v2962_v54  ;;  %v1391_v10 = vpop.xlane.xlu1 %1390 }
 0x29f   : > { %2264 = vrcp.f32 %v1391_v10 }
 0x2a0   : > { %1512 = vst [vmem:[%s3088_s20] sm:$0xff] %v1480_v40 }
 0x2a1   : > { %v2261_v44 = vpop.eup %2260 }
 0x2a2   : > { %v1481_v17 = vmul.f32 %v2261_v44, %v2966_v58  ;;  %v1393_v19 = vpop.xlane.xlu0 %1392 }
 0x2a3   : > { %2266 = vrcp.f32 %v1393_v19 }
 0x2a4   : > { %1513 = vst [vmem:[%s3088_s20 + $0x8] sm:$0xff] %v1481_v17  ;;  %v1395_v27 = vpop.xlane.xlu1 %1394 }
 0x2a5   : > { %v2263_v53 = vpop.eup %2262  ;;  %2268 = vrcp.f32 %v1395_v27 }
 0x2a6   : > { %v1482_v54 = vmul.f32 %v2263_v53, %v2970_v18 }
 0x2a8   : > { %1514 = vst [vmem:[%s3088_s20 + $0x10] sm:$0xff] %v1482_v54 }
 0x2a9   : > { %v2265_v36 = vpop.eup %2264 }
 0x2aa   : > { %v1483_v55 = vmul.f32 %v2265_v36, %v2974_v23  ;;  %v1397_v46 = vpop.xlane.xlu0 %1396 }
 0x2ab   : > { %2270 = vrcp.f32 %v1397_v46 }
 0x2ac   : > { %1515 = vst [vmem:[%s3088_s20 + $0x18] sm:$0xff] %v1483_v55  ;;  %v1399_v41 = vpop.xlane.xlu1 %1398 }
 0x2ad   : > { %v2267_v58 = vpop.eup %2266  ;;  %2272 = vrcp.f32 %v1399_v41 }
 0x2ae   : > { %v1484_v49 = vmul.f32 %v2267_v58, %v2978_v13 }
 0x2af   : > { %v2269_v59 = vpop.eup %2268 }
 0x2b0   : > { %1516 = vst [vmem:[%s3088_s20 + $0x20] sm:$0xff] %v1484_v49  ;;  %v1485_v1 = vmul.f32 %v2269_v59, %v2981_v15 }
 0x2b2   : > { %1517 = vst [vmem:[%s3088_s20 + $0x28] sm:$0xff] %v1485_v1  ;;  %v1401_v18 = vpop.xlane.xlu0 %1400 }
 0x2b3   : > { %2274 = vrcp.f32 %v1401_v18 }
 0x2b4   : > { %v1403_v61 = vpop.xlane.xlu1 %1402 }
 0x2b5   : > { %v2271_v23 = vpop.eup %2270  ;;  %2276 = vrcp.f32 %v1403_v61 }
 0x2b6   : > { %v1486_v12 = vmul.f32 %v2271_v23, %v2986_v24 }
 0x2b7   : > { %v2273_v63 = vpop.eup %2272 }
 0x2b8   : > { %1518 = vst [vmem:[%s3088_s20 + $0x30] sm:$0xff] %v1486_v12  ;;  %v1487_v9 = vmul.f32 %v2273_v63, %v2989_v26 }
 0x2ba   : > { %1519 = vst [vmem:[%s3088_s20 + $0x38] sm:$0xff] %v1487_v9  ;;  %v1405_v13 = vpop.xlane.xlu0 %1404 }
 0x2bb   : > { %2278 = vrcp.f32 %v1405_v13 }
 0x2bc   : > { %v1407_v6 = vpop.xlane.xlu1 %1406 }
 0x2bd   : > { %v2275_v15 = vpop.eup %2274  ;;  %2280 = vrcp.f32 %v1407_v6 }
 0x2be   : > { %v1488_v29 = vmul.f32 %v2275_v15, %v2994_v39 }
 0x2bf   : > { %v2277_v30 = vpop.eup %2276 }
 0x2c0   : > { %1520 = vst [vmem:[%s3088_s20 + $0x40] sm:$0xff] %v1488_v29  ;;  %v1489_v42 = vmul.f32 %v2277_v30, %v2997_v35 }
 0x2c2   : > { %1521 = vst [vmem:[%s3088_s20 + $0x48] sm:$0xff] %v1489_v42  ;;  %v1409_v24 = vpop.xlane.xlu0 %1408 }
 0x2c3   : > { %2282 = vrcp.f32 %v1409_v24 }
 0x2c4   : > { %v1411_v22 = vpop.xlane.xlu1 %1410 }
 0x2c5   : > { %v2279_v26 = vpop.eup %2278  ;;  %2284 = vrcp.f32 %v1411_v22 }
 0x2c6   : > { %v1490_v32 = vmul.f32 %v2279_v26, %v3002_v52 }
 0x2c7   : > { %v2281_v20 = vpop.eup %2280 }
 0x2c8   : > { %1522 = vst [vmem:[%s3088_s20 + $0x50] sm:$0xff] %v1490_v32  ;;  %v1491_v60 = vmul.f32 %v2281_v20, %v3005_v37 }
 0x2ca   : > { %1523 = vst [vmem:[%s3088_s20 + $0x58] sm:$0xff] %v1491_v60  ;;  %v1413_v39 = vpop.xlane.xlu0 %1412 }
 0x2cb   : > { %2286 = vrcp.f32 %v1413_v39 }
 0x2cc   : > { %v1415_v21 = vpop.xlane.xlu1 %1414 }
 0x2cd   : > { %v2283_v35 = vpop.eup %2282  ;;  %2288 = vrcp.f32 %v1415_v21 }
 0x2ce   : > { %v1492_v11 = vmul.f32 %v2283_v35, %v3010_v0 }
 0x2cf   : > { %v2285_v33 = vpop.eup %2284 }
 0x2d0   : > { %1524 = vst [vmem:[%s3088_s20 + $0x60] sm:$0xff] %v1492_v11  ;;  %v1493_v57 = vmul.f32 %v2285_v33, %v3013_v5 }
 0x2d2   : > { %1525 = vst [vmem:[%s3088_s20 + $0x68] sm:$0xff] %v1493_v57  ;;  %v1417_v52 = vpop.xlane.xlu0 %1416 }
 0x2d3   : > { %2290 = vrcp.f32 %v1417_v52 }
 0x2d4   : > { %v1419_v62 = vpop.xlane.xlu1 %1418 }
 0x2d5   : > { %v2287_v37 = vpop.eup %2286  ;;  %2292 = vrcp.f32 %v1419_v62 }
 0x2d6   : > { %v1494_v7 = vmul.f32 %v2287_v37, %v3018_v4 }
 0x2d7   : > { %v2289_v40 = vpop.eup %2288 }
 0x2d8   : > { %1526 = vst [vmem:[%s3088_s20 + $0x70] sm:$0xff] %v1494_v7  ;;  %v1495_v10 = vmul.f32 %v2289_v40, %v3021_v8 }
 0x2da   : > { %1527 = vst [vmem:[%s3088_s20 + $0x78] sm:$0xff] %v1495_v10  ;;  %v1421_v0 = vpop.xlane.xlu0 %1420 }
 0x2db   : > { %2294 = vrcp.f32 %v1421_v0 }
 0x2dc   : > { %v1423_v44 = vpop.xlane.xlu1 %1422 }
 0x2dd   : > { %v2291_v5 = vpop.eup %2290  ;;  %2296 = vrcp.f32 %v1423_v44 }
 0x2de   : > { %v1496_v17 = vmul.f32 %v2291_v5, %v3026_v16 }
 0x2df   : > { %v2293_v19 = vpop.eup %2292 }
 0x2e0   : > { %1528 = vst [vmem:[%s3088_s20 + $0x80] sm:$0xff] %v1496_v17  ;;  %v1497_v27 = vmul.f32 %v2293_v19, %v3029_v50 }
 0x2e2   : > { %1529 = vst [vmem:[%s3088_s20 + $0x88] sm:$0xff] %v1497_v27  ;;  %v1425_v4 = vpop.xlane.xlu0 %1424 }
 0x2e3   : > { %2298 = vrcp.f32 %v1425_v4 }
 0x2e4   : > { %v1427_v53 = vpop.xlane.xlu1 %1426 }
 0x2e5   : > { %v2295_v8 = vpop.eup %2294  ;;  %2300 = vrcp.f32 %v1427_v53 }
 0x2e6   : > { %v1498_v54 = vmul.f32 %v2295_v8, %v3034_v34 }
 0x2e7   : > { %v2297_v36 = vpop.eup %2296 }
 0x2e8   : > { %1530 = vst [vmem:[%s3088_s20 + $0x90] sm:$0xff] %v1498_v54  ;;  %v1499_v55 = vmul.f32 %v2297_v36, %v3037_v38 }
 0x2ea   : > { %1531 = vst [vmem:[%s3088_s20 + $0x98] sm:$0xff] %v1499_v55  ;;  %v1429_v16 = vpop.xlane.xlu0 %1428 }
 0x2eb   : > { %2302 = vrcp.f32 %v1429_v16 }
 0x2ec   : > { %v1431_v46 = vpop.xlane.xlu1 %1430 }
 0x2ed   : > { %v2299_v50 = vpop.eup %2298  ;;  %2304 = vrcp.f32 %v1431_v46 }
 0x2ee   : > { %v1500_v41 = vmul.f32 %v2299_v50, %v3042_v45 }
 0x2ef   : > { %v2301_v58 = vpop.eup %2300 }
 0x2f0   : > { %1532 = vst [vmem:[%s3088_s20 + $0xa0] sm:$0xff] %v1500_v41  ;;  %v1501_v49 = vmul.f32 %v2301_v58, %v3045_v48 }
 0x2f2   : > { %1533 = vst [vmem:[%s3088_s20 + $0xa8] sm:$0xff] %v1501_v49  ;;  %v1433_v34 = vpop.xlane.xlu0 %1432 }
 0x2f3   : > { %2306 = vrcp.f32 %v1433_v34 }
 0x2f4   : > { %v1435_v59 = vpop.xlane.xlu1 %1434 }
 0x2f5   : > { %v2303_v38 = vpop.eup %2302  ;;  %2308 = vrcp.f32 %v1435_v59 }
 0x2f6   : > { %v1502_v1 = vmul.f32 %v2303_v38, %v3050_v51 }
 0x2f7   : > { %v2305_v18 = vpop.eup %2304 }
 0x2f8   : > { %1534 = vst [vmem:[%s3088_s20 + $0xb0] sm:$0xff] %v1502_v1  ;;  %v1503_v61 = vmul.f32 %v2305_v18, %v3053_v56 }
 0x2fa   : > { %1535 = vst [vmem:[%s3088_s20 + $0xb8] sm:$0xff] %v1503_v61  ;;  %v1437_v45 = vpop.xlane.xlu0 %1436 }
 0x2fb   : > { %2310 = vrcp.f32 %v1437_v45 }
 0x2fc   : > { %v1439_v23 = vpop.xlane.xlu1 %1438 }
 0x2fd   : > { %v2307_v48 = vpop.eup %2306  ;;  %2312 = vrcp.f32 %v1439_v23 }
 0x2fe   : > { %v1504_v12 = vmul.f32 %v2307_v48, %v3058_v2 }
 0x2ff   : > { %v2309_v63 = vpop.eup %2308 }
 0x300   : > { %1536 = vst [vmem:[%s3088_s20 + $0xc0] sm:$0xff] %v1504_v12  ;;  %v1505_v9 = vmul.f32 %v2309_v63, %v3061_v3 }
 0x302   : > { %1537 = vst [vmem:[%s3088_s20 + $0xc8] sm:$0xff] %v1505_v9  ;;  %v1441_v51 = vpop.xlane.xlu0 %1440 }
 0x303   : > { %2314 = vrcp.f32 %v1441_v51 }
 0x304   : > { %v1443_v13 = vpop.xlane.xlu1 %1442 }
 0x305   : > { %v2311_v56 = vpop.eup %2310  ;;  %2316 = vrcp.f32 %v1443_v13 }
 0x306   : > { %v1506_v6 = vmul.f32 %v2311_v56, %v3066_v14 }
 0x307   : > { %v2313_v15 = vpop.eup %2312 }
 0x308   : > { %1538 = vst [vmem:[%s3088_s20 + $0xd0] sm:$0xff] %v1506_v6  ;;  %v1507_v2 = vmul.f32 %v2313_v15, %v3069_v43 }
 0x30a   : > { %1539 = vst [vmem:[%s3088_s20 + $0xd8] sm:$0xff] %v1507_v2  ;;  %v1445_v29 = vpop.xlane.xlu0 %1444 }
 0x30b   : > { %2318 = vrcp.f32 %v1445_v29 }
 0x30c   : > { %v1447_v3 = vpop.xlane.xlu1 %1446 }
 0x30d   : > { %v2315_v30 = vpop.eup %2314  ;;  %2320 = vrcp.f32 %v1447_v3 }
 0x30e   : > { %v1508_v42 = vmul.f32 %v2315_v30, %v3074_v25 }
 0x30f   : > { %v2317_v24 = vpop.eup %2316 }
 0x310   : > { %1540 = vst [vmem:[%s3088_s20 + $0xe0] sm:$0xff] %v1508_v42  ;;  %v1509_v14 = vmul.f32 %v2317_v24, %v3077_v47 }
 0x312   : > { %1541 = vst [vmem:[%s3088_s20 + $0xe8] sm:$0xff] %v1509_v14 }
 0x315   : > { %v2319_v43 = vpop.eup %2318 }
 0x316   : > { %v1510_v22 = vmul.f32 %v2319_v43, %v3080_v31 }
 0x317   : > { %v2321_v26 = vpop.eup %2320 }
 0x318   : > { %1542 = vst [vmem:[%s3088_s20 + $0xf0] sm:$0xff] %v1510_v22  ;;  %v1511_v25 = vmul.f32 %v2321_v26, %v3083_v28 }
 0x31a   : > { %1543 = vst [vmem:[%s3088_s20 + $0xf8] sm:$0xff] %v1511_v25 }
 0x31b   : > { %2421 = shalt.err (!%p2418_p2)
}
 0x31c   : > { %s2422_s11 = scalar_lea.hbm %s3155_s23, 4096  ;;  %s2426_s29 = scalar_lea.hbm %s3207_s3, 8192 }
 0x31d   : > { %p2423_p13 = scmp.ne.s32.totalorder %s3155_s23, %s2422_s11  ;;  %p2427_p4 = scmp.lt.u32.totalorder %s3155_s23, %s3207_s3 }
 0x31e   : > { %p2428_p5 = scmp.lt.u32.totalorder %s2426_s29, %s2422_s11  ;;  %p2430_p11 = scmp.lt.u32.totalorder %s2422_s11, %s3155_s23 }
 0x31f   : > { %p2424_p6 = pnand %p2423_p13, %p3221_p0 }
 0x320   : > { %p2429_p8 = por %p2428_p5, %p2427_p4 }
 0x321   : > { %p2425_p10 = pneg %p2424_p6 }
 0x322   : > { %p2431_p1 = por %p2430_p11, %p2429_p8 }
 0x324   : > { %p2432_p3 = pnand %p2431_p1, %p2425_p10 }
 0x326   : > { %2435 = shalt.err (!%p2432_p3)
}
 0x327   : > { %s2488_s18 = smov 128   ;;  %s2489_s20 = smov 8  }
 0x328   : > { %2003 = dma.vmem_to_hbm [thread:$0]  (%p3221_p0), %s3157_s26, 4096, %s3155_s23, %s1545_s16, %s2488_s18, %s2488_s18, %s2489_s20  }
 0x329 PF: > { %s1573_s21 = sand.u32 1, %s2466_s12   ;;  %p3222_p7 = scmp.ne.s32.totalorder %s3212_s19, 0 }
 0x32a   : > { %p3223_p9 = scmp.ge.s32.totalorder %s2478_s15, 2  ;;  %s1574_s27 = scalar_lea.sflag [#allocation4], %s1573_s21 }
 0x32c   : > { %p2017_p12 = pnand %p3223_p9, %p3222_p7 }
 0x32e   : > { %2461 = dma.done.wait (!%p2017_p12), %s1574_s27, 4096  }
 0x32f   : > { %2463 = vsyncadd (!%p2017_p12), %s1574_s27, 4294963200  ;;  %p17_p2 = scmp.ge.s32.totalorder %s2621_s5, 4   ;;  %s3224_s12 = smov %s2470_s13 }
 0x330   : > { %s3225_s13 = smov %s2474_s14  ;;  %s3226_s14 = smov %s2637_s8 }
 0x331   : > { %s3227_s15 = smov %s2621_s5  ;;  %19 = sbr.rel (!%p17_p2) target bundleno = 6 (0x6), region = 85 }
 0x338   :  { %1579 = vsyncpa [#allocation3], 1 }
 0x339   :  { %1581 = vsyncpa [#allocation3 + $0x1], 1 }
 0x33a   :  { %1582 = vsyncpa [#allocation6], 1 }
 0x33b   :  { %1583 = vsyncpa [#allocation4], 1 }
 0x33c   :  { %1585 = vsyncpa [#allocation4 + $0x1], 1 }

</bundles_post_ra>
